<compile_context>
chip_gen: v7x
topology: tpu7x:2x2x1
jax: 0.10.0
libtpu: 0.0.40
codegen_flags: <defaults>
</compile_context>

<pallas_src>
import functools

import jax
import jax.numpy as jnp
import numpy as np
from jax.experimental import pallas as pl
from jax.experimental.pallas import tpu as pltpu

# Model hyper-parameters hard-coded by the PyTorch `Dense` module.
FIRST_CH = 32                               # first_conv output channels
GROWTH = 16                                 # DenseBlock growth rate
NUM_LAYERS = 4                              # layers per DenseBlock
BINS = 4                                    # AdaptiveMaxPool1d output size
HIDDEN = 64                                 # fc1 width
C1 = FIRST_CH + NUM_LAYERS * GROWTH         # 96  (channels after dense1)
C1T = C1 // 2                               # 48  (channels after transition)
C2 = C1T + NUM_LAYERS * GROWTH              # 112 (channels after dense2)
CP = 128                                    # lane-padded channel width
BN_EPS = 1e-5

MATMUL_DTYPE = jnp.bfloat16                 # MXU operand dtype (f32 accumulation)


# ----------------------------------------------------------------------------
# Fused forward kernel (one batch tile per grid step)
# ----------------------------------------------------------------------------
def _dense_forward_kernel(
    x_ref,
    w0_ref, b0_ref,
    d1_scale_ref, d1_shift_ref, d1_w_ref, d1_b_ref,
    t_scale_ref, t_shift_ref, t_w_ref, t_b_ref,
    d2_scale_ref, d2_shift_ref, d2_w_ref, d2_b_ref,
    w1_ref, b1_ref, w2_ref, b2_ref,
    o_ref,
    a_ref, f_ref,
    *, bt, L):
  f32 = jnp.float32
  Lh = L // 2
  halo_zero = jnp.zeros((bt, CP), dtype=a_ref.dtype)

  # Zero ONLY the conv halo rows (interior rows are always overwritten before
  # being read).  Done every grid step so the kernel stays correct when the
  # grid is sharded across TensorCores.
  a_ref[:, 0, :] = halo_zero
  a_ref[:, L + 1, :] = halo_zero

  def conv3(Lc, w_ref, li, b_row):
    """3-tap conv as three K=128 MXU dots on shifted bf16 windows, f32 acc."""
    t0 = a_ref[:, 0:Lc, :].reshape(bt * Lc, CP)
    t1 = a_ref[:, 1:Lc + 1, :].reshape(bt * Lc, CP)
    t2 = a_ref[:, 2:Lc + 2, :].reshape(bt * Lc, CP)
    y = jnp.dot(t0, w_ref[li, 0:CP, :], preferred_element_type=f32)
    y = y + jnp.dot(t1, w_ref[li, CP:2 * CP, :], preferred_element_type=f32)
    y = y + jnp.dot(t2, w_ref[li, 2 * CP:3 * CP, :], preferred_element_type=f32)
    return y + b_row                                   # (bt*Lc, CP) f32

  # ---- first_conv: Conv1d(1, 32, k=3, pad=1) as three VPU broadcast FMAs ----
  y0 = (x_ref[:, 0:L, :] * w0_ref[0:1, :]
        + x_ref[:, 1:L + 1, :] * w0_ref[1:2, :]
        + x_ref[:, 2:L + 2, :] * w0_ref[2:3, :]
        + b0_ref[...])                                 # (bt, L, CP) f32
  f_ref[...] = y0.reshape(bt * L, CP)                  # cols >= 32 are zero

  # ---- dense block 1: [BN -> ReLU -> Conv3 -> concat] x 4 -------------------
  for i in range(NUM_LAYERS):
    act = jnp.maximum(
        f_ref[...] * d1_scale_ref[i:i + 1, :] + d1_shift_ref[i:i + 1, :], 0.0)
    a_ref[:, 1:L + 1, :] = act.reshape(bt, L, CP).astype(a_ref.dtype)
    # new 16 channels sit at their layer offset inside a full 128-wide tile:
    # lane-dense accumulate instead of a masked 16-lane partial store.
    f_ref[...] += conv3(L, d1_w_ref, i, d1_b_ref[i:i + 1, :])

  # ---- transition: BN -> ReLU -> AvgPool(2) -> Conv1d(k=1) ------------------
  # (avg-pool commuted ahead of the linear 1x1 conv: half the matmul M)
  act = jnp.maximum(f_ref[...] * t_scale_ref[...] + t_shift_ref[...], 0.0)
  f_ref[...] = act                                     # stage f32 activation
  pooled = (f_ref[pl.ds(0, bt * Lh, stride=2), :]
            + f_ref[pl.ds(1, bt * Lh, stride=2), :]) * 0.5
  y = jnp.dot(pooled.astype(MATMUL_DTYPE), t_w_ref[...],
              preferred_element_type=f32) + t_b_ref[...]
  f_ref[0:bt * Lh, :] = y                              # cols >= 48 are zero

  # ---- dense block 2 (reuses the stage-1 scratch windows) -------------------
  a_ref[:, Lh + 1, :] = halo_zero                      # fresh right halo row
  for i in range(NUM_LAYERS):
    act = jnp.maximum(
        f_ref[0:bt * Lh, :] * d2_scale_ref[i:i + 1, :]
        + d2_shift_ref[i:i + 1, :], 0.0)
    a_ref[:, 1:Lh + 1, :] = act.reshape(bt, Lh, CP).astype(a_ref.dtype)
    f_ref[0:bt * Lh, :] += conv3(Lh, d2_w_ref, i, d2_b_ref[i:i + 1, :])

  # ---- head: AdaptiveMaxPool1d(BINS) + flatten + fc1 + ReLU + fc2 -----------
  feats = f_ref[0:bt * Lh, :].reshape(bt, Lh, CP)
  pooled = jnp.concatenate(
      [jnp.max(feats[:, (p * Lh) // BINS:-(-((p + 1) * Lh) // BINS), :], axis=1)
       for p in range(BINS)], axis=-1)                 # (bt, BINS*CP)
  h = jnp.dot(pooled.astype(MATMUL_DTYPE), w1_ref[...],
              preferred_element_type=f32) + b1_ref[...]
  h = jnp.maximum(h, 0.0)
  o_ref[...] = jnp.dot(h.astype(MATMUL_DTYPE), w2_ref[...],
                       preferred_element_type=f32) + b2_ref[...]


# ----------------------------------------------------------------------------
# Wrapper
# ----------------------------------------------------------------------------
def dense_forward(x, params, *, batch_tile=None):
  B, L = x.shape
  if L % 2:
    raise ValueError("sequence length must be even (AvgPool1d(2))")
  Lh = L // 2
  dout = params["b2"].shape[-1]

  # Per-batch-element VMEM footprint: bf16 halo scratch + f32 feature scratch
  # + two pipelined (bt, L+2, 1) f32 input blocks (lane-padded).
  per_b = (L + 2) * CP * 2 + L * CP * 4 + 2 * (L + 2) * CP * 4
  budget = 20 << 20                      # conservative: fits v7x/v5e w/ headroom

  if batch_tile is None:
    bt = B
    if B >= 16 and B % 8 == 0:
      # Prefer >= 2 grid steps (v7x dual-TC + DMA/compute overlap) with
      # multiple-of-8 tiles, the largest that fits the VMEM budget.
      cands = [t for t in range(8, B // 2 + 1, 8) if B % t == 0]
      if cands:
        fit = [t for t in cands if t * per_b <= budget]
        bt = max(fit) if fit else min(cands)
  else:
    bt = batch_tile
  if B % bt or not (bt == B or bt % 8 == 0):
    raise ValueError("batch_tile must divide B and be a multiple of 8 (or B)")
  nbt = B // bt

  # Halo'd, un-padded input: (B, L+2, 1); the two zero rows implement the
  # first conv's zero padding.
  x_in = jnp.pad(x, ((0, 0), (1, 1)))[:, :, None]

  def const(ndim):
    return lambda i: (0,) * ndim

  in_specs = [
      pl.BlockSpec((bt, L + 2, 1), lambda i: (i, 0, 0)),      # x (halo'd)
      pl.BlockSpec((3, CP), const(2)),                        # w0
      pl.BlockSpec((1, CP), const(2)),                        # b0
      pl.BlockSpec((NUM_LAYERS, CP), const(2)),               # d1_scale
      pl.BlockSpec((NUM_LAYERS, CP), const(2)),               # d1_shift
      pl.BlockSpec((NUM_LAYERS, 3 * CP, CP), const(3)),       # d1_w
      pl.BlockSpec((NUM_LAYERS, CP), const(2)),               # d1_b
      pl.BlockSpec((1, CP), const(2)),                        # t_scale
      pl.BlockSpec((1, CP), const(2)),                        # t_shift
      pl.BlockSpec((CP, CP), const(2)),                       # t_w
      pl.BlockSpec((1, CP), const(2)),                        # t_b
      pl.BlockSpec((NUM_LAYERS, CP), const(2)),               # d2_scale
      pl.BlockSpec((NUM_LAYERS, CP), const(2)),               # d2_shift
      pl.BlockSpec((NUM_LAYERS, 3 * CP, CP), const(3)),       # d2_w
      pl.BlockSpec((NUM_LAYERS, CP), const(2)),               # d2_b
      pl.BlockSpec((BINS * CP, HIDDEN), const(2)),            # w1
      pl.BlockSpec((1, HIDDEN), const(2)),                    # b1
      pl.BlockSpec((HIDDEN, dout), const(2)),                 # w2
      pl.BlockSpec((1, dout), const(2)),                      # b2
  ]
  scratch_shapes = [
      pltpu.VMEM((bt, L + 2, CP), MATMUL_DTYPE),   # shared bf16 halo activations
      pltpu.VMEM((bt * L, CP), jnp.float32),       # shared f32 feature map
  ]

  weight_bytes = 0
  for k in ("w0", "b0", "d1_scale", "d1_shift", "d1_w", "d1_b",
            "t_scale", "t_shift", "t_w", "t_b",
            "d2_scale", "d2_shift", "d2_w", "d2_b", "w1", "b1", "w2", "b2"):
    v = params[k]
    weight_bytes += int(np.prod(v.shape)) * np.dtype(v.dtype).itemsize
  vmem_est = bt * per_b + 2 * weight_bytes + 2 * bt * CP * 4
  vmem_limit = int(min(100 << 20, max(32 << 20, 1.5 * vmem_est + (4 << 20))))

  kernel = functools.partial(_dense_forward_kernel, bt=bt, L=L)
  return pl.pallas_call(
      kernel,
      out_shape=jax.ShapeDtypeStruct((B, dout), jnp.float32),
      grid=(nbt,),
      in_specs=in_specs,
      out_specs=pl.BlockSpec((bt, dout), lambda i: (i, 0)),
      scratch_shapes=scratch_shapes,
      compiler_params=pltpu.CompilerParams(
          dimension_semantics=("parallel",),
          vmem_limit_bytes=vmem_limit),
  )(x_in, params["w0"], params["b0"],
    params["d1_scale"], params["d1_shift"], params["d1_w"], params["d1_b"],
    params["t_scale"], params["t_shift"], params["t_w"], params["t_b"],
    params["d2_scale"], params["d2_shift"], params["d2_w"], params["d2_b"],
    params["w1"], params["b1"], params["w2"], params["b2"])


# ----------------------------------------------------------------------------
# Deterministic "PyTorch-like" raw parameters
# ----------------------------------------------------------------------------
def init_raw_params(key, output_dim):
  keys = iter(jax.random.split(key, 64))
  nk = lambda: next(keys)
  f32 = jnp.float32

  def conv_w(cin, cout, k=3):
    return jax.random.normal(nk(), (k, cin, cout), f32) / np.sqrt(k * cin)

  def bn(c):
    return dict(gamma=1.0 + 0.1 * jax.random.normal(nk(), (c,), f32),
                beta=0.1 * jax.random.normal(nk(), (c,), f32),
                mean=0.05 * jax.random.normal(nk(), (c,), f32),
                var=1.0 + 0.1 * jax.random.uniform(nk(), (c,), f32))

  raw = dict(first_w=conv_w(1, FIRST_CH),
             first_b=0.05 * jax.random.normal(nk(), (FIRST_CH,), f32))

  def dense_block(cin0):
    layers, c = [], cin0
    for _ in range(NUM_LAYERS):
      lp = bn(c)
      lp["w"] = conv_w(c, GROWTH)
      lp["b"] = 0.05 * jax.random.normal(nk(), (GROWTH,), f32)
      layers.append(lp)
      c += GROWTH
    return layers

  raw["dense1"] = dense_block(FIRST_CH)
  tr = bn(C1)
  tr["w"] = jax.random.normal(nk(), (C1, C1T), f32) / np.sqrt(C1)
  tr["b"] = 0.05 * jax.random.normal(nk(), (C1T,), f32)
  raw["trans"] = tr
  raw["dense2"] = dense_block(C1T)
  raw["fc1_w"] = jax.random.normal(nk(), (C2 * BINS, HIDDEN), f32) / np.sqrt(C2 * BINS)
  raw["fc1_b"] = 0.05 * jax.random.normal(nk(), (HIDDEN,), f32)
  raw["fc2_w"] = jax.random.normal(nk(), (HIDDEN, output_dim), f32) / np.sqrt(HIDDEN)
  raw["fc2_b"] = 0.05 * jax.random.normal(nk(), (output_dim,), f32)
  return raw


# ----------------------------------------------------------------------------
# Pack raw params into the kernel layout (BN folded, lane-padded, bf16 weights,
# dense-layer outputs placed at their channel offset inside a 128-wide tile)
# ----------------------------------------------------------------------------
def pack_params(raw):
  f32 = jnp.float32

  def bn_fold(p, c):
    scale = p["gamma"] / jnp.sqrt(p["var"] + BN_EPS)
    shift = p["beta"] - p["mean"] * scale
    return (jnp.zeros((1, CP), f32).at[0, :c].set(scale),
            jnp.zeros((1, CP), f32).at[0, :c].set(shift))

  def pack_conv3(w, b, col_off):
    _, cin, cout = w.shape
    wp = jnp.zeros((3 * CP, CP), f32)
    for t in range(3):
      wp = wp.at[t * CP:t * CP + cin, col_off:col_off + cout].set(w[t])
    bp = jnp.zeros((1, CP), f32).at[0, col_off:col_off + cout].set(b)
    return wp.astype(MATMUL_DTYPE), bp

  p = {}
  p["w0"] = (jnp.zeros((3, CP), f32)
             .at[:, :FIRST_CH].set(raw["first_w"][:, 0, :]))
  p["b0"] = jnp.zeros((1, CP), f32).at[0, :FIRST_CH].set(raw["first_b"])

  def pack_block(block, prefix, cin0):
    scales, shifts, ws, bs = [], [], [], []
    c = cin0
    for lp in block:
      s, sh = bn_fold(lp, c)
      w, b = pack_conv3(lp["w"], lp["b"], c)   # new channels land at offset c
      scales.append(s); shifts.append(sh); ws.append(w); bs.append(b)
      c += GROWTH
    p[prefix + "_scale"] = jnp.concatenate(scales, axis=0)
    p[prefix + "_shift"] = jnp.concatenate(shifts, axis=0)
    p[prefix + "_w"] = jnp.stack(ws, axis=0)
    p[prefix + "_b"] = jnp.concatenate(bs, axis=0)

  pack_block(raw["dense1"], "d1", FIRST_CH)
  p["t_scale"], p["t_shift"] = bn_fold(raw["trans"], C1)
  p["t_w"] = (jnp.zeros((CP, CP), f32)
              .at[:C1, :C1T].set(raw["trans"]["w"]).astype(MATMUL_DTYPE))
  p["t_b"] = jnp.zeros((1, CP), f32).at[0, :C1T].set(raw["trans"]["b"])
  pack_block(raw["dense2"], "d2", C1T)

  # fc1: torch flatten order is (channel, bin); kernel pools bin-major with
  # lane-padded channels -> permute to (bin, channel) and zero-pad channels.
  w1_perm = raw["fc1_w"].reshape(C2, BINS, HIDDEN).transpose(1, 0, 2)
  p["w1"] = (jnp.zeros((BINS, CP, HIDDEN), f32)
             .at[:, :C2, :].set(w1_perm)
             .reshape(BINS * CP, HIDDEN).astype(MATMUL_DTYPE))
  p["b1"] = raw["fc1_b"].reshape(1, HIDDEN).astype(f32)
  p["w2"] = raw["fc2_w"].astype(MATMUL_DTYPE)
  p["b2"] = raw["fc2_b"].reshape(1, -1).astype(f32)
  return p


# ----------------------------------------------------------------------------
# Pure-JAX reference (mirrors the PyTorch module; same precision policy as the
# kernel: f32 first conv / BN / pooling, bf16 matmul operands, f32 accumulate)
# ----------------------------------------------------------------------------
def ref_forward(x, raw):
  f32 = jnp.float32
  bf = lambda a: a.astype(MATMUL_DTYPE)
  B, L = x.shape
  Lh = L // 2

  def bn_fold(p):
    scale = p["gamma"] / jnp.sqrt(p["var"] + BN_EPS)
    return scale, p["beta"] - p["mean"] * scale

  def conv3(act_bf, w, b):                   # act_bf: (B, Lc, C) bf16
    Lc = act_bf.shape[1]
    ap = jnp.pad(act_bf, ((0, 0), (1, 1), (0, 0)))
    y = b.astype(f32)
    for t in range(3):
      y = y + jnp.einsum("blc,cd->bld", ap[:, t:t + Lc], bf(w[t]),
                         preferred_element_type=f32)
    return y

  # first conv in pure f32 (matches the kernel's VPU path)
  xp = jnp.pad(x, ((0, 0), (1, 1)))
  w0 = raw["first_w"]
  feats = (xp[:, 0:L, None] * w0[0, 0] + xp[:, 1:L + 1, None] * w0[1, 0]
           + xp[:, 2:L + 2, None] * w0[2, 0] + raw["first_b"])

  for lp in raw["dense1"]:
    s, sh = bn_fold(lp)
    act = bf(jnp.maximum(feats * s + sh, 0.0))
    feats = jnp.concatenate([feats, conv3(act, lp["w"], lp["b"])], axis=-1)

  # transition: BN/ReLU (f32) -> avg-pool(2) (f32) -> 1x1 conv (bf16 operands)
  s, sh = bn_fold(raw["trans"])
  act = jnp.maximum(feats * s + sh, 0.0)
  pooled = act.reshape(B, Lh, 2, -1).mean(axis=2)
  feats = jnp.einsum("blc,cd->bld", bf(pooled), bf(raw["trans"]["w"]),
                     preferred_element_type=f32) + raw["trans"]["b"]

  for lp in raw["dense2"]:
    s, sh = bn_fold(lp)
    act = bf(jnp.maximum(feats * s + sh, 0.0))
    feats = jnp.concatenate([feats, conv3(act, lp["w"], lp["b"])], axis=-1)

  C = feats.shape[-1]
  pooled = []
  for p in range(BINS):
    s0 = (p * Lh) // BINS
    e0 = -(-((p + 1) * Lh) // BINS)
    pooled.append(jnp.max(feats[:, s0:e0, :], axis=1))
  pooled = jnp.stack(pooled, axis=1)                            # (B, BINS, C)
  flat = jnp.transpose(pooled, (0, 2, 1)).reshape(B, C * BINS)  # torch order
  h = jnp.maximum(jnp.dot(bf(flat), bf(raw["fc1_w"]),
                          preferred_element_type=f32) + raw["fc1_b"], 0.0)
  return jnp.dot(bf(h), bf(raw["fc2_w"]),
                 preferred_element_type=f32) + raw["fc2_b"]


if __name__ == "__main__":
  B, input_dim, output_dim = 2, 16, 8
  key = jax.random.PRNGKey(0)
  kx, kp = jax.random.split(key)
  x = jax.random.normal(kx, (B, input_dim), jnp.float32)
  raw = init_raw_params(kp, output_dim)
  params = pack_params(raw)

  out = jax.jit(dense_forward)(x, params)
  out = jax.block_until_ready(out)
  assert out.shape == (B, output_dim)

  ref = jax.block_until_ready(ref_forward(x, raw))
  np.testing.assert_allclose(np.asarray(out), np.asarray(ref),
                             rtol=1e-2, atol=1e-2)
  print("KERNEL_OK")
</pallas_src>

<mosaic_0001>
module attributes {stable_mosaic.version = 11 : i64} {
  func.func @_dense_forward_kernel(%arg0: i32, %arg1: memref<2x18x1xf32, #tpu.memory_space<vmem>>, %arg2: memref<3x128xf32, #tpu.memory_space<vmem>>, %arg3: memref<1x128xf32, #tpu.memory_space<vmem>>, %arg4: memref<4x128xf32, #tpu.memory_space<vmem>>, %arg5: memref<4x128xf32, #tpu.memory_space<vmem>>, %arg6: memref<4x384x128xbf16, #tpu.memory_space<vmem>>, %arg7: memref<4x128xf32, #tpu.memory_space<vmem>>, %arg8: memref<1x128xf32, #tpu.memory_space<vmem>>, %arg9: memref<1x128xf32, #tpu.memory_space<vmem>>, %arg10: memref<128x128xbf16, #tpu.memory_space<vmem>>, %arg11: memref<1x128xf32, #tpu.memory_space<vmem>>, %arg12: memref<4x128xf32, #tpu.memory_space<vmem>>, %arg13: memref<4x128xf32, #tpu.memory_space<vmem>>, %arg14: memref<4x384x128xbf16, #tpu.memory_space<vmem>>, %arg15: memref<4x128xf32, #tpu.memory_space<vmem>>, %arg16: memref<512x64xbf16, #tpu.memory_space<vmem>>, %arg17: memref<1x64xf32, #tpu.memory_space<vmem>>, %arg18: memref<64x8xbf16, #tpu.memory_space<vmem>>, %arg19: memref<1x8xf32, #tpu.memory_space<vmem>>, %arg20: memref<2x8xf32, #tpu.memory_space<vmem>>, %arg21: memref<2x18x128xbf16, #tpu.memory_space<vmem>>, %arg22: memref<32x128xf32, #tpu.memory_space<vmem>>) attributes {dimension_semantics = [#tpu.dimension_semantics<parallel>], iteration_bounds = array<i64: 1>, scalar_prefetch = 0 : i64, scratch_operands = 2 : i64, tpu.core_type = #tpu.core_type<tc>, window_params = [{transform_indices = @transform_0, window_bounds = array<i64: 2, 18, 1>}, {pipeline_mode = #tpu.pipeline_mode<synchronous>, transform_indices = @transform_1, window_bounds = array<i64: 3, 128>}, {pipeline_mode = #tpu.pipeline_mode<synchronous>, transform_indices = @transform_2, window_bounds = array<i64: 1, 128>}, {pipeline_mode = #tpu.pipeline_mode<synchronous>, transform_indices = @transform_3, window_bounds = array<i64: 4, 128>}, {pipeline_mode = #tpu.pipeline_mode<synchronous>, transform_indices = @transform_4, window_bounds = array<i64: 4, 128>}, {pipeline_mode = #tpu.pipeline_mode<synchronous>, transform_indices = @transform_5, window_bounds = array<i64: 4, 384, 128>}, {pipeline_mode = #tpu.pipeline_mode<synchronous>, transform_indices = @transform_6, window_bounds = array<i64: 4, 128>}, {pipeline_mode = #tpu.pipeline_mode<synchronous>, transform_indices = @transform_7, window_bounds = array<i64: 1, 128>}, {pipeline_mode = #tpu.pipeline_mode<synchronous>, transform_indices = @transform_8, window_bounds = array<i64: 1, 128>}, {pipeline_mode = #tpu.pipeline_mode<synchronous>, transform_indices = @transform_9, window_bounds = array<i64: 128, 128>}, {pipeline_mode = #tpu.pipeline_mode<synchronous>, transform_indices = @transform_10, window_bounds = array<i64: 1, 128>}, {pipeline_mode = #tpu.pipeline_mode<synchronous>, transform_indices = @transform_11, window_bounds = array<i64: 4, 128>}, {pipeline_mode = #tpu.pipeline_mode<synchronous>, transform_indices = @transform_12, window_bounds = array<i64: 4, 128>}, {pipeline_mode = #tpu.pipeline_mode<synchronous>, transform_indices = @transform_13, window_bounds = array<i64: 4, 384, 128>}, {pipeline_mode = #tpu.pipeline_mode<synchronous>, transform_indices = @transform_14, window_bounds = array<i64: 4, 128>}, {pipeline_mode = #tpu.pipeline_mode<synchronous>, transform_indices = @transform_15, window_bounds = array<i64: 512, 64>}, {pipeline_mode = #tpu.pipeline_mode<synchronous>, transform_indices = @transform_16, window_bounds = array<i64: 1, 64>}, {pipeline_mode = #tpu.pipeline_mode<synchronous>, transform_indices = @transform_17, window_bounds = array<i64: 64, 8>}, {pipeline_mode = #tpu.pipeline_mode<synchronous>, transform_indices = @transform_18, window_bounds = array<i64: 1, 8>}, {transform_indices = @transform_19, window_bounds = array<i64: 2, 8>}]} {
    %cst = arith.constant 0.000000e+00 : bf16
    %0 = vector.broadcast %cst : bf16 to vector<2x128xbf16>
    %c0 = arith.constant 0 : index
    %c0_0 = arith.constant 0 : index
    %c0_1 = arith.constant 0 : index
    %1 = vector.load %arg21[%c0, %c0_0, %c0_1] : memref<2x18x128xbf16, #tpu.memory_space<vmem>>, vector<2x1x128xbf16>
    %2 = vector.shape_cast %1 : vector<2x1x128xbf16> to vector<2x128xbf16>
    %3 = vector.shape_cast %0 : vector<2x128xbf16> to vector<2x1x128xbf16>
    tpu.vector_store %arg21[%c0, %c0_0, %c0_1], %3 {strides = array<i32>} : memref<2x18x128xbf16, #tpu.memory_space<vmem>>, vector<2x1x128xbf16>,
    %c0_2 = arith.constant 0 : index
    %c17 = arith.constant 17 : index
    %c0_3 = arith.constant 0 : index
    %4 = vector.load %arg21[%c0_2, %c17, %c0_3] : memref<2x18x128xbf16, #tpu.memory_space<vmem>>, vector<2x1x128xbf16>
    %5 = vector.shape_cast %4 : vector<2x1x128xbf16> to vector<2x128xbf16>
    %6 = vector.shape_cast %0 : vector<2x128xbf16> to vector<2x1x128xbf16>
    tpu.vector_store %arg21[%c0_2, %c17, %c0_3], %6 {strides = array<i32>} : memref<2x18x128xbf16, #tpu.memory_space<vmem>>, vector<2x1x128xbf16>,
    %c0_4 = arith.constant 0 : index
    %c0_5 = arith.constant 0 : index
    %c0_6 = arith.constant 0 : index
    %7 = vector.load %arg1[%c0_4, %c0_5, %c0_6] : memref<2x18x1xf32, #tpu.memory_space<vmem>>, vector<2x16x1xf32>
    %c0_7 = arith.constant 0 : index
    %c0_8 = arith.constant 0 : index
    %8 = vector.load %arg2[%c0_7, %c0_8] : memref<3x128xf32, #tpu.memory_space<vmem>>, vector<1x128xf32>
    %9 = vector.shape_cast %8 : vector<1x128xf32> to vector<1x1x128xf32>
    %10 = vector.broadcast %7 : vector<2x16x1xf32> to vector<2x16x128xf32>
    %11 = vector.broadcast %9 : vector<1x1x128xf32> to vector<2x16x128xf32>
    %12 = arith.mulf %10, %11 : vector<2x16x128xf32>
    %c0_9 = arith.constant 0 : index
    %c1 = arith.constant 1 : index
    %c0_10 = arith.constant 0 : index
    %13 = vector.load %arg1[%c0_9, %c1, %c0_10] : memref<2x18x1xf32, #tpu.memory_space<vmem>>, vector<2x16x1xf32>
    %c1_11 = arith.constant 1 : index
    %c0_12 = arith.constant 0 : index
    %14 = vector.load %arg2[%c1_11, %c0_12] : memref<3x128xf32, #tpu.memory_space<vmem>>, vector<1x128xf32>
    %15 = vector.shape_cast %14 : vector<1x128xf32> to vector<1x1x128xf32>
    %16 = vector.broadcast %13 : vector<2x16x1xf32> to vector<2x16x128xf32>
    %17 = vector.broadcast %15 : vector<1x1x128xf32> to vector<2x16x128xf32>
    %18 = arith.mulf %16, %17 : vector<2x16x128xf32>
    %19 = arith.addf %12, %18 : vector<2x16x128xf32>
    %c0_13 = arith.constant 0 : index
    %c2 = arith.constant 2 : index
    %c0_14 = arith.constant 0 : index
    %20 = vector.load %arg1[%c0_13, %c2, %c0_14] : memref<2x18x1xf32, #tpu.memory_space<vmem>>, vector<2x16x1xf32>
    %c2_15 = arith.constant 2 : index
    %c0_16 = arith.constant 0 : index
    %21 = vector.load %arg2[%c2_15, %c0_16] : memref<3x128xf32, #tpu.memory_space<vmem>>, vector<1x128xf32>
    %22 = vector.shape_cast %21 : vector<1x128xf32> to vector<1x1x128xf32>
    %23 = vector.broadcast %20 : vector<2x16x1xf32> to vector<2x16x128xf32>
    %24 = vector.broadcast %22 : vector<1x1x128xf32> to vector<2x16x128xf32>
    %25 = arith.mulf %23, %24 : vector<2x16x128xf32>
    %26 = arith.addf %19, %25 : vector<2x16x128xf32>
    %c0_17 = arith.constant 0 : index
    %c0_18 = arith.constant 0 : index
    %27 = vector.load %arg3[%c0_17, %c0_18] : memref<1x128xf32, #tpu.memory_space<vmem>>, vector<1x128xf32>
    %28 = vector.shape_cast %27 : vector<1x128xf32> to vector<1x1x128xf32>
    %29 = vector.broadcast %28 : vector<1x1x128xf32> to vector<2x16x128xf32>
    %30 = arith.addf %26, %29 : vector<2x16x128xf32>
    %31 = vector.shape_cast %30 : vector<2x16x128xf32> to vector<32x128xf32>
    %c0_19 = arith.constant 0 : index
    %c0_20 = arith.constant 0 : index
    %32 = vector.load %arg22[%c0_19, %c0_20] : memref<32x128xf32, #tpu.memory_space<vmem>>, vector<32x128xf32>
    tpu.vector_store %arg22[%c0_19, %c0_20], %31 {strides = array<i32>} : memref<32x128xf32, #tpu.memory_space<vmem>>, vector<32x128xf32>,
    %c0_21 = arith.constant 0 : index
    %c0_22 = arith.constant 0 : index
    %33 = vector.load %arg22[%c0_21, %c0_22] : memref<32x128xf32, #tpu.memory_space<vmem>>, vector<32x128xf32>
    %c0_23 = arith.constant 0 : index
    %c0_24 = arith.constant 0 : index
    %34 = vector.load %arg4[%c0_23, %c0_24] : memref<4x128xf32, #tpu.memory_space<vmem>>, vector<1x128xf32>
    %35 = vector.broadcast %34 : vector<1x128xf32> to vector<32x128xf32>
    %36 = arith.mulf %33, %35 : vector<32x128xf32>
    %c0_25 = arith.constant 0 : index
    %c0_26 = arith.constant 0 : index
    %37 = vector.load %arg5[%c0_25, %c0_26] : memref<4x128xf32, #tpu.memory_space<vmem>>, vector<1x128xf32>
    %38 = vector.broadcast %37 : vector<1x128xf32> to vector<32x128xf32>
    %39 = arith.addf %36, %38 : vector<32x128xf32>
    %cst_27 = arith.constant 0.000000e+00 : f32
    %40 = vector.broadcast %cst_27 : f32 to vector<32x128xf32>
    %41 = arith.maximumf %39, %40 : vector<32x128xf32>
    %42 = vector.shape_cast %41 : vector<32x128xf32> to vector<2x16x128xf32>
    %43 = arith.truncf %42 : vector<2x16x128xf32> to vector<2x16x128xbf16>
    %c0_28 = arith.constant 0 : index
    %c1_29 = arith.constant 1 : index
    %c0_30 = arith.constant 0 : index
    %44 = vector.load %arg21[%c0_28, %c1_29, %c0_30] : memref<2x18x128xbf16, #tpu.memory_space<vmem>>, vector<2x16x128xbf16>
    tpu.vector_store %arg21[%c0_28, %c1_29, %c0_30], %43 {strides = array<i32>} : memref<2x18x128xbf16, #tpu.memory_space<vmem>>, vector<2x16x128xbf16>,
    %c0_31 = arith.constant 0 : index
    %c0_32 = arith.constant 0 : index
    %45 = vector.load %arg22[%c0_31, %c0_32] : memref<32x128xf32, #tpu.memory_space<vmem>>, vector<32x128xf32>
    %c0_33 = arith.constant 0 : index
    %c0_34 = arith.constant 0 : index
    %46 = vector.load %arg7[%c0_33, %c0_34] : memref<4x128xf32, #tpu.memory_space<vmem>>, vector<1x128xf32>
    %c0_35 = arith.constant 0 : index
    %c0_36 = arith.constant 0 : index
    %c0_37 = arith.constant 0 : index
    %47 = vector.load %arg21[%c0_35, %c0_36, %c0_37] : memref<2x18x128xbf16, #tpu.memory_space<vmem>>, vector<2x16x128xbf16>
    %48 = vector.shape_cast %47 : vector<2x16x128xbf16> to vector<32x128xbf16>
    %c0_38 = arith.constant 0 : index
    %c1_39 = arith.constant 1 : index
    %c0_40 = arith.constant 0 : index
    %49 = vector.load %arg21[%c0_38, %c1_39, %c0_40] : memref<2x18x128xbf16, #tpu.memory_space<vmem>>, vector<2x16x128xbf16>
    %50 = vector.shape_cast %49 : vector<2x16x128xbf16> to vector<32x128xbf16>
    %c0_41 = arith.constant 0 : index
    %c2_42 = arith.constant 2 : index
    %c0_43 = arith.constant 0 : index
    %51 = vector.load %arg21[%c0_41, %c2_42, %c0_43] : memref<2x18x128xbf16, #tpu.memory_space<vmem>>, vector<2x16x128xbf16>
    %52 = vector.shape_cast %51 : vector<2x16x128xbf16> to vector<32x128xbf16>
    %c0_44 = arith.constant 0 : index
    %c0_45 = arith.constant 0 : index
    %c0_46 = arith.constant 0 : index
    %53 = vector.load %arg6[%c0_44, %c0_45, %c0_46] : memref<4x384x128xbf16, #tpu.memory_space<vmem>>, vector<1x128x128xbf16>
    %54 = vector.shape_cast %53 : vector<1x128x128xbf16> to vector<128x128xbf16>
    %cst_47 = arith.constant dense<0.000000e+00> : vector<32x128xf32>
    %55 = tpu.matmul %48, %54, %cst_47 {dimension_numbers = #tpu.dot_dimension_numbers<[1], [0], [0], [1], [0, 0, 1, 1], [], []>} : vector<32x128xbf16>, vector<128x128xbf16>, vector<32x128xf32> -> vector<32x128xf32>
    %c0_48 = arith.constant 0 : index
    %c128 = arith.constant 128 : index
    %c0_49 = arith.constant 0 : index
    %56 = vector.load %arg6[%c0_48, %c128, %c0_49] : memref<4x384x128xbf16, #tpu.memory_space<vmem>>, vector<1x128x128xbf16>
    %57 = vector.shape_cast %56 : vector<1x128x128xbf16> to vector<128x128xbf16>
    %cst_50 = arith.constant dense<0.000000e+00> : vector<32x128xf32>
    %58 = tpu.matmul %50, %57, %cst_50 {dimension_numbers = #tpu.dot_dimension_numbers<[1], [0], [0], [1], [0, 0, 1, 1], [], []>} : vector<32x128xbf16>, vector<128x128xbf16>, vector<32x128xf32> -> vector<32x128xf32>
    %59 = arith.addf %55, %58 : vector<32x128xf32>
    %c0_51 = arith.constant 0 : index
    %c256 = arith.constant 256 : index
    %c0_52 = arith.constant 0 : index
    %60 = vector.load %arg6[%c0_51, %c256, %c0_52] : memref<4x384x128xbf16, #tpu.memory_space<vmem>>, vector<1x128x128xbf16>
    %61 = vector.shape_cast %60 : vector<1x128x128xbf16> to vector<128x128xbf16>
    %cst_53 = arith.constant dense<0.000000e+00> : vector<32x128xf32>
    %62 = tpu.matmul %52, %61, %cst_53 {dimension_numbers = #tpu.dot_dimension_numbers<[1], [0], [0], [1], [0, 0, 1, 1], [], []>} : vector<32x128xbf16>, vector<128x128xbf16>, vector<32x128xf32> -> vector<32x128xf32>
    %63 = arith.addf %59, %62 : vector<32x128xf32>
    %64 = vector.broadcast %46 : vector<1x128xf32> to vector<32x128xf32>
    %65 = arith.addf %63, %64 : vector<32x128xf32>
    %66 = arith.addf %45, %65 : vector<32x128xf32>
    %c0_54 = arith.constant 0 : index
    %c0_55 = arith.constant 0 : index
    %67 = vector.load %arg22[%c0_54, %c0_55] : memref<32x128xf32, #tpu.memory_space<vmem>>, vector<32x128xf32>
    tpu.vector_store %arg22[%c0_54, %c0_55], %66 {strides = array<i32>} : memref<32x128xf32, #tpu.memory_space<vmem>>, vector<32x128xf32>,
    %c0_56 = arith.constant 0 : index
    %c0_57 = arith.constant 0 : index
    %68 = vector.load %arg22[%c0_56, %c0_57] : memref<32x128xf32, #tpu.memory_space<vmem>>, vector<32x128xf32>
    %c1_58 = arith.constant 1 : index
    %c0_59 = arith.constant 0 : index
    %69 = vector.load %arg4[%c1_58, %c0_59] : memref<4x128xf32, #tpu.memory_space<vmem>>, vector<1x128xf32>
    %70 = vector.broadcast %69 : vector<1x128xf32> to vector<32x128xf32>
    %71 = arith.mulf %68, %70 : vector<32x128xf32>
    %c1_60 = arith.constant 1 : index
    %c0_61 = arith.constant 0 : index
    %72 = vector.load %arg5[%c1_60, %c0_61] : memref<4x128xf32, #tpu.memory_space<vmem>>, vector<1x128xf32>
    %73 = vector.broadcast %72 : vector<1x128xf32> to vector<32x128xf32>
    %74 = arith.addf %71, %73 : vector<32x128xf32>
    %cst_62 = arith.constant 0.000000e+00 : f32
    %75 = vector.broadcast %cst_62 : f32 to vector<32x128xf32>
    %76 = arith.maximumf %74, %75 : vector<32x128xf32>
    %77 = vector.shape_cast %76 : vector<32x128xf32> to vector<2x16x128xf32>
    %78 = arith.truncf %77 : vector<2x16x128xf32> to vector<2x16x128xbf16>
    %c0_63 = arith.constant 0 : index
    %c1_64 = arith.constant 1 : index
    %c0_65 = arith.constant 0 : index
    %79 = vector.load %arg21[%c0_63, %c1_64, %c0_65] : memref<2x18x128xbf16, #tpu.memory_space<vmem>>, vector<2x16x128xbf16>
    tpu.vector_store %arg21[%c0_63, %c1_64, %c0_65], %78 {strides = array<i32>} : memref<2x18x128xbf16, #tpu.memory_space<vmem>>, vector<2x16x128xbf16>,
    %c0_66 = arith.constant 0 : index
    %c0_67 = arith.constant 0 : index
    %80 = vector.load %arg22[%c0_66, %c0_67] : memref<32x128xf32, #tpu.memory_space<vmem>>, vector<32x128xf32>
    %c1_68 = arith.constant 1 : index
    %c0_69 = arith.constant 0 : index
    %81 = vector.load %arg7[%c1_68, %c0_69] : memref<4x128xf32, #tpu.memory_space<vmem>>, vector<1x128xf32>
    %c0_70 = arith.constant 0 : index
    %c0_71 = arith.constant 0 : index
    %c0_72 = arith.constant 0 : index
    %82 = vector.load %arg21[%c0_70, %c0_71, %c0_72] : memref<2x18x128xbf16, #tpu.memory_space<vmem>>, vector<2x16x128xbf16>
    %83 = vector.shape_cast %82 : vector<2x16x128xbf16> to vector<32x128xbf16>
    %c0_73 = arith.constant 0 : index
    %c1_74 = arith.constant 1 : index
    %c0_75 = arith.constant 0 : index
    %84 = vector.load %arg21[%c0_73, %c1_74, %c0_75] : memref<2x18x128xbf16, #tpu.memory_space<vmem>>, vector<2x16x128xbf16>
    %85 = vector.shape_cast %84 : vector<2x16x128xbf16> to vector<32x128xbf16>
    %c0_76 = arith.constant 0 : index
    %c2_77 = arith.constant 2 : index
    %c0_78 = arith.constant 0 : index
    %86 = vector.load %arg21[%c0_76, %c2_77, %c0_78] : memref<2x18x128xbf16, #tpu.memory_space<vmem>>, vector<2x16x128xbf16>
    %87 = vector.shape_cast %86 : vector<2x16x128xbf16> to vector<32x128xbf16>
    %c1_79 = arith.constant 1 : index
    %c0_80 = arith.constant 0 : index
    %c0_81 = arith.constant 0 : index
    %88 = vector.load %arg6[%c1_79, %c0_80, %c0_81] : memref<4x384x128xbf16, #tpu.memory_space<vmem>>, vector<1x128x128xbf16>
    %89 = vector.shape_cast %88 : vector<1x128x128xbf16> to vector<128x128xbf16>
    %cst_82 = arith.constant dense<0.000000e+00> : vector<32x128xf32>
    %90 = tpu.matmul %83, %89, %cst_82 {dimension_numbers = #tpu.dot_dimension_numbers<[1], [0], [0], [1], [0, 0, 1, 1], [], []>} : vector<32x128xbf16>, vector<128x128xbf16>, vector<32x128xf32> -> vector<32x128xf32>
    %c1_83 = arith.constant 1 : index
    %c128_84 = arith.constant 128 : index
    %c0_85 = arith.constant 0 : index
    %91 = vector.load %arg6[%c1_83, %c128_84, %c0_85] : memref<4x384x128xbf16, #tpu.memory_space<vmem>>, vector<1x128x128xbf16>
    %92 = vector.shape_cast %91 : vector<1x128x128xbf16> to vector<128x128xbf16>
    %cst_86 = arith.constant dense<0.000000e+00> : vector<32x128xf32>
    %93 = tpu.matmul %85, %92, %cst_86 {dimension_numbers = #tpu.dot_dimension_numbers<[1], [0], [0], [1], [0, 0, 1, 1], [], []>} : vector<32x128xbf16>, vector<128x128xbf16>, vector<32x128xf32> -> vector<32x128xf32>
    %94 = arith.addf %90, %93 : vector<32x128xf32>
    %c1_87 = arith.constant 1 : index
    %c256_88 = arith.constant 256 : index
    %c0_89 = arith.constant 0 : index
    %95 = vector.load %arg6[%c1_87, %c256_88, %c0_89] : memref<4x384x128xbf16, #tpu.memory_space<vmem>>, vector<1x128x128xbf16>
    %96 = vector.shape_cast %95 : vector<1x128x128xbf16> to vector<128x128xbf16>
    %cst_90 = arith.constant dense<0.000000e+00> : vector<32x128xf32>
    %97 = tpu.matmul %87, %96, %cst_90 {dimension_numbers = #tpu.dot_dimension_numbers<[1], [0], [0], [1], [0, 0, 1, 1], [], []>} : vector<32x128xbf16>, vector<128x128xbf16>, vector<32x128xf32> -> vector<32x128xf32>
    %98 = arith.addf %94, %97 : vector<32x128xf32>
    %99 = vector.broadcast %81 : vector<1x128xf32> to vector<32x128xf32>
    %100 = arith.addf %98, %99 : vector<32x128xf32>
    %101 = arith.addf %80, %100 : vector<32x128xf32>
    %c0_91 = arith.constant 0 : index
    %c0_92 = arith.constant 0 : index
    %102 = vector.load %arg22[%c0_91, %c0_92] : memref<32x128xf32, #tpu.memory_space<vmem>>, vector<32x128xf32>
    tpu.vector_store %arg22[%c0_91, %c0_92], %101 {strides = array<i32>} : memref<32x128xf32, #tpu.memory_space<vmem>>, vector<32x128xf32>,
    %c0_93 = arith.constant 0 : index
    %c0_94 = arith.constant 0 : index
    %103 = vector.load %arg22[%c0_93, %c0_94] : memref<32x128xf32, #tpu.memory_space<vmem>>, vector<32x128xf32>
    %c2_95 = arith.constant 2 : index
    %c0_96 = arith.constant 0 : index
    %104 = vector.load %arg4[%c2_95, %c0_96] : memref<4x128xf32, #tpu.memory_space<vmem>>, vector<1x128xf32>
    %105 = vector.broadcast %104 : vector<1x128xf32> to vector<32x128xf32>
    %106 = arith.mulf %103, %105 : vector<32x128xf32>
    %c2_97 = arith.constant 2 : index
    %c0_98 = arith.constant 0 : index
    %107 = vector.load %arg5[%c2_97, %c0_98] : memref<4x128xf32, #tpu.memory_space<vmem>>, vector<1x128xf32>
    %108 = vector.broadcast %107 : vector<1x128xf32> to vector<32x128xf32>
    %109 = arith.addf %106, %108 : vector<32x128xf32>
    %cst_99 = arith.constant 0.000000e+00 : f32
    %110 = vector.broadcast %cst_99 : f32 to vector<32x128xf32>
    %111 = arith.maximumf %109, %110 : vector<32x128xf32>
    %112 = vector.shape_cast %111 : vector<32x128xf32> to vector<2x16x128xf32>
    %113 = arith.truncf %112 : vector<2x16x128xf32> to vector<2x16x128xbf16>
    %c0_100 = arith.constant 0 : index
    %c1_101 = arith.constant 1 : index
    %c0_102 = arith.constant 0 : index
    %114 = vector.load %arg21[%c0_100, %c1_101, %c0_102] : memref<2x18x128xbf16, #tpu.memory_space<vmem>>, vector<2x16x128xbf16>
    tpu.vector_store %arg21[%c0_100, %c1_101, %c0_102], %113 {strides = array<i32>} : memref<2x18x128xbf16, #tpu.memory_space<vmem>>, vector<2x16x128xbf16>,
    %c0_103 = arith.constant 0 : index
    %c0_104 = arith.constant 0 : index
    %115 = vector.load %arg22[%c0_103, %c0_104] : memref<32x128xf32, #tpu.memory_space<vmem>>, vector<32x128xf32>
    %c2_105 = arith.constant 2 : index
    %c0_106 = arith.constant 0 : index
    %116 = vector.load %arg7[%c2_105, %c0_106] : memref<4x128xf32, #tpu.memory_space<vmem>>, vector<1x128xf32>
    %c0_107 = arith.constant 0 : index
    %c0_108 = arith.constant 0 : index
    %c0_109 = arith.constant 0 : index
    %117 = vector.load %arg21[%c0_107, %c0_108, %c0_109] : memref<2x18x128xbf16, #tpu.memory_space<vmem>>, vector<2x16x128xbf16>
    %118 = vector.shape_cast %117 : vector<2x16x128xbf16> to vector<32x128xbf16>
    %c0_110 = arith.constant 0 : index
    %c1_111 = arith.constant 1 : index
    %c0_112 = arith.constant 0 : index
    %119 = vector.load %arg21[%c0_110, %c1_111, %c0_112] : memref<2x18x128xbf16, #tpu.memory_space<vmem>>, vector<2x16x128xbf16>
    %120 = vector.shape_cast %119 : vector<2x16x128xbf16> to vector<32x128xbf16>
    %c0_113 = arith.constant 0 : index
    %c2_114 = arith.constant 2 : index
    %c0_115 = arith.constant 0 : index
    %121 = vector.load %arg21[%c0_113, %c2_114, %c0_115] : memref<2x18x128xbf16, #tpu.memory_space<vmem>>, vector<2x16x128xbf16>
    %122 = vector.shape_cast %121 : vector<2x16x128xbf16> to vector<32x128xbf16>
    %c2_116 = arith.constant 2 : index
    %c0_117 = arith.constant 0 : index
    %c0_118 = arith.constant 0 : index
    %123 = vector.load %arg6[%c2_116, %c0_117, %c0_118] : memref<4x384x128xbf16, #tpu.memory_space<vmem>>, vector<1x128x128xbf16>
    %124 = vector.shape_cast %123 : vector<1x128x128xbf16> to vector<128x128xbf16>
    %cst_119 = arith.constant dense<0.000000e+00> : vector<32x128xf32>
    %125 = tpu.matmul %118, %124, %cst_119 {dimension_numbers = #tpu.dot_dimension_numbers<[1], [0], [0], [1], [0, 0, 1, 1], [], []>} : vector<32x128xbf16>, vector<128x128xbf16>, vector<32x128xf32> -> vector<32x128xf32>
    %c2_120 = arith.constant 2 : index
    %c128_121 = arith.constant 128 : index
    %c0_122 = arith.constant 0 : index
    %126 = vector.load %arg6[%c2_120, %c128_121, %c0_122] : memref<4x384x128xbf16, #tpu.memory_space<vmem>>, vector<1x128x128xbf16>
    %127 = vector.shape_cast %126 : vector<1x128x128xbf16> to vector<128x128xbf16>
    %cst_123 = arith.constant dense<0.000000e+00> : vector<32x128xf32>
    %128 = tpu.matmul %120, %127, %cst_123 {dimension_numbers = #tpu.dot_dimension_numbers<[1], [0], [0], [1], [0, 0, 1, 1], [], []>} : vector<32x128xbf16>, vector<128x128xbf16>, vector<32x128xf32> -> vector<32x128xf32>
    %129 = arith.addf %125, %128 : vector<32x128xf32>
    %c2_124 = arith.constant 2 : index
    %c256_125 = arith.constant 256 : index
    %c0_126 = arith.constant 0 : index
    %130 = vector.load %arg6[%c2_124, %c256_125, %c0_126] : memref<4x384x128xbf16, #tpu.memory_space<vmem>>, vector<1x128x128xbf16>
    %131 = vector.shape_cast %130 : vector<1x128x128xbf16> to vector<128x128xbf16>
    %cst_127 = arith.constant dense<0.000000e+00> : vector<32x128xf32>
    %132 = tpu.matmul %122, %131, %cst_127 {dimension_numbers = #tpu.dot_dimension_numbers<[1], [0], [0], [1], [0, 0, 1, 1], [], []>} : vector<32x128xbf16>, vector<128x128xbf16>, vector<32x128xf32> -> vector<32x128xf32>
    %133 = arith.addf %129, %132 : vector<32x128xf32>
    %134 = vector.broadcast %116 : vector<1x128xf32> to vector<32x128xf32>
    %135 = arith.addf %133, %134 : vector<32x128xf32>
    %136 = arith.addf %115, %135 : vector<32x128xf32>
    %c0_128 = arith.constant 0 : index
    %c0_129 = arith.constant 0 : index
    %137 = vector.load %arg22[%c0_128, %c0_129] : memref<32x128xf32, #tpu.memory_space<vmem>>, vector<32x128xf32>
    tpu.vector_store %arg22[%c0_128, %c0_129], %136 {strides = array<i32>} : memref<32x128xf32, #tpu.memory_space<vmem>>, vector<32x128xf32>,
    %c0_130 = arith.constant 0 : index
    %c0_131 = arith.constant 0 : index
    %138 = vector.load %arg22[%c0_130, %c0_131] : memref<32x128xf32, #tpu.memory_space<vmem>>, vector<32x128xf32>
    %c3 = arith.constant 3 : index
    %c0_132 = arith.constant 0 : index
    %139 = vector.load %arg4[%c3, %c0_132] : memref<4x128xf32, #tpu.memory_space<vmem>>, vector<1x128xf32>
    %140 = vector.broadcast %139 : vector<1x128xf32> to vector<32x128xf32>
    %141 = arith.mulf %138, %140 : vector<32x128xf32>
    %c3_133 = arith.constant 3 : index
    %c0_134 = arith.constant 0 : index
    %142 = vector.load %arg5[%c3_133, %c0_134] : memref<4x128xf32, #tpu.memory_space<vmem>>, vector<1x128xf32>
    %143 = vector.broadcast %142 : vector<1x128xf32> to vector<32x128xf32>
    %144 = arith.addf %141, %143 : vector<32x128xf32>
    %cst_135 = arith.constant 0.000000e+00 : f32
    %145 = vector.broadcast %cst_135 : f32 to vector<32x128xf32>
    %146 = arith.maximumf %144, %145 : vector<32x128xf32>
    %147 = vector.shape_cast %146 : vector<32x128xf32> to vector<2x16x128xf32>
    %148 = arith.truncf %147 : vector<2x16x128xf32> to vector<2x16x128xbf16>
    %c0_136 = arith.constant 0 : index
    %c1_137 = arith.constant 1 : index
    %c0_138 = arith.constant 0 : index
    %149 = vector.load %arg21[%c0_136, %c1_137, %c0_138] : memref<2x18x128xbf16, #tpu.memory_space<vmem>>, vector<2x16x128xbf16>
    tpu.vector_store %arg21[%c0_136, %c1_137, %c0_138], %148 {strides = array<i32>} : memref<2x18x128xbf16, #tpu.memory_space<vmem>>, vector<2x16x128xbf16>,
    %c0_139 = arith.constant 0 : index
    %c0_140 = arith.constant 0 : index
    %150 = vector.load %arg22[%c0_139, %c0_140] : memref<32x128xf32, #tpu.memory_space<vmem>>, vector<32x128xf32>
    %c3_141 = arith.constant 3 : index
    %c0_142 = arith.constant 0 : index
    %151 = vector.load %arg7[%c3_141, %c0_142] : memref<4x128xf32, #tpu.memory_space<vmem>>, vector<1x128xf32>
    %c0_143 = arith.constant 0 : index
    %c0_144 = arith.constant 0 : index
    %c0_145 = arith.constant 0 : index
    %152 = vector.load %arg21[%c0_143, %c0_144, %c0_145] : memref<2x18x128xbf16, #tpu.memory_space<vmem>>, vector<2x16x128xbf16>
    %153 = vector.shape_cast %152 : vector<2x16x128xbf16> to vector<32x128xbf16>
    %c0_146 = arith.constant 0 : index
    %c1_147 = arith.constant 1 : index
    %c0_148 = arith.constant 0 : index
    %154 = vector.load %arg21[%c0_146, %c1_147, %c0_148] : memref<2x18x128xbf16, #tpu.memory_space<vmem>>, vector<2x16x128xbf16>
    %155 = vector.shape_cast %154 : vector<2x16x128xbf16> to vector<32x128xbf16>
    %c0_149 = arith.constant 0 : index
    %c2_150 = arith.constant 2 : index
    %c0_151 = arith.constant 0 : index
    %156 = vector.load %arg21[%c0_149, %c2_150, %c0_151] : memref<2x18x128xbf16, #tpu.memory_space<vmem>>, vector<2x16x128xbf16>
    %157 = vector.shape_cast %156 : vector<2x16x128xbf16> to vector<32x128xbf16>
    %c3_152 = arith.constant 3 : index
    %c0_153 = arith.constant 0 : index
    %c0_154 = arith.constant 0 : index
    %158 = vector.load %arg6[%c3_152, %c0_153, %c0_154] : memref<4x384x128xbf16, #tpu.memory_space<vmem>>, vector<1x128x128xbf16>
    %159 = vector.shape_cast %158 : vector<1x128x128xbf16> to vector<128x128xbf16>
    %cst_155 = arith.constant dense<0.000000e+00> : vector<32x128xf32>
    %160 = tpu.matmul %153, %159, %cst_155 {dimension_numbers = #tpu.dot_dimension_numbers<[1], [0], [0], [1], [0, 0, 1, 1], [], []>} : vector<32x128xbf16>, vector<128x128xbf16>, vector<32x128xf32> -> vector<32x128xf32>
    %c3_156 = arith.constant 3 : index
    %c128_157 = arith.constant 128 : index
    %c0_158 = arith.constant 0 : index
    %161 = vector.load %arg6[%c3_156, %c128_157, %c0_158] : memref<4x384x128xbf16, #tpu.memory_space<vmem>>, vector<1x128x128xbf16>
    %162 = vector.shape_cast %161 : vector<1x128x128xbf16> to vector<128x128xbf16>
    %cst_159 = arith.constant dense<0.000000e+00> : vector<32x128xf32>
    %163 = tpu.matmul %155, %162, %cst_159 {dimension_numbers = #tpu.dot_dimension_numbers<[1], [0], [0], [1], [0, 0, 1, 1], [], []>} : vector<32x128xbf16>, vector<128x128xbf16>, vector<32x128xf32> -> vector<32x128xf32>
    %164 = arith.addf %160, %163 : vector<32x128xf32>
    %c3_160 = arith.constant 3 : index
    %c256_161 = arith.constant 256 : index
    %c0_162 = arith.constant 0 : index
    %165 = vector.load %arg6[%c3_160, %c256_161, %c0_162] : memref<4x384x128xbf16, #tpu.memory_space<vmem>>, vector<1x128x128xbf16>
    %166 = vector.shape_cast %165 : vector<1x128x128xbf16> to vector<128x128xbf16>
    %cst_163 = arith.constant dense<0.000000e+00> : vector<32x128xf32>
    %167 = tpu.matmul %157, %166, %cst_163 {dimension_numbers = #tpu.dot_dimension_numbers<[1], [0], [0], [1], [0, 0, 1, 1], [], []>} : vector<32x128xbf16>, vector<128x128xbf16>, vector<32x128xf32> -> vector<32x128xf32>
    %168 = arith.addf %164, %167 : vector<32x128xf32>
    %169 = vector.broadcast %151 : vector<1x128xf32> to vector<32x128xf32>
    %170 = arith.addf %168, %169 : vector<32x128xf32>
    %171 = arith.addf %150, %170 : vector<32x128xf32>
    %c0_164 = arith.constant 0 : index
    %c0_165 = arith.constant 0 : index
    %172 = vector.load %arg22[%c0_164, %c0_165] : memref<32x128xf32, #tpu.memory_space<vmem>>, vector<32x128xf32>
    tpu.vector_store %arg22[%c0_164, %c0_165], %171 {strides = array<i32>} : memref<32x128xf32, #tpu.memory_space<vmem>>, vector<32x128xf32>,
    %c0_166 = arith.constant 0 : index
    %c0_167 = arith.constant 0 : index
    %173 = vector.load %arg22[%c0_166, %c0_167] : memref<32x128xf32, #tpu.memory_space<vmem>>, vector<32x128xf32>
    %c0_168 = arith.constant 0 : index
    %c0_169 = arith.constant 0 : index
    %174 = vector.load %arg8[%c0_168, %c0_169] : memref<1x128xf32, #tpu.memory_space<vmem>>, vector<1x128xf32>
    %175 = vector.broadcast %174 : vector<1x128xf32> to vector<32x128xf32>
    %176 = arith.mulf %173, %175 : vector<32x128xf32>
    %c0_170 = arith.constant 0 : index
    %c0_171 = arith.constant 0 : index
    %177 = vector.load %arg9[%c0_170, %c0_171] : memref<1x128xf32, #tpu.memory_space<vmem>>, vector<1x128xf32>
    %178 = vector.broadcast %177 : vector<1x128xf32> to vector<32x128xf32>
    %179 = arith.addf %176, %178 : vector<32x128xf32>
    %cst_172 = arith.constant 0.000000e+00 : f32
    %180 = vector.broadcast %cst_172 : f32 to vector<32x128xf32>
    %181 = arith.maximumf %179, %180 : vector<32x128xf32>
    %c0_173 = arith.constant 0 : index
    %c0_174 = arith.constant 0 : index
    %182 = vector.load %arg22[%c0_173, %c0_174] : memref<32x128xf32, #tpu.memory_space<vmem>>, vector<32x128xf32>
    tpu.vector_store %arg22[%c0_173, %c0_174], %181 {strides = array<i32>} : memref<32x128xf32, #tpu.memory_space<vmem>>, vector<32x128xf32>,
    %c0_175 = arith.constant 0 : index
    %c0_176 = arith.constant 0 : index
    %183 = tpu.strided_load %arg22[%c0_175, %c0_176] {strides = array<i32: 2, 1>} : memref<32x128xf32, #tpu.memory_space<vmem>>, vector<16x128xf32>
    %c1_177 = arith.constant 1 : index
    %c0_178 = arith.constant 0 : index
    %184 = tpu.strided_load %arg22[%c1_177, %c0_178] {strides = array<i32: 2, 1>} : memref<32x128xf32, #tpu.memory_space<vmem>>, vector<16x128xf32>
    %185 = arith.addf %183, %184 : vector<16x128xf32>
    %cst_179 = arith.constant 5.000000e-01 : f32
    %186 = vector.broadcast %cst_179 : f32 to vector<16x128xf32>
    %187 = arith.mulf %185, %186 : vector<16x128xf32>
    %188 = arith.truncf %187 : vector<16x128xf32> to vector<16x128xbf16>
    %c0_180 = arith.constant 0 : index
    %c0_181 = arith.constant 0 : index
    %189 = vector.load %arg10[%c0_180, %c0_181] : memref<128x128xbf16, #tpu.memory_space<vmem>>, vector<128x128xbf16>
    %cst_182 = arith.constant dense<0.000000e+00> : vector<16x128xf32>
    %190 = tpu.matmul %188, %189, %cst_182 {dimension_numbers = #tpu.dot_dimension_numbers<[1], [0], [0], [1], [0, 0, 1, 1], [], []>} : vector<16x128xbf16>, vector<128x128xbf16>, vector<16x128xf32> -> vector<16x128xf32>
    %c0_183 = arith.constant 0 : index
    %c0_184 = arith.constant 0 : index
    %191 = vector.load %arg11[%c0_183, %c0_184] : memref<1x128xf32, #tpu.memory_space<vmem>>, vector<1x128xf32>
    %192 = vector.broadcast %191 : vector<1x128xf32> to vector<16x128xf32>
    %193 = arith.addf %190, %192 : vector<16x128xf32>
    %c0_185 = arith.constant 0 : index
    %c0_186 = arith.constant 0 : index
    %194 = vector.load %arg22[%c0_185, %c0_186] : memref<32x128xf32, #tpu.memory_space<vmem>>, vector<16x128xf32>
    tpu.vector_store %arg22[%c0_185, %c0_186], %193 {strides = array<i32>} : memref<32x128xf32, #tpu.memory_space<vmem>>, vector<16x128xf32>,
    %c0_187 = arith.constant 0 : index
    %c9 = arith.constant 9 : index
    %c0_188 = arith.constant 0 : index
    %195 = vector.load %arg21[%c0_187, %c9, %c0_188] : memref<2x18x128xbf16, #tpu.memory_space<vmem>>, vector<2x1x128xbf16>
    %196 = vector.shape_cast %195 : vector<2x1x128xbf16> to vector<2x128xbf16>
    %197 = vector.shape_cast %0 : vector<2x128xbf16> to vector<2x1x128xbf16>
    tpu.vector_store %arg21[%c0_187, %c9, %c0_188], %197 {strides = array<i32>} : memref<2x18x128xbf16, #tpu.memory_space<vmem>>, vector<2x1x128xbf16>,
    %c0_189 = arith.constant 0 : index
    %c0_190 = arith.constant 0 : index
    %198 = vector.load %arg22[%c0_189, %c0_190] : memref<32x128xf32, #tpu.memory_space<vmem>>, vector<16x128xf32>
    %c0_191 = arith.constant 0 : index
    %c0_192 = arith.constant 0 : index
    %199 = vector.load %arg12[%c0_191, %c0_192] : memref<4x128xf32, #tpu.memory_space<vmem>>, vector<1x128xf32>
    %200 = vector.broadcast %199 : vector<1x128xf32> to vector<16x128xf32>
    %201 = arith.mulf %198, %200 : vector<16x128xf32>
    %c0_193 = arith.constant 0 : index
    %c0_194 = arith.constant 0 : index
    %202 = vector.load %arg13[%c0_193, %c0_194] : memref<4x128xf32, #tpu.memory_space<vmem>>, vector<1x128xf32>
    %203 = vector.broadcast %202 : vector<1x128xf32> to vector<16x128xf32>
    %204 = arith.addf %201, %203 : vector<16x128xf32>
    %cst_195 = arith.constant 0.000000e+00 : f32
    %205 = vector.broadcast %cst_195 : f32 to vector<16x128xf32>
    %206 = arith.maximumf %204, %205 : vector<16x128xf32>
    %207 = vector.shape_cast %206 : vector<16x128xf32> to vector<2x8x128xf32>
    %208 = arith.truncf %207 : vector<2x8x128xf32> to vector<2x8x128xbf16>
    %c0_196 = arith.constant 0 : index
    %c1_197 = arith.constant 1 : index
    %c0_198 = arith.constant 0 : index
    %209 = vector.load %arg21[%c0_196, %c1_197, %c0_198] : memref<2x18x128xbf16, #tpu.memory_space<vmem>>, vector<2x8x128xbf16>
    tpu.vector_store %arg21[%c0_196, %c1_197, %c0_198], %208 {strides = array<i32>} : memref<2x18x128xbf16, #tpu.memory_space<vmem>>, vector<2x8x128xbf16>,
    %c0_199 = arith.constant 0 : index
    %c0_200 = arith.constant 0 : index
    %210 = vector.load %arg22[%c0_199, %c0_200] : memref<32x128xf32, #tpu.memory_space<vmem>>, vector<16x128xf32>
    %c0_201 = arith.constant 0 : index
    %c0_202 = arith.constant 0 : index
    %211 = vector.load %arg15[%c0_201, %c0_202] : memref<4x128xf32, #tpu.memory_space<vmem>>, vector<1x128xf32>
    %c0_203 = arith.constant 0 : index
    %c0_204 = arith.constant 0 : index
    %c0_205 = arith.constant 0 : index
    %212 = vector.load %arg21[%c0_203, %c0_204, %c0_205] : memref<2x18x128xbf16, #tpu.memory_space<vmem>>, vector<2x8x128xbf16>
    %213 = vector.shape_cast %212 : vector<2x8x128xbf16> to vector<16x128xbf16>
    %c0_206 = arith.constant 0 : index
    %c1_207 = arith.constant 1 : index
    %c0_208 = arith.constant 0 : index
    %214 = vector.load %arg21[%c0_206, %c1_207, %c0_208] : memref<2x18x128xbf16, #tpu.memory_space<vmem>>, vector<2x8x128xbf16>
    %215 = vector.shape_cast %214 : vector<2x8x128xbf16> to vector<16x128xbf16>
    %c0_209 = arith.constant 0 : index
    %c2_210 = arith.constant 2 : index
    %c0_211 = arith.constant 0 : index
    %216 = vector.load %arg21[%c0_209, %c2_210, %c0_211] : memref<2x18x128xbf16, #tpu.memory_space<vmem>>, vector<2x8x128xbf16>
    %217 = vector.shape_cast %216 : vector<2x8x128xbf16> to vector<16x128xbf16>
    %c0_212 = arith.constant 0 : index
    %c0_213 = arith.constant 0 : index
    %c0_214 = arith.constant 0 : index
    %218 = vector.load %arg14[%c0_212, %c0_213, %c0_214] : memref<4x384x128xbf16, #tpu.memory_space<vmem>>, vector<1x128x128xbf16>
    %219 = vector.shape_cast %218 : vector<1x128x128xbf16> to vector<128x128xbf16>
    %cst_215 = arith.constant dense<0.000000e+00> : vector<16x128xf32>
    %220 = tpu.matmul %213, %219, %cst_215 {dimension_numbers = #tpu.dot_dimension_numbers<[1], [0], [0], [1], [0, 0, 1, 1], [], []>} : vector<16x128xbf16>, vector<128x128xbf16>, vector<16x128xf32> -> vector<16x128xf32>
    %c0_216 = arith.constant 0 : index
    %c128_217 = arith.constant 128 : index
    %c0_218 = arith.constant 0 : index
    %221 = vector.load %arg14[%c0_216, %c128_217, %c0_218] : memref<4x384x128xbf16, #tpu.memory_space<vmem>>, vector<1x128x128xbf16>
    %222 = vector.shape_cast %221 : vector<1x128x128xbf16> to vector<128x128xbf16>
    %cst_219 = arith.constant dense<0.000000e+00> : vector<16x128xf32>
    %223 = tpu.matmul %215, %222, %cst_219 {dimension_numbers = #tpu.dot_dimension_numbers<[1], [0], [0], [1], [0, 0, 1, 1], [], []>} : vector<16x128xbf16>, vector<128x128xbf16>, vector<16x128xf32> -> vector<16x128xf32>
    %224 = arith.addf %220, %223 : vector<16x128xf32>
    %c0_220 = arith.constant 0 : index
    %c256_221 = arith.constant 256 : index
    %c0_222 = arith.constant 0 : index
    %225 = vector.load %arg14[%c0_220, %c256_221, %c0_222] : memref<4x384x128xbf16, #tpu.memory_space<vmem>>, vector<1x128x128xbf16>
    %226 = vector.shape_cast %225 : vector<1x128x128xbf16> to vector<128x128xbf16>
    %cst_223 = arith.constant dense<0.000000e+00> : vector<16x128xf32>
    %227 = tpu.matmul %217, %226, %cst_223 {dimension_numbers = #tpu.dot_dimension_numbers<[1], [0], [0], [1], [0, 0, 1, 1], [], []>} : vector<16x128xbf16>, vector<128x128xbf16>, vector<16x128xf32> -> vector<16x128xf32>
    %228 = arith.addf %224, %227 : vector<16x128xf32>
    %229 = vector.broadcast %211 : vector<1x128xf32> to vector<16x128xf32>
    %230 = arith.addf %228, %229 : vector<16x128xf32>
    %231 = arith.addf %210, %230 : vector<16x128xf32>
    %c0_224 = arith.constant 0 : index
    %c0_225 = arith.constant 0 : index
    %232 = vector.load %arg22[%c0_224, %c0_225] : memref<32x128xf32, #tpu.memory_space<vmem>>, vector<16x128xf32>
    tpu.vector_store %arg22[%c0_224, %c0_225], %231 {strides = array<i32>} : memref<32x128xf32, #tpu.memory_space<vmem>>, vector<16x128xf32>,
    %c0_226 = arith.constant 0 : index
    %c0_227 = arith.constant 0 : index
    %233 = vector.load %arg22[%c0_226, %c0_227] : memref<32x128xf32, #tpu.memory_space<vmem>>, vector<16x128xf32>
    %c1_228 = arith.constant 1 : index
    %c0_229 = arith.constant 0 : index
    %234 = vector.load %arg12[%c1_228, %c0_229] : memref<4x128xf32, #tpu.memory_space<vmem>>, vector<1x128xf32>
    %235 = vector.broadcast %234 : vector<1x128xf32> to vector<16x128xf32>
    %236 = arith.mulf %233, %235 : vector<16x128xf32>
    %c1_230 = arith.constant 1 : index
    %c0_231 = arith.constant 0 : index
    %237 = vector.load %arg13[%c1_230, %c0_231] : memref<4x128xf32, #tpu.memory_space<vmem>>, vector<1x128xf32>
    %238 = vector.broadcast %237 : vector<1x128xf32> to vector<16x128xf32>
    %239 = arith.addf %236, %238 : vector<16x128xf32>
    %cst_232 = arith.constant 0.000000e+00 : f32
    %240 = vector.broadcast %cst_232 : f32 to vector<16x128xf32>
    %241 = arith.maximumf %239, %240 : vector<16x128xf32>
    %242 = vector.shape_cast %241 : vector<16x128xf32> to vector<2x8x128xf32>
    %243 = arith.truncf %242 : vector<2x8x128xf32> to vector<2x8x128xbf16>
    %c0_233 = arith.constant 0 : index
    %c1_234 = arith.constant 1 : index
    %c0_235 = arith.constant 0 : index
    %244 = vector.load %arg21[%c0_233, %c1_234, %c0_235] : memref<2x18x128xbf16, #tpu.memory_space<vmem>>, vector<2x8x128xbf16>
    tpu.vector_store %arg21[%c0_233, %c1_234, %c0_235], %243 {strides = array<i32>} : memref<2x18x128xbf16, #tpu.memory_space<vmem>>, vector<2x8x128xbf16>,
    %c0_236 = arith.constant 0 : index
    %c0_237 = arith.constant 0 : index
    %245 = vector.load %arg22[%c0_236, %c0_237] : memref<32x128xf32, #tpu.memory_space<vmem>>, vector<16x128xf32>
    %c1_238 = arith.constant 1 : index
    %c0_239 = arith.constant 0 : index
    %246 = vector.load %arg15[%c1_238, %c0_239] : memref<4x128xf32, #tpu.memory_space<vmem>>, vector<1x128xf32>
    %c0_240 = arith.constant 0 : index
    %c0_241 = arith.constant 0 : index
    %c0_242 = arith.constant 0 : index
    %247 = vector.load %arg21[%c0_240, %c0_241, %c0_242] : memref<2x18x128xbf16, #tpu.memory_space<vmem>>, vector<2x8x128xbf16>
    %248 = vector.shape_cast %247 : vector<2x8x128xbf16> to vector<16x128xbf16>
    %c0_243 = arith.constant 0 : index
    %c1_244 = arith.constant 1 : index
    %c0_245 = arith.constant 0 : index
    %249 = vector.load %arg21[%c0_243, %c1_244, %c0_245] : memref<2x18x128xbf16, #tpu.memory_space<vmem>>, vector<2x8x128xbf16>
    %250 = vector.shape_cast %249 : vector<2x8x128xbf16> to vector<16x128xbf16>
    %c0_246 = arith.constant 0 : index
    %c2_247 = arith.constant 2 : index
    %c0_248 = arith.constant 0 : index
    %251 = vector.load %arg21[%c0_246, %c2_247, %c0_248] : memref<2x18x128xbf16, #tpu.memory_space<vmem>>, vector<2x8x128xbf16>
    %252 = vector.shape_cast %251 : vector<2x8x128xbf16> to vector<16x128xbf16>
    %c1_249 = arith.constant 1 : index
    %c0_250 = arith.constant 0 : index
    %c0_251 = arith.constant 0 : index
    %253 = vector.load %arg14[%c1_249, %c0_250, %c0_251] : memref<4x384x128xbf16, #tpu.memory_space<vmem>>, vector<1x128x128xbf16>
    %254 = vector.shape_cast %253 : vector<1x128x128xbf16> to vector<128x128xbf16>
    %cst_252 = arith.constant dense<0.000000e+00> : vector<16x128xf32>
    %255 = tpu.matmul %248, %254, %cst_252 {dimension_numbers = #tpu.dot_dimension_numbers<[1], [0], [0], [1], [0, 0, 1, 1], [], []>} : vector<16x128xbf16>, vector<128x128xbf16>, vector<16x128xf32> -> vector<16x128xf32>
    %c1_253 = arith.constant 1 : index
    %c128_254 = arith.constant 128 : index
    %c0_255 = arith.constant 0 : index
    %256 = vector.load %arg14[%c1_253, %c128_254, %c0_255] : memref<4x384x128xbf16, #tpu.memory_space<vmem>>, vector<1x128x128xbf16>
    %257 = vector.shape_cast %256 : vector<1x128x128xbf16> to vector<128x128xbf16>
    %cst_256 = arith.constant dense<0.000000e+00> : vector<16x128xf32>
    %258 = tpu.matmul %250, %257, %cst_256 {dimension_numbers = #tpu.dot_dimension_numbers<[1], [0], [0], [1], [0, 0, 1, 1], [], []>} : vector<16x128xbf16>, vector<128x128xbf16>, vector<16x128xf32> -> vector<16x128xf32>
    %259 = arith.addf %255, %258 : vector<16x128xf32>
    %c1_257 = arith.constant 1 : index
    %c256_258 = arith.constant 256 : index
    %c0_259 = arith.constant 0 : index
    %260 = vector.load %arg14[%c1_257, %c256_258, %c0_259] : memref<4x384x128xbf16, #tpu.memory_space<vmem>>, vector<1x128x128xbf16>
    %261 = vector.shape_cast %260 : vector<1x128x128xbf16> to vector<128x128xbf16>
    %cst_260 = arith.constant dense<0.000000e+00> : vector<16x128xf32>
    %262 = tpu.matmul %252, %261, %cst_260 {dimension_numbers = #tpu.dot_dimension_numbers<[1], [0], [0], [1], [0, 0, 1, 1], [], []>} : vector<16x128xbf16>, vector<128x128xbf16>, vector<16x128xf32> -> vector<16x128xf32>
    %263 = arith.addf %259, %262 : vector<16x128xf32>
    %264 = vector.broadcast %246 : vector<1x128xf32> to vector<16x128xf32>
    %265 = arith.addf %263, %264 : vector<16x128xf32>
    %266 = arith.addf %245, %265 : vector<16x128xf32>
    %c0_261 = arith.constant 0 : index
    %c0_262 = arith.constant 0 : index
    %267 = vector.load %arg22[%c0_261, %c0_262] : memref<32x128xf32, #tpu.memory_space<vmem>>, vector<16x128xf32>
    tpu.vector_store %arg22[%c0_261, %c0_262], %266 {strides = array<i32>} : memref<32x128xf32, #tpu.memory_space<vmem>>, vector<16x128xf32>,
    %c0_263 = arith.constant 0 : index
    %c0_264 = arith.constant 0 : index
    %268 = vector.load %arg22[%c0_263, %c0_264] : memref<32x128xf32, #tpu.memory_space<vmem>>, vector<16x128xf32>
    %c2_265 = arith.constant 2 : index
    %c0_266 = arith.constant 0 : index
    %269 = vector.load %arg12[%c2_265, %c0_266] : memref<4x128xf32, #tpu.memory_space<vmem>>, vector<1x128xf32>
    %270 = vector.broadcast %269 : vector<1x128xf32> to vector<16x128xf32>
    %271 = arith.mulf %268, %270 : vector<16x128xf32>
    %c2_267 = arith.constant 2 : index
    %c0_268 = arith.constant 0 : index
    %272 = vector.load %arg13[%c2_267, %c0_268] : memref<4x128xf32, #tpu.memory_space<vmem>>, vector<1x128xf32>
    %273 = vector.broadcast %272 : vector<1x128xf32> to vector<16x128xf32>
    %274 = arith.addf %271, %273 : vector<16x128xf32>
    %cst_269 = arith.constant 0.000000e+00 : f32
    %275 = vector.broadcast %cst_269 : f32 to vector<16x128xf32>
    %276 = arith.maximumf %274, %275 : vector<16x128xf32>
    %277 = vector.shape_cast %276 : vector<16x128xf32> to vector<2x8x128xf32>
    %278 = arith.truncf %277 : vector<2x8x128xf32> to vector<2x8x128xbf16>
    %c0_270 = arith.constant 0 : index
    %c1_271 = arith.constant 1 : index
    %c0_272 = arith.constant 0 : index
    %279 = vector.load %arg21[%c0_270, %c1_271, %c0_272] : memref<2x18x128xbf16, #tpu.memory_space<vmem>>, vector<2x8x128xbf16>
    tpu.vector_store %arg21[%c0_270, %c1_271, %c0_272], %278 {strides = array<i32>} : memref<2x18x128xbf16, #tpu.memory_space<vmem>>, vector<2x8x128xbf16>,
    %c0_273 = arith.constant 0 : index
    %c0_274 = arith.constant 0 : index
    %280 = vector.load %arg22[%c0_273, %c0_274] : memref<32x128xf32, #tpu.memory_space<vmem>>, vector<16x128xf32>
    %c2_275 = arith.constant 2 : index
    %c0_276 = arith.constant 0 : index
    %281 = vector.load %arg15[%c2_275, %c0_276] : memref<4x128xf32, #tpu.memory_space<vmem>>, vector<1x128xf32>
    %c0_277 = arith.constant 0 : index
    %c0_278 = arith.constant 0 : index
    %c0_279 = arith.constant 0 : index
    %282 = vector.load %arg21[%c0_277, %c0_278, %c0_279] : memref<2x18x128xbf16, #tpu.memory_space<vmem>>, vector<2x8x128xbf16>
    %283 = vector.shape_cast %282 : vector<2x8x128xbf16> to vector<16x128xbf16>
    %c0_280 = arith.constant 0 : index
    %c1_281 = arith.constant 1 : index
    %c0_282 = arith.constant 0 : index
    %284 = vector.load %arg21[%c0_280, %c1_281, %c0_282] : memref<2x18x128xbf16, #tpu.memory_space<vmem>>, vector<2x8x128xbf16>
    %285 = vector.shape_cast %284 : vector<2x8x128xbf16> to vector<16x128xbf16>
    %c0_283 = arith.constant 0 : index
    %c2_284 = arith.constant 2 : index
    %c0_285 = arith.constant 0 : index
    %286 = vector.load %arg21[%c0_283, %c2_284, %c0_285] : memref<2x18x128xbf16, #tpu.memory_space<vmem>>, vector<2x8x128xbf16>
    %287 = vector.shape_cast %286 : vector<2x8x128xbf16> to vector<16x128xbf16>
    %c2_286 = arith.constant 2 : index
    %c0_287 = arith.constant 0 : index
    %c0_288 = arith.constant 0 : index
    %288 = vector.load %arg14[%c2_286, %c0_287, %c0_288] : memref<4x384x128xbf16, #tpu.memory_space<vmem>>, vector<1x128x128xbf16>
    %289 = vector.shape_cast %288 : vector<1x128x128xbf16> to vector<128x128xbf16>
    %cst_289 = arith.constant dense<0.000000e+00> : vector<16x128xf32>
    %290 = tpu.matmul %283, %289, %cst_289 {dimension_numbers = #tpu.dot_dimension_numbers<[1], [0], [0], [1], [0, 0, 1, 1], [], []>} : vector<16x128xbf16>, vector<128x128xbf16>, vector<16x128xf32> -> vector<16x128xf32>
    %c2_290 = arith.constant 2 : index
    %c128_291 = arith.constant 128 : index
    %c0_292 = arith.constant 0 : index
    %291 = vector.load %arg14[%c2_290, %c128_291, %c0_292] : memref<4x384x128xbf16, #tpu.memory_space<vmem>>, vector<1x128x128xbf16>
    %292 = vector.shape_cast %291 : vector<1x128x128xbf16> to vector<128x128xbf16>
    %cst_293 = arith.constant dense<0.000000e+00> : vector<16x128xf32>
    %293 = tpu.matmul %285, %292, %cst_293 {dimension_numbers = #tpu.dot_dimension_numbers<[1], [0], [0], [1], [0, 0, 1, 1], [], []>} : vector<16x128xbf16>, vector<128x128xbf16>, vector<16x128xf32> -> vector<16x128xf32>
    %294 = arith.addf %290, %293 : vector<16x128xf32>
    %c2_294 = arith.constant 2 : index
    %c256_295 = arith.constant 256 : index
    %c0_296 = arith.constant 0 : index
    %295 = vector.load %arg14[%c2_294, %c256_295, %c0_296] : memref<4x384x128xbf16, #tpu.memory_space<vmem>>, vector<1x128x128xbf16>
    %296 = vector.shape_cast %295 : vector<1x128x128xbf16> to vector<128x128xbf16>
    %cst_297 = arith.constant dense<0.000000e+00> : vector<16x128xf32>
    %297 = tpu.matmul %287, %296, %cst_297 {dimension_numbers = #tpu.dot_dimension_numbers<[1], [0], [0], [1], [0, 0, 1, 1], [], []>} : vector<16x128xbf16>, vector<128x128xbf16>, vector<16x128xf32> -> vector<16x128xf32>
    %298 = arith.addf %294, %297 : vector<16x128xf32>
    %299 = vector.broadcast %281 : vector<1x128xf32> to vector<16x128xf32>
    %300 = arith.addf %298, %299 : vector<16x128xf32>
    %301 = arith.addf %280, %300 : vector<16x128xf32>
    %c0_298 = arith.constant 0 : index
    %c0_299 = arith.constant 0 : index
    %302 = vector.load %arg22[%c0_298, %c0_299] : memref<32x128xf32, #tpu.memory_space<vmem>>, vector<16x128xf32>
    tpu.vector_store %arg22[%c0_298, %c0_299], %301 {strides = array<i32>} : memref<32x128xf32, #tpu.memory_space<vmem>>, vector<16x128xf32>,
    %c0_300 = arith.constant 0 : index
    %c0_301 = arith.constant 0 : index
    %303 = vector.load %arg22[%c0_300, %c0_301] : memref<32x128xf32, #tpu.memory_space<vmem>>, vector<16x128xf32>
    %c3_302 = arith.constant 3 : index
    %c0_303 = arith.constant 0 : index
    %304 = vector.load %arg12[%c3_302, %c0_303] : memref<4x128xf32, #tpu.memory_space<vmem>>, vector<1x128xf32>
    %305 = vector.broadcast %304 : vector<1x128xf32> to vector<16x128xf32>
    %306 = arith.mulf %303, %305 : vector<16x128xf32>
    %c3_304 = arith.constant 3 : index
    %c0_305 = arith.constant 0 : index
    %307 = vector.load %arg13[%c3_304, %c0_305] : memref<4x128xf32, #tpu.memory_space<vmem>>, vector<1x128xf32>
    %308 = vector.broadcast %307 : vector<1x128xf32> to vector<16x128xf32>
    %309 = arith.addf %306, %308 : vector<16x128xf32>
    %cst_306 = arith.constant 0.000000e+00 : f32
    %310 = vector.broadcast %cst_306 : f32 to vector<16x128xf32>
    %311 = arith.maximumf %309, %310 : vector<16x128xf32>
    %312 = vector.shape_cast %311 : vector<16x128xf32> to vector<2x8x128xf32>
    %313 = arith.truncf %312 : vector<2x8x128xf32> to vector<2x8x128xbf16>
    %c0_307 = arith.constant 0 : index
    %c1_308 = arith.constant 1 : index
    %c0_309 = arith.constant 0 : index
    %314 = vector.load %arg21[%c0_307, %c1_308, %c0_309] : memref<2x18x128xbf16, #tpu.memory_space<vmem>>, vector<2x8x128xbf16>
    tpu.vector_store %arg21[%c0_307, %c1_308, %c0_309], %313 {strides = array<i32>} : memref<2x18x128xbf16, #tpu.memory_space<vmem>>, vector<2x8x128xbf16>,
    %c0_310 = arith.constant 0 : index
    %c0_311 = arith.constant 0 : index
    %315 = vector.load %arg22[%c0_310, %c0_311] : memref<32x128xf32, #tpu.memory_space<vmem>>, vector<16x128xf32>
    %c3_312 = arith.constant 3 : index
    %c0_313 = arith.constant 0 : index
    %316 = vector.load %arg15[%c3_312, %c0_313] : memref<4x128xf32, #tpu.memory_space<vmem>>, vector<1x128xf32>
    %c0_314 = arith.constant 0 : index
    %c0_315 = arith.constant 0 : index
    %c0_316 = arith.constant 0 : index
    %317 = vector.load %arg21[%c0_314, %c0_315, %c0_316] : memref<2x18x128xbf16, #tpu.memory_space<vmem>>, vector<2x8x128xbf16>
    %318 = vector.shape_cast %317 : vector<2x8x128xbf16> to vector<16x128xbf16>
    %c0_317 = arith.constant 0 : index
    %c1_318 = arith.constant 1 : index
    %c0_319 = arith.constant 0 : index
    %319 = vector.load %arg21[%c0_317, %c1_318, %c0_319] : memref<2x18x128xbf16, #tpu.memory_space<vmem>>, vector<2x8x128xbf16>
    %320 = vector.shape_cast %319 : vector<2x8x128xbf16> to vector<16x128xbf16>
    %c0_320 = arith.constant 0 : index
    %c2_321 = arith.constant 2 : index
    %c0_322 = arith.constant 0 : index
    %321 = vector.load %arg21[%c0_320, %c2_321, %c0_322] : memref<2x18x128xbf16, #tpu.memory_space<vmem>>, vector<2x8x128xbf16>
    %322 = vector.shape_cast %321 : vector<2x8x128xbf16> to vector<16x128xbf16>
    %c3_323 = arith.constant 3 : index
    %c0_324 = arith.constant 0 : index
    %c0_325 = arith.constant 0 : index
    %323 = vector.load %arg14[%c3_323, %c0_324, %c0_325] : memref<4x384x128xbf16, #tpu.memory_space<vmem>>, vector<1x128x128xbf16>
    %324 = vector.shape_cast %323 : vector<1x128x128xbf16> to vector<128x128xbf16>
    %cst_326 = arith.constant dense<0.000000e+00> : vector<16x128xf32>
    %325 = tpu.matmul %318, %324, %cst_326 {dimension_numbers = #tpu.dot_dimension_numbers<[1], [0], [0], [1], [0, 0, 1, 1], [], []>} : vector<16x128xbf16>, vector<128x128xbf16>, vector<16x128xf32> -> vector<16x128xf32>
    %c3_327 = arith.constant 3 : index
    %c128_328 = arith.constant 128 : index
    %c0_329 = arith.constant 0 : index
    %326 = vector.load %arg14[%c3_327, %c128_328, %c0_329] : memref<4x384x128xbf16, #tpu.memory_space<vmem>>, vector<1x128x128xbf16>
    %327 = vector.shape_cast %326 : vector<1x128x128xbf16> to vector<128x128xbf16>
    %cst_330 = arith.constant dense<0.000000e+00> : vector<16x128xf32>
    %328 = tpu.matmul %320, %327, %cst_330 {dimension_numbers = #tpu.dot_dimension_numbers<[1], [0], [0], [1], [0, 0, 1, 1], [], []>} : vector<16x128xbf16>, vector<128x128xbf16>, vector<16x128xf32> -> vector<16x128xf32>
    %329 = arith.addf %325, %328 : vector<16x128xf32>
    %c3_331 = arith.constant 3 : index
    %c256_332 = arith.constant 256 : index
    %c0_333 = arith.constant 0 : index
    %330 = vector.load %arg14[%c3_331, %c256_332, %c0_333] : memref<4x384x128xbf16, #tpu.memory_space<vmem>>, vector<1x128x128xbf16>
    %331 = vector.shape_cast %330 : vector<1x128x128xbf16> to vector<128x128xbf16>
    %cst_334 = arith.constant dense<0.000000e+00> : vector<16x128xf32>
    %332 = tpu.matmul %322, %331, %cst_334 {dimension_numbers = #tpu.dot_dimension_numbers<[1], [0], [0], [1], [0, 0, 1, 1], [], []>} : vector<16x128xbf16>, vector<128x128xbf16>, vector<16x128xf32> -> vector<16x128xf32>
    %333 = arith.addf %329, %332 : vector<16x128xf32>
    %334 = vector.broadcast %316 : vector<1x128xf32> to vector<16x128xf32>
    %335 = arith.addf %333, %334 : vector<16x128xf32>
    %336 = arith.addf %315, %335 : vector<16x128xf32>
    %c0_335 = arith.constant 0 : index
    %c0_336 = arith.constant 0 : index
    %337 = vector.load %arg22[%c0_335, %c0_336] : memref<32x128xf32, #tpu.memory_space<vmem>>, vector<16x128xf32>
    tpu.vector_store %arg22[%c0_335, %c0_336], %336 {strides = array<i32>} : memref<32x128xf32, #tpu.memory_space<vmem>>, vector<16x128xf32>,
    %c0_337 = arith.constant 0 : index
    %c0_338 = arith.constant 0 : index
    %338 = vector.load %arg22[%c0_337, %c0_338] : memref<32x128xf32, #tpu.memory_space<vmem>>, vector<16x128xf32>
    %339 = vector.shape_cast %338 : vector<16x128xf32> to vector<2x8x128xf32>
    %340 = vector.extract_strided_slice %339 {offsets = [0, 0, 0], sizes = [2, 2, 128], strides = [1, 1, 1]} : vector<2x8x128xf32> to vector<2x2x128xf32>
    %cst_339 = arith.constant dense<0xFF800000> : vector<2x128xf32>
    %341 = vector.multi_reduction <maximumf>, %340, %cst_339 [1] : vector<2x2x128xf32> to vector<2x128xf32>
    %342 = vector.extract_strided_slice %339 {offsets = [0, 2, 0], sizes = [2, 2, 128], strides = [1, 1, 1]} : vector<2x8x128xf32> to vector<2x2x128xf32>
    %cst_340 = arith.constant dense<0xFF800000> : vector<2x128xf32>
    %343 = vector.multi_reduction <maximumf>, %342, %cst_340 [1] : vector<2x2x128xf32> to vector<2x128xf32>
    %344 = vector.extract_strided_slice %339 {offsets = [0, 4, 0], sizes = [2, 2, 128], strides = [1, 1, 1]} : vector<2x8x128xf32> to vector<2x2x128xf32>
    %cst_341 = arith.constant dense<0xFF800000> : vector<2x128xf32>
    %345 = vector.multi_reduction <maximumf>, %344, %cst_341 [1] : vector<2x2x128xf32> to vector<2x128xf32>
    %346 = vector.extract_strided_slice %339 {offsets = [0, 6, 0], sizes = [2, 2, 128], strides = [1, 1, 1]} : vector<2x8x128xf32> to vector<2x2x128xf32>
    %cst_342 = arith.constant dense<0xFF800000> : vector<2x128xf32>
    %347 = vector.multi_reduction <maximumf>, %346, %cst_342 [1] : vector<2x2x128xf32> to vector<2x128xf32>
    %348 = tpu.concatenate %341, %343, %345, %347 in 1 : vector<2x128xf32>, vector<2x128xf32>, vector<2x128xf32>, vector<2x128xf32> -> vector<2x512xf32>
    %349 = arith.truncf %348 : vector<2x512xf32> to vector<2x512xbf16>
    %c0_343 = arith.constant 0 : index
    %c0_344 = arith.constant 0 : index
    %350 = vector.load %arg16[%c0_343, %c0_344] : memref<512x64xbf16, #tpu.memory_space<vmem>>, vector<512x64xbf16>
    %cst_345 = arith.constant dense<0.000000e+00> : vector<2x64xf32>
    %351 = tpu.matmul %349, %350, %cst_345 {dimension_numbers = #tpu.dot_dimension_numbers<[1], [0], [0], [1], [0, 0, 1, 1], [], []>} : vector<2x512xbf16>, vector<512x64xbf16>, vector<2x64xf32> -> vector<2x64xf32>
    %c0_346 = arith.constant 0 : index
    %c0_347 = arith.constant 0 : index
    %352 = vector.load %arg17[%c0_346, %c0_347] : memref<1x64xf32, #tpu.memory_space<vmem>>, vector<1x64xf32>
    %353 = vector.broadcast %352 : vector<1x64xf32> to vector<2x64xf32>
    %354 = arith.addf %351, %353 : vector<2x64xf32>
    %cst_348 = arith.constant 0.000000e+00 : f32
    %355 = vector.broadcast %cst_348 : f32 to vector<2x64xf32>
    %356 = arith.maximumf %354, %355 : vector<2x64xf32>
    %357 = arith.truncf %356 : vector<2x64xf32> to vector<2x64xbf16>
    %c0_349 = arith.constant 0 : index
    %c0_350 = arith.constant 0 : index
    %358 = vector.load %arg18[%c0_349, %c0_350] : memref<64x8xbf16, #tpu.memory_space<vmem>>, vector<64x8xbf16>
    %cst_351 = arith.constant dense<0.000000e+00> : vector<2x8xf32>
    %359 = tpu.matmul %357, %358, %cst_351 {dimension_numbers = #tpu.dot_dimension_numbers<[1], [0], [0], [1], [0, 0, 1, 1], [], []>} : vector<2x64xbf16>, vector<64x8xbf16>, vector<2x8xf32> -> vector<2x8xf32>
    %c0_352 = arith.constant 0 : index
    %c0_353 = arith.constant 0 : index
    %360 = vector.load %arg19[%c0_352, %c0_353] : memref<1x8xf32, #tpu.memory_space<vmem>>, vector<1x8xf32>
    %361 = vector.broadcast %360 : vector<1x8xf32> to vector<2x8xf32>
    %362 = arith.addf %359, %361 : vector<2x8xf32>
    %c0_354 = arith.constant 0 : index
    %c0_355 = arith.constant 0 : index
    %363 = vector.load %arg20[%c0_354, %c0_355] : memref<2x8xf32, #tpu.memory_space<vmem>>, vector<2x8xf32>
    tpu.vector_store %arg20[%c0_354, %c0_355], %362 {strides = array<i32>} : memref<2x8xf32, #tpu.memory_space<vmem>>, vector<2x8xf32>,
    return
  }
  func.func @transform_0(%arg0: i32) -> (i32, i32, i32) {
    %c0_i32 = arith.constant 0 : i32
    %c0_i32_0 = arith.constant 0 : i32
    %c0_i32_1 = arith.constant 0 : i32
    return %arg0, %c0_i32, %c0_i32_0 : i32, i32, i32
  }
  func.func @transform_1(%arg0: i32) -> (i32, i32) {
    %c0_i32 = arith.constant 0 : i32
    %c0_i32_0 = arith.constant 0 : i32
    %c0_i32_1 = arith.constant 0 : i32
    return %c0_i32, %c0_i32_0 : i32, i32
  }
  func.func @transform_2(%arg0: i32) -> (i32, i32) {
    %c0_i32 = arith.constant 0 : i32
    %c0_i32_0 = arith.constant 0 : i32
    %c0_i32_1 = arith.constant 0 : i32
    return %c0_i32, %c0_i32_0 : i32, i32
  }
  func.func @transform_3(%arg0: i32) -> (i32, i32) {
    %c0_i32 = arith.constant 0 : i32
    %c0_i32_0 = arith.constant 0 : i32
    %c0_i32_1 = arith.constant 0 : i32
    return %c0_i32, %c0_i32_0 : i32, i32
  }
  func.func @transform_4(%arg0: i32) -> (i32, i32) {
    %c0_i32 = arith.constant 0 : i32
    %c0_i32_0 = arith.constant 0 : i32
    %c0_i32_1 = arith.constant 0 : i32
    return %c0_i32, %c0_i32_0 : i32, i32
  }
  func.func @transform_5(%arg0: i32) -> (i32, i32, i32) {
    %c0_i32 = arith.constant 0 : i32
    %c0_i32_0 = arith.constant 0 : i32
    %c0_i32_1 = arith.constant 0 : i32
    %c0_i32_2 = arith.constant 0 : i32
    return %c0_i32, %c0_i32_0, %c0_i32_1 : i32, i32, i32
  }
  func.func @transform_6(%arg0: i32) -> (i32, i32) {
    %c0_i32 = arith.constant 0 : i32
    %c0_i32_0 = arith.constant 0 : i32
    %c0_i32_1 = arith.constant 0 : i32
    return %c0_i32, %c0_i32_0 : i32, i32
  }
  func.func @transform_7(%arg0: i32) -> (i32, i32) {
    %c0_i32 = arith.constant 0 : i32
    %c0_i32_0 = arith.constant 0 : i32
    %c0_i32_1 = arith.constant 0 : i32
    return %c0_i32, %c0_i32_0 : i32, i32
  }
  func.func @transform_8(%arg0: i32) -> (i32, i32) {
    %c0_i32 = arith.constant 0 : i32
    %c0_i32_0 = arith.constant 0 : i32
    %c0_i32_1 = arith.constant 0 : i32
    return %c0_i32, %c0_i32_0 : i32, i32
  }
  func.func @transform_9(%arg0: i32) -> (i32, i32) {
    %c0_i32 = arith.constant 0 : i32
    %c0_i32_0 = arith.constant 0 : i32
    %c0_i32_1 = arith.constant 0 : i32
    return %c0_i32, %c0_i32_0 : i32, i32
  }
  func.func @transform_10(%arg0: i32) -> (i32, i32) {
    %c0_i32 = arith.constant 0 : i32
    %c0_i32_0 = arith.constant 0 : i32
    %c0_i32_1 = arith.constant 0 : i32
    return %c0_i32, %c0_i32_0 : i32, i32
  }
  func.func @transform_11(%arg0: i32) -> (i32, i32) {
    %c0_i32 = arith.constant 0 : i32
    %c0_i32_0 = arith.constant 0 : i32
    %c0_i32_1 = arith.constant 0 : i32
    return %c0_i32, %c0_i32_0 : i32, i32
  }
  func.func @transform_12(%arg0: i32) -> (i32, i32) {
    %c0_i32 = arith.constant 0 : i32
    %c0_i32_0 = arith.constant 0 : i32
    %c0_i32_1 = arith.constant 0 : i32
    return %c0_i32, %c0_i32_0 : i32, i32
  }
  func.func @transform_13(%arg0: i32) -> (i32, i32, i32) {
    %c0_i32 = arith.constant 0 : i32
    %c0_i32_0 = arith.constant 0 : i32
    %c0_i32_1 = arith.constant 0 : i32
    %c0_i32_2 = arith.constant 0 : i32
    return %c0_i32, %c0_i32_0, %c0_i32_1 : i32, i32, i32
  }
  func.func @transform_14(%arg0: i32) -> (i32, i32) {
    %c0_i32 = arith.constant 0 : i32
    %c0_i32_0 = arith.constant 0 : i32
    %c0_i32_1 = arith.constant 0 : i32
    return %c0_i32, %c0_i32_0 : i32, i32
  }
  func.func @transform_15(%arg0: i32) -> (i32, i32) {
    %c0_i32 = arith.constant 0 : i32
    %c0_i32_0 = arith.constant 0 : i32
    %c0_i32_1 = arith.constant 0 : i32
    return %c0_i32, %c0_i32_0 : i32, i32
  }
  func.func @transform_16(%arg0: i32) -> (i32, i32) {
    %c0_i32 = arith.constant 0 : i32
    %c0_i32_0 = arith.constant 0 : i32
    %c0_i32_1 = arith.constant 0 : i32
    return %c0_i32, %c0_i32_0 : i32, i32
  }
  func.func @transform_17(%arg0: i32) -> (i32, i32) {
    %c0_i32 = arith.constant 0 : i32
    %c0_i32_0 = arith.constant 0 : i32
    %c0_i32_1 = arith.constant 0 : i32
    return %c0_i32, %c0_i32_0 : i32, i32
  }
  func.func @transform_18(%arg0: i32) -> (i32, i32) {
    %c0_i32 = arith.constant 0 : i32
    %c0_i32_0 = arith.constant 0 : i32
    %c0_i32_1 = arith.constant 0 : i32
    return %c0_i32, %c0_i32_0 : i32, i32
  }
  func.func @transform_19(%arg0: i32) -> (i32, i32) {
    %c0_i32 = arith.constant 0 : i32
    %c0_i32_0 = arith.constant 0 : i32
    return %arg0, %c0_i32 : i32, i32
  }
}

</mosaic_0001>

<bundles_post_ra>
// kernel: dense_forward.1
= control target key start
LH: loop header
LB: loop body
LE: loop exit
PB: predicated region body
PF: predicated region fallthrough
CT: control target
= control target key end

     0   :  { %s7483_s0 = inlined_call_operand.vmem [shape: f32[2,18,1], index: 0, kind: input, shape index: {}]   ;;  %s7484_s1 = inlined_call_operand.vmem [shape: f32[3,128], index: 1, kind: input, shape index: {}]   ;;  %s7485_s2 = inlined_call_operand.vmem [shape: f32[1,128], index: 2, kind: input, shape index: {}]   ;;  %s7486_s3 = inlined_call_operand.vmem [shape: f32[4,128], index: 3, kind: input, shape index: {}]   ;;  %s7487_s4 = inlined_call_operand.vmem [shape: f32[4,128], index: 4, kind: input, shape index: {}]   ;;  %s7488_s5 = inlined_call_operand.hbm [shape: bf16[4,384,128], index: 5, kind: input, shape index: {}]   ;;  %s7489_s6 = inlined_call_operand.vmem [shape: f32[4,128], index: 6, kind: input, shape index: {}]   ;;  %s7490_s7 = inlined_call_operand.vmem [shape: f32[1,128], index: 7, kind: input, shape index: {}]   ;;  %s7491_s8 = inlined_call_operand.vmem [shape: f32[1,128], index: 8, kind: input, shape index: {}]   ;;  %s7492_s9 = inlined_call_operand.vmem [shape: bf16[128,128], index: 9, kind: input, shape index: {}]   ;;  %s7493_s10 = inlined_call_operand.vmem [shape: f32[1,128], index: 10, kind: input, shape index: {}]   ;;  %s7494_s11 = inlined_call_operand.vmem [shape: f32[4,128], index: 11, kind: input, shape index: {}]   ;;  %s7495_s12 = inlined_call_operand.vmem [shape: f32[4,128], index: 12, kind: input, shape index: {}]   ;;  %s7496_s13 = inlined_call_operand.hbm [shape: bf16[4,384,128], index: 13, kind: input, shape index: {}]   ;;  %s7497_s14 = inlined_call_operand.vmem [shape: f32[4,128], index: 14, kind: input, shape index: {}]   ;;  %s7498_s15 = inlined_call_operand.vmem [shape: bf16[512,64], index: 15, kind: input, shape index: {}]   ;;  %s7499_s16 = inlined_call_operand.vmem [shape: f32[1,64], index: 16, kind: input, shape index: {}]   ;;  %s7500_s17 = inlined_call_operand.vmem [shape: bf16[64,8], index: 17, kind: input, shape index: {}]   ;;  %s7501_s18 = inlined_call_operand.vmem [shape: f32[1,8], index: 18, kind: input, shape index: {}]   ;;  %s7502_s19 = inlined_call_operand.hbm [shape: f32[2,8], index: 19, kind: output, shape index: {}]  }
   0x1   :  { %7506 = sst [smem:[#allocation13_spill]] %s7483_s0 }
   0x2   :  { %7507 = sst [smem:[#allocation14_spill]] %s7484_s1 }
   0x3   :  { %7508 = sst [smem:[#allocation15_spill]] %s7485_s2 }
   0x4   :  { %7509 = sst [smem:[#allocation16_spill]] %s7486_s3 }
   0x5   :  { %24 = vsyncpa [#allocation5], 0 }
   0x6   :  { %25 = vsyncpa [#allocation8], 0 }
   0x7   :  { %26 = vsyncpa [#allocation6], 0  ;;  %s6494_s0 = smov [#allocation4]   ;;  %s6422_s1 = scalar_lea.hbm %s7488_s5, 12288 }
   0x8   :  { %s42_s30 = sshll.u32 %s6494_s0, 4  ;;  %p6423_p0 = scmp.ne.s32.totalorder %s7488_s5, %s6422_s1  ;;  %s43_s30 = int_to_ptr.vmem [resolvable:$true] %s42_s30 }
   0x9   :  { %p6426_p1 = scmp.lt.u32.totalorder %s6422_s1, %s7488_s5 }
   0xb   :  { %p6428_p2 = pnand %p6426_p1, %p6423_p0 }
   0xd   :  { %6431 = shalt.err (!%p6428_p2)
}
   0xe   :  { %s6432_s25 = scalar_lea.vmem %s43_s30, 12288  ;;  %p6437_p4 = scmp.lt.s32.totalorder %s43_s30, %s43_s30 }
   0xf   :  { %p6433_p3 = scmp.ne.s32.totalorder %s43_s30, %s6432_s25  ;;  %p6438_p5 = scmp.lt.s32.totalorder %s6432_s25, %s6432_s25 }
  0x11   :  { %p6439_p6 = por %p6438_p5, %p6437_p4 }
  0x13   :  { %p6440_p7 = pnand %p6439_p6, %p6433_p3 }
  0x15   :  { %6443 = shalt.err (!%p6440_p7)
}
  0x16   :  { %s6495_s3 = smov 64   ;;  %s6496_s26 = smov 4  }
  0x17   :  { %48 = dma.hbm_to_vmem [thread:$0]  %s7488_s5, 12288, %s43_s30, [#allocation5], %s6495_s3, %s6495_s3, %s6496_s26  }
  0x18   :  { %s6497_s29 = smov [#allocation7]   ;;  %s6444_s1 = scalar_lea.hbm %s7496_s13, 12288 }
  0x19   :  { %s68_s0 = sshll.u32 %s6497_s29, 4  ;;  %p6445_p8 = scmp.ne.s32.totalorder %s7496_s13, %s6444_s1  ;;  %s69_s0 = int_to_ptr.vmem [resolvable:$true] %s68_s0 }
  0x1a   :  { %p6448_p9 = scmp.lt.u32.totalorder %s6444_s1, %s7496_s13 }
  0x1c   :  { %p6450_p10 = pnand %p6448_p9, %p6445_p8 }
  0x1e   :  { %6453 = shalt.err (!%p6450_p10)
}
  0x1f   :  { %s6454_s25 = scalar_lea.vmem %s69_s0, 12288  ;;  %p6459_p12 = scmp.lt.s32.totalorder %s69_s0, %s69_s0 }
  0x20   :  { %p6455_p11 = scmp.ne.s32.totalorder %s69_s0, %s6454_s25  ;;  %p6460_p13 = scmp.lt.s32.totalorder %s6454_s25, %s6454_s25 }
  0x22   :  { %p6461_p0 = por %p6460_p13, %p6459_p12 }
  0x24   :  { %p6462_p1 = pnand %p6461_p0, %p6455_p11 }
  0x26   :  { %6465 = shalt.err (!%p6462_p1)
}
  0x27   :  { %74 = dma.hbm_to_vmem [thread:$0]  %s7496_s13, 12288, %s69_s0, [#allocation8], %s6495_s3, %s6495_s3, %s6496_s26  }
  0x28   :  { %6488 = dma.done.wait [#allocation5], 12288  }
  0x29   :  { %6489 = vsyncadd [#allocation5], 4294955008 }
  0x2a   :  { %6490 = dma.done.wait [#allocation8], 12288  }
  0x2b   :  { %6491 = vsyncadd [#allocation8], 4294955008  ;;  %v6498_v0 = vmov 0   ;;  %s7510_s29 = sld [smem:[#allocation13_spill]]  ;;  %vm92_vm0 = vcmask 1040384   ;;  %v6176_v15 = vld [vmem:[#allocation4 + $0x40] sm:$0xff]  }
  0x2c   :  { %6175 = vset.pattern.permute.xlu1 %v6498_v0  ;;  %6174 = vset.pattern.permute.xlu0 %v6498_v0  ;;  %vm93_vm1 = vsmask.f32 256  ;;  %vm101_vm2 = vsmask.f32 7938  ;;  %v95_v14 = vld [vmem:[#allocation2] sm:$0x1] }
  0x2d   :  { %vm6663_vm3 = vmand %vm92_vm0, %vm93_vm1  ;;  %v103_v18 = vld [vmem:[#allocation2 + $0x8] sm:$0x1]  ;;  %5622 = vmatprep.subr.bf16.mxu0 %v6176_v15  ;;  %v106_v20 = vld [vmem:[#allocation2 + $0x14] sm:$0x1]  ;;  %s7515_s0 = sld [smem:[#allocation14_spill]]  ;;  %s7516_s27 = sld [smem:[#allocation15_spill]] }
  0x2e   :  { %v96_v16 = vsel %vm6663_vm3, 0, %v95_v14  ;;  %vm6670_vm4 = vmand %vm92_vm0, %vm101_vm2  ;;  %5623 = vmatpush3.bf16.msra.mxu0 %v6176_v15  ;;  %v6177_v21 = vld [vmem:[#allocation4 + $0x48] sm:$0xff]   ;;  %v98_v23 = vld [vmem:[#allocation2 + $0xc] sm:$0x1]  ;;  %s7517_s21 = sld [smem:[#allocation16_spill]]  ;;  %vm311_vm6 = vcmask 1043456  }
  0x2f   :  { %97 = vst [vmem:[#allocation2] sm:$0x1] %v96_v16  ;;  %v104_v19 = vsel %vm6670_vm4, 0, %v103_v18  ;;  %v107_v22 = vsel %vm6670_vm4, 0, %v106_v20  ;;  %v99_v24 = vsel %vm6663_vm3, 0, %v98_v23  ;;  %5624 = vmatprep.subr.bf16.mxu0 %v6177_v21  ;;  %v6178_v25 = vld [vmem:[#allocation4 + $0x50] sm:$0xff]   ;;  %vm6721_vm8 = vmand %vm311_vm6, %vm101_vm2 }
  0x30   :  { %105 = vst [vmem:[#allocation2 + $0x8] sm:$0x1] %v104_v19  ;;  %108 = vst [vmem:[#allocation2 + $0x14] sm:$0x1] %v107_v22  ;;  %v6179_v26 = vld [vmem:[#allocation4 + $0x58] sm:$0xff]   ;;  %v6180_v27 = vld [vmem:[#allocation4 + $0x60] sm:$0xff]  }
  0x31   :  { %v142_v1 = vld [vmem:[%s7510_s29 + $0x1] sm:$0xff]  ;;  %v143_v3 = vld [vmem:[%s7510_s29 + $0x9] sm:$0xff]  ;;  %v111_v6 = vld [vmem:[%s7510_s29 + $0x18] sm:$0xff]  ;;  %100 = vst [vmem:[#allocation2 + $0xc] sm:$0x1] %v99_v24  ;;  %vm397_vm12 = vcmask 1042432  }
  0x32   :  { %v109_v2 = vld [vmem:[%s7510_s29] sm:$0xff]  ;;  %149 = vperm.xlu1 %6175, %v142_v1   ;;  %v110_v4 = vld [vmem:[%s7510_s29 + $0x8] sm:$0xff]  ;;  %5625 = vmatpush3.bf16.msra.mxu0 %v6177_v21  ;;  %v6182_v29 = vld [vmem:[#allocation4 + $0x70] sm:$0xff]   ;;  %vm269_vm5 = vsmask.f32 4368  ;;  %vm398_vm13 = vcmask 1046532  }
  0x33   :  { %116 = vperm.xlu0 %6174, %v109_v2   ;;  %v112_v5 = vld [vmem:[%s7510_s29 + $0x20] sm:$0xff]  ;;  %v180_v9 = vld [vmem:[%s7510_s29 + $0xa] sm:$0xff]  ;;  %5626 = vmatprep.subr.bf16.mxu0 %v6178_v25  ;;  %v6183_v30 = vld [vmem:[#allocation4 + $0x78] sm:$0xff]   ;;  %vm338_vm9 = vsmask.f32 3328  ;;  %vm6500_vm15 = vmmov 0  }
  0x34   :  { %v145_v7 = vld [vmem:[%s7510_s29 + $0x21] sm:$0xff]  ;;  %v144_v8 = vld [vmem:[%s7510_s29 + $0x19] sm:$0xff]  ;;  %vm6715_vm7 = vmor %vm93_vm1, %vm269_vm5  ;;  %vm339_vm10 = vsmask.f32 7440  ;;  %vm4454_vm0 = vcmask 1043458   ;;  %vm4484_vm1 = vcmask 1047558  }
  0x35   :  { %v179_v10 = vld [vmem:[%s7510_s29 + $0x2] sm:$0xff]  ;;  %v181_v12 = vld [vmem:[%s7510_s29 + $0x1a] sm:$0xff]  ;;  %vm6750_vm11 = vmor %vm338_vm9, %vm339_vm10  ;;  %vm4439_vm2 = vcmask 1041408   ;;  %vm4904_vm5 = vcmask 523264   ;;  %vm4948_vm6 = vcmask 58368  }
  0x36   :  { %154 = vperm.xlu1 %6175, %v143_v3   ;;  %v182_v11 = vld [vmem:[%s7510_s29 + $0x22] sm:$0xff]  ;;  %5627 = vmatpush3.bf16.msra.mxu0 %v6178_v25  ;;  %v4967_v36 = vld [vmem:[%s7515_s0 + $0x1] ss:$0 sm:$0xff]  ;;  %v4966_v37 = vld [vmem:[%s7515_s0] ss:$0 sm:$0xff] }
  0x37   :  { %121 = vperm.xlu0 %6174, %v110_v4   ;;  %5628 = vmatprep.subr.bf16.mxu0 %v6179_v26  ;;  %v6181_v28 = vld [vmem:[#allocation4 + $0x68] sm:$0xff]   ;;  %v6680_v31 = vld [vmem:[#allocation4] sm:$0xff]   ;;  %vm6771_vm14 = vmor %vm397_vm12, %vm398_vm13 }
  0x38   :  { %v4968_v42 = vld [vmem:[%s7515_s0 + $0x2] ss:$0 sm:$0xff]  ;;  %v4969_v49 = vld [vmem:[%s7516_s27] ss:$0 sm:$0xff] }
  0x39   :  { %v4970_v58 = vld [vmem:[%s7517_s21] ss:$0 sm:$0xff] }
  0x3a   :  { %131 = vperm.xlu1 %6175, %v112_v5   ;;  %5629 = vmatpush3.bf16.msra.mxu0 %v6179_v26  ;;  %v4971_v63 = vld [vmem:[%s7487_s4] ss:$0 sm:$0xff] }
  0x3b   :  { %126 = vperm.xlu0 %6174, %v111_v6   ;;  %5630 = vmatprep.subr.bf16.mxu0 %v6180_v27 }
  0x3e   :  { %164 = vperm.xlu1 %6175, %v145_v7   ;;  %5631 = vmatpush3.bf16.msra.mxu0 %v6180_v27 }
  0x3f   :  { %159 = vperm.xlu0 %6174, %v144_v8   ;;  %5632 = vmatprep.subr.bf16.mxu0 %v6181_v28 }
  0x42   :  { %191 = vperm.xlu1 %6175, %v180_v9   ;;  %5633 = vmatpush3.bf16.msra.mxu0 %v6181_v28 }
  0x43   :  { %186 = vperm.xlu0 %6174, %v179_v10   ;;  %5634 = vmatprep.subr.bf16.mxu0 %v6182_v29 }
  0x46   :  { %201 = vperm.xlu1 %6175, %v182_v11   ;;  %5635 = vmatpush3.bf16.msra.mxu0 %v6182_v29  ;;  %v313_v29 = vld [vmem:[#allocation2] sm:$0xf] }
  0x47   :  { %196 = vperm.xlu0 %6174, %v181_v12   ;;  %5636 = vmatprep.subr.bf16.mxu0 %v6183_v30 }
  0x4a   :  { %5637 = vmatpush3.bf16.msra.mxu0 %v6183_v30 }
  0x4b   :  { %5642 = vmatprep.subr.bf16.mxu0 %v6680_v31 }
  0xb1   :  { %v150_v32 = vpop.permute.xlu1 %149 }
  0xb2   :  { %v117_v33 = vpop.permute.xlu0 %116  ;;  %v171_v43 = vmul.f32 %v4967_v36, %v150_v32 }
  0xb3   :  { %v138_v44 = vmul.f32 %v4966_v37, %v117_v33  ;;  %v317_v33 = vld [vmem:[#allocation2 + $0x8] sm:$0x1] }
  0xb5   :  { %v155_v34 = vpop.permute.xlu1 %154  ;;  %v175_v52 = vadd.f32 %v171_v43, %v138_v44 }
  0xb6   :  { %v122_v35 = vpop.permute.xlu0 %121  ;;  %v172_v45 = vmul.f32 %v4967_v36, %v155_v34 }
  0xb7   :  { %v139_v46 = vmul.f32 %v4966_v37, %v122_v35 }
  0xb9   :  { %v132_v38 = vpop.permute.xlu1 %131  ;;  %v176_v53 = vadd.f32 %v172_v45, %v139_v46 }
  0xba   :  { %v127_v39 = vpop.permute.xlu0 %126  ;;  %v141_v56 = vmul.f32 %v4966_v37, %v132_v38 }
  0xbb   :  { %v140_v57 = vmul.f32 %v4966_v37, %v127_v39 }
  0xbd   :  { %v165_v40 = vpop.permute.xlu1 %164 }
  0xbe   :  { %v160_v41 = vpop.permute.xlu0 %159  ;;  %v174_v47 = vmul.f32 %v4967_v36, %v165_v40 }
  0xbf   :  { %v173_v48 = vmul.f32 %v4967_v36, %v160_v41 }
  0xc0   :  { %v178_v61 = vadd.f32 %v174_v47, %v141_v56 }
  0xc1   :  { %v192_v50 = vpop.permute.xlu1 %191  ;;  %v177_v62 = vadd.f32 %v173_v48, %v140_v57 }
  0xc2   :  { %v187_v51 = vpop.permute.xlu0 %186  ;;  %v209_v54 = vmul.f32 %v4968_v42, %v192_v50  ;;  %v320_v50 = vld [vmem:[#allocation2 + $0xc] sm:$0xf] }
  0xc3   :  { %v208_v55 = vmul.f32 %v4968_v42, %v187_v51 }
  0xc4   :  { %v213_v59 = vadd.f32 %v209_v54, %v176_v53 }
  0xc5   :  { %v212_v60 = vadd.f32 %v208_v55, %v175_v52  ;;  %v202_v0 = vpop.permute.xlu1 %201 }
  0xc6   :  { %v197_v1 = vpop.permute.xlu0 %196  ;;  %v6701_v2 = vadd.f32 %v4969_v49, %v213_v59  ;;  %v211_v4 = vmul.f32 %v4968_v42, %v202_v0 }
  0xc7   :  { %v6703_v3 = vadd.f32 %v4969_v49, %v212_v60  ;;  %v210_v5 = vmul.f32 %v4968_v42, %v197_v1 }
  0xc8   :  { %v241_v6 = vmul.f32 %v4970_v58, %v6701_v2  ;;  %v215_v8 = vadd.f32 %v211_v4, %v178_v61 }
  0xc9   :  { %v240_v7 = vmul.f32 %v4970_v58, %v6703_v3  ;;  %v214_v9 = vadd.f32 %v210_v5, %v177_v62 }
  0xca   :  { %v250_v10 = vadd.f32 %v4971_v63, %v241_v6  ;;  %v6707_v12 = vadd.f32 %v4969_v49, %v215_v8 }
  0xcb   :  { %v249_v11 = vadd.f32 %v4971_v63, %v240_v7  ;;  %v6709_v14 = vadd.f32 %v4969_v49, %v214_v9  ;;  %v324_v49 = vld [vmem:[#allocation2 + $0x14] sm:$0x1] }
  0xcc   :  { %v254_v15 = vmax.f32 %v250_v10, 0.0  ;;  %v243_v18 = vmul.f32 %v4970_v58, %v6707_v12 }
  0xcd   :  { %v253_v16 = vmax.f32 %v249_v11, 0.0  ;;  %v242_v19 = vmul.f32 %v4970_v58, %v6709_v14 }
  0xce   :  { %v5313_v20 = vpack.c.bf16 %v254_v15, %v254_v15  ;;  %v252_v22 = vadd.f32 %v4971_v63, %v243_v18 }
  0xcf   :  { %v5312_v21 = vpack.c.bf16 %v253_v16, %v253_v16  ;;  %v251_v23 = vadd.f32 %v4971_v63, %v242_v19 }
  0xd0   :  { %v280_v24 = vshrl.u32 %v5313_v20, 16  ;;  %v283_v25 = vshll.u32 %v5313_v20, 16  ;;  %v256_v30 = vmax.f32 %v252_v22, 0.0  ;;  %v6382_v20 = vld [vmem:[#allocation7 + $0x2e0] sm:$0xff]  }
  0xd1   :  { %v272_v26 = vshrl.u32 %v5312_v21, 16  ;;  %v275_v27 = vshll.u32 %v5312_v21, 16  ;;  %v255_v32 = vmax.f32 %v251_v23, 0.0 }
  0xd2   :  { %v282_v34 = vrot.slane %v280_v24, 7  ;;  %v5315_v37 = vpack.c.bf16 %v256_v30, %v256_v30 }
  0xd3   :  { %v274_v36 = vrot.slane %v272_v26, 7  ;;  %v5314_v38 = vpack.c.bf16 %v255_v32, %v255_v32 }
  0xd4   :  { %v285_v39 = vor.u32 %v283_v25, %v282_v34  ;;  %v287_v40 = vrot.slane %v282_v34, 4  ;;  %v297_v43 = vshrl.u32 %v5315_v37, 16  ;;  %v300_v44 = vshll.u32 %v5315_v37, 16 }
  0xd5   :  { %v277_v41 = vor.u32 %v275_v27, %v274_v36  ;;  %v278_v42 = vrot.slane %v274_v36, 4  ;;  %v289_v45 = vshrl.u32 %v5314_v38, 16  ;;  %v292_v46 = vshll.u32 %v5314_v38, 16 }
  0xd6   :  { %v318_v51 = vsel %vm6663_vm3, %v287_v40, %v317_v33  ;;  %v299_v52 = vrot.slane %v297_v43, 7 }
  0xd7   :  { %v286_v47 = vsel %vm6715_vm7, %v278_v42, %v285_v39  ;;  %v314_v48 = vsel %vm6721_vm8, %v277_v41, %v313_v29  ;;  %v291_v53 = vrot.slane %v289_v45, 7  ;;  %319 = vst [vmem:[#allocation2 + $0x8] sm:$0x1] %v318_v51  ;;  %v6189_v51 = vld [vmem:[#allocation4 + $0x20] sm:$0xff]  }
  0xd8   :  { %315 = vst [vmem:[#allocation2] sm:$0xf] %v314_v48  ;;  %316 = vst [vmem:[#allocation2 + $0x4] sm:$0xf] %v286_v47  ;;  %v302_v54 = vor.u32 %v300_v44, %v299_v52  ;;  %v304_v55 = vrot.slane %v299_v52, 4  ;;  %v6186_v44 = vld [vmem:[#allocation4 + $0x8] sm:$0xff]  }
  0xd9   :  { %v294_v56 = vor.u32 %v292_v46, %v291_v53  ;;  %v295_v57 = vrot.slane %v291_v53, 4  ;;  %v6190_v52 = vld [vmem:[#allocation4 + $0x28] sm:$0xff]   ;;  %v6191_v53 = vld [vmem:[#allocation4 + $0x30] sm:$0xff]  }
  0xda   :  { %v325_v58 = vsel %vm6663_vm3, %v304_v55, %v324_v49  ;;  %v6187_v49 = vld [vmem:[#allocation4 + $0x10] sm:$0xff]   ;;  %v6192_v55 = vld [vmem:[#allocation4 + $0x38] sm:$0xff]  }
  0xdb   :  { %v303_v59 = vsel %vm6715_vm7, %v295_v57, %v302_v54  ;;  %v321_v60 = vsel %vm6721_vm8, %v294_v56, %v320_v50  ;;  %326 = vst [vmem:[#allocation2 + $0x14] sm:$0x1] %v325_v58  ;;  %v6188_v50 = vld [vmem:[#allocation4 + $0x18] sm:$0xff]   ;;  %v6194_v57 = vld [vmem:[#allocation4 + $0x80] sm:$0xff]  }
  0xdc   :  { %322 = vst [vmem:[#allocation2 + $0xc] sm:$0xf] %v321_v60  ;;  %323 = vst [vmem:[#allocation2 + $0x10] sm:$0xf] %v303_v59  ;;  %v6390_v60 = vld [vmem:[%s7498_s15 + $0x48] sm:$0xff]  }
  0xde   :  { %v6739_v63 = vld [vmem:[#allocation2 + $0x8] sm:$0x1] }
  0xdf   :  { %v332_v61 = vld [vmem:[#allocation2] sm:$0xf]  ;;  %v6737_v62 = vld [vmem:[#allocation2 + $0x4] sm:$0xf]  ;;  %v361_v6 = vshll.u32 %v6739_v63, 16  ;;  %v405_v59 = vrot.slane %v6739_v63, 5 }
  0xe0   :  { %v342_v0 = vshrl.u32 %v332_v61, 16  ;;  %v345_v1 = vshll.u32 %v332_v61, 16  ;;  %v351_v4 = vshll.u32 %v6737_v62, 16  ;;  %v355_v5 = vshrl.u32 %v6737_v62, 16  ;;  %v6196_v63 = vld [vmem:[#allocation4 + $0x90] sm:$0xff]  }
  0xe1   :  { %v363_v27 = vrot.slane %v361_v6, 5  ;;  %v4988_v48 = vcombine.low %v332_v61, %v6737_v62  ;;  %v402_v54 = vrot.slane %v6737_v62, 5  ;;  %v6198_v6 = vld [vmem:[#allocation4 + $0xa0] sm:$0xff]  }
  0xe2   :  { %v344_v7 = vrot.slane %v342_v0, 4  ;;  %v347_v8 = vrot.slane %v345_v1, 5  ;;  %v353_v9 = vrot.slane %v351_v4, 5  ;;  %v357_v10 = vrot.slane %v355_v5, 4  ;;  %v6748_v19 = vld [vmem:[#allocation2 + $0x14] sm:$0x1] }
  0xe3   :  { %v6744_v16 = vld [vmem:[#allocation2 + $0xc] sm:$0xf]  ;;  %v6746_v18 = vld [vmem:[#allocation2 + $0x10] sm:$0xf]  ;;  %v385_v29 = vshll.u32 %v6748_v19, 16  ;;  %v404_v56 = vrot.slane %v402_v54, 4 }
  0xe4   :  { %v348_v11 = vor.u32 %v347_v8, %v344_v7  ;;  %v358_v15 = vor.u32 %v357_v10, %v353_v9  ;;  %v366_v21 = vshrl.u32 %v6744_v16, 16  ;;  %v369_v22 = vshll.u32 %v6744_v16, 16  ;;  %v6195_v1 = vld [vmem:[#allocation4 + $0x88] sm:$0xff]   ;;  %v6197_v5 = vld [vmem:[#allocation4 + $0x98] sm:$0xff]   ;;  %v6200_v8 = vld [vmem:[#allocation4 + $0xb0] sm:$0xff]  }
  0xe5   :  { %v375_v23 = vshll.u32 %v6746_v18, 16  ;;  %v379_v24 = vshrl.u32 %v6746_v18, 16  ;;  %v387_v41 = vrot.slane %v385_v29, 5  ;;  %v406_v61 = vsel %vm6771_vm14, %v404_v56, %v405_v59  ;;  %v6199_v7 = vld [vmem:[#allocation4 + $0xa8] sm:$0xff]   ;;  %v6201_v10 = vld [vmem:[#allocation4 + $0xb8] sm:$0xff]  }
  0xe6   :  { %v349_v25 = vrot.slane %v348_v11, 4  ;;  %v359_v26 = vrot.slane %v358_v15, 4  ;;  %v368_v30 = vrot.slane %v366_v21, 4  ;;  %v371_v32 = vrot.slane %v369_v22, 5  ;;  %v390_v11 = vld [vmem:[#allocation2 + $0xc] sm:$0xe] }
  0xe7   :  { %v377_v33 = vrot.slane %v375_v23, 5  ;;  %v381_v34 = vrot.slane %v379_v24, 4  ;;  %v4989_v62 = vcombine.low %v6744_v16, %v6746_v18  ;;  %v4977_v16 = vrot.slane %v390_v11, 9  ;;  %v6207_v29 = vld [vmem:[#allocation4 + $0x128] sm:$0xff]   ;;  %v884_v11 = vld [vmem:[#allocation2 + $0xc] sm:$0xf] }
  0xe8   :  { %v354_v36 = vsel %vm6750_vm11, %v349_v25, %v353_v9  ;;  %v364_v37 = vsel %vm6750_vm11, %v359_v26, %v363_v27  ;;  %v372_v39 = vor.u32 %v371_v32, %v368_v30  ;;  %v409_v9 = vrot.slane %v6746_v18, 5  ;;  %v6202_v18 = vld [vmem:[#allocation4 + $0x100] sm:$0xff]   ;;  %v6203_v25 = vld [vmem:[#allocation4 + $0x108] sm:$0xff]   ;;  %v6204_v26 = vld [vmem:[#allocation4 + $0x110] sm:$0xff]  }
  0xe9   :  { %v4978_v38 = vcombine.low %v354_v36, %v364_v37  ;;  %v382_v40 = vor.u32 %v381_v34, %v377_v33  ;;  %v412_v21 = vrot.slane %v6748_v19, 5  ;;  %5682 = vmatprep.subr.bf16.mxu1 %v6202_v18  ;;  %v6205_v19 = vld [vmem:[#allocation4 + $0x118] sm:$0xff]   ;;  %v6206_v27 = vld [vmem:[#allocation4 + $0x120] sm:$0xff]   ;;  %v6208_v30 = vld [vmem:[#allocation4 + $0x130] sm:$0xff]  }
  0xea   :  { %v373_v42 = vrot.slane %v372_v39, 4  ;;  %v411_v15 = vrot.slane %v409_v9, 4  ;;  %v410_v23 = vsel %vm6771_vm14, %v4977_v16, %v409_v9  ;;  %5683 = vmatpush3.bf16.msra.mxu1 %v6202_v18  ;;  %v6209_v32 = vld [vmem:[#allocation4 + $0x138] sm:$0xff]   ;;  %v5008_v34 = vld [vmem:[%s7489_s6] ss:$0 sm:$0xff] }
  0xeb   :  { %5638 = vmatprep.mubr.bf16.mxu0 %v4978_v38  ;;  %v383_v43 = vrot.slane %v382_v40, 4  ;;  %5684 = vmatprep.subr.bf16.mxu1 %v6203_v25  ;;  %v5009_v39 = vld [vmem:[%s7517_s21 + $0x1] ss:$0 sm:$0xff] }
  0xec   :  { %v378_v45 = vsel %vm6750_vm11, %v373_v42, %v377_v33  ;;  %v413_v22 = vsel %vm6771_vm14, %v411_v15, %v412_v21  ;;  %v6787_v33 = vld [vmem:[#allocation4 + $0xc0] sm:$0xff]  }
  0xed   :  { %v388_v46 = vsel %vm6750_vm11, %v383_v43, %v387_v41  ;;  %v4999_v24 = vcombine.low %v410_v23, %v413_v22 }
  0xee   :  { %v4979_v47 = vcombine.low %v378_v45, %v388_v46  ;;  %5685 = vmatpush3.bf16.msra.mxu1 %v6203_v25  ;;  %v5010_v45 = vld [vmem:[%s7487_s4 + $0x1] ss:$0 sm:$0xff] }
  0xef   :  { %5686 = vmatprep.subr.bf16.mxu1 %v6204_v26 }
  0xf0   :  { %5639 = vmatmul.mubr.bf16.vlgmr.msra.gmra.mrb[0].mxu0 %v4979_v47 }
  0xf1   :  { %5643 = vmatpush3.bf16.msra.mxu0 %v6680_v31  ;;  %5658 = vmatprep.mubr.bf16.mxu0 %v4988_v48  ;;  %v389_v31 = vld [vmem:[#allocation2] sm:$0xe] }
  0xf2   :  { %5644 = vmatprep.subr.bf16.mxu0 %v6186_v44  ;;  %v4976_v58 = vrot.slane %v389_v31, 9  ;;  %5687 = vmatpush3.bf16.msra.mxu1 %v6204_v26 }
  0xf3   :  { %5688 = vmatprep.subr.bf16.mxu1 %v6205_v19 }
  0xf4   :  { %v403_v0 = vsel %vm6771_vm14, %v4976_v58, %v402_v54 }
  0xf5   :  { %5645 = vmatpush3.bf16.msra.mxu0 %v6186_v44  ;;  %v4998_v4 = vcombine.low %v403_v0, %v406_v61 }
  0xf6   :  { %5646 = vmatprep.subr.bf16.mxu0 %v6187_v49  ;;  %5689 = vmatpush3.bf16.msra.mxu1 %v6205_v19 }
  0xf7   :  { %5690 = vmatprep.subr.bf16.mxu1 %v6206_v27 }
  0xf9   :  { %5647 = vmatpush3.bf16.msra.mxu0 %v6187_v49 }
  0xfa   :  { %5648 = vmatprep.subr.bf16.mxu0 %v6188_v50  ;;  %5691 = vmatpush3.bf16.msra.mxu1 %v6206_v27  ;;  %v888_v27 = vld [vmem:[#allocation2 + $0x14] sm:$0x1] }
  0xfb   :  { %5692 = vmatprep.subr.bf16.mxu1 %v6207_v29 }
  0xfd   :  { %5649 = vmatpush3.bf16.msra.mxu0 %v6188_v50 }
  0xfe   :  { %5650 = vmatprep.subr.bf16.mxu0 %v6189_v51  ;;  %5693 = vmatpush3.bf16.msra.mxu1 %v6207_v29 }
  0xff   :  { %5694 = vmatprep.subr.bf16.mxu1 %v6208_v30 }
 0x101   :  { %5651 = vmatpush3.bf16.msra.mxu0 %v6189_v51 }
 0x102   :  { %5652 = vmatprep.subr.bf16.mxu0 %v6190_v52  ;;  %5695 = vmatpush3.bf16.msra.mxu1 %v6208_v30 }
 0x103   :  { %5696 = vmatprep.subr.bf16.mxu1 %v6209_v32 }
 0x105   :  { %5653 = vmatpush3.bf16.msra.mxu0 %v6190_v52 }
 0x106   :  { %5654 = vmatprep.subr.bf16.mxu0 %v6191_v53  ;;  %5697 = vmatpush3.bf16.msra.mxu1 %v6209_v32 }
 0x107   :  { %5702 = vmatprep.subr.bf16.mxu1 %v6787_v33 }
 0x109   :  { %5655 = vmatpush3.bf16.msra.mxu0 %v6191_v53 }
 0x10a   :  { %5656 = vmatprep.subr.bf16.mxu0 %v6192_v55 }
 0x10d   :  { %5657 = vmatpush3.bf16.msra.mxu0 %v6192_v55 }
 0x10e   :  { %5662 = vmatprep.subr.bf16.mxu0 %v6194_v57 }
 0x110   :  { %5659 = vmatmul.mubr.bf16.vlgmr.msra.gmra.mrb[0].mxu0 %v4989_v62 }
 0x111   :  { %5663 = vmatpush3.bf16.msra.mxu0 %v6194_v57  ;;  %5678 = vmatprep.mubr.bf16.mxu0 %v4998_v4 }
 0x112   :  { %5664 = vmatprep.subr.bf16.mxu0 %v6195_v1 }
 0x115   :  { %5665 = vmatpush3.bf16.msra.mxu0 %v6195_v1 }
 0x116   :  { %5666 = vmatprep.subr.bf16.mxu0 %v6196_v63 }
 0x119   :  { %5667 = vmatpush3.bf16.msra.mxu0 %v6196_v63 }
 0x11a   :  { %5668 = vmatprep.subr.bf16.mxu0 %v6197_v5 }
 0x11d   :  { %5669 = vmatpush3.bf16.msra.mxu0 %v6197_v5 }
 0x11e   :  { %5670 = vmatprep.subr.bf16.mxu0 %v6198_v6 }
 0x121   :  { %5671 = vmatpush3.bf16.msra.mxu0 %v6198_v6 }
 0x122   :  { %5672 = vmatprep.subr.bf16.mxu0 %v6199_v7 }
 0x125   :  { %5673 = vmatpush3.bf16.msra.mxu0 %v6199_v7 }
 0x126   :  { %5674 = vmatprep.subr.bf16.mxu0 %v6200_v8 }
 0x129   :  { %5675 = vmatpush3.bf16.msra.mxu0 %v6200_v8 }
 0x12a   :  { %5676 = vmatprep.subr.bf16.mxu0 %v6201_v10 }
 0x12d   :  { %5677 = vmatpush3.bf16.msra.mxu0 %v6201_v10 }
 0x130   :  { %5679 = vmatmul.mubr.bf16.vlgmr.msra.gmra.mrb[0].mxu0 %v4999_v24  ;;  %v877_v24 = vld [vmem:[#allocation2] sm:$0xf] }
 0x203   :  { %v5680_v36 = vpop.f32.mrb[0].mxu0 }
 0x204   :  { %v789_v37 = vadd.f32 %v5680_v36, %v5008_v34  ;;  %v764_v38 = vpop.f32.mrb[1].mxu0  ;;  %v881_v36 = vld [vmem:[#allocation2 + $0x8] sm:$0x1] }
 0x205   :  { %v787_v40 = vadd.f32 %v5008_v34, %v764_v38  ;;  %v5681_v41 = vpop.f32.mrb[2].mxu0 }
 0x206   :  { %v6797_v42 = vadd.f32 %v789_v37, %v6709_v14  ;;  %v790_v43 = vadd.f32 %v5681_v41, %v5008_v34  ;;  %v767_v44 = vpop.f32.mrb[3].mxu0 }
 0x207   :  { %v6803_v46 = vadd.f32 %v787_v40, %v6703_v3  ;;  %v788_v47 = vadd.f32 %v5008_v34, %v767_v44 }
 0x208   :  { %v810_v48 = vmul.f32 %v5009_v39, %v6797_v42  ;;  %v6807_v49 = vadd.f32 %v790_v43, %v6707_v12 }
 0x209   :  { %v808_v50 = vmul.f32 %v5009_v39, %v6803_v46  ;;  %v6811_v14 = vadd.f32 %v788_v47, %v6701_v2 }
 0x20a   :  { %v819_v51 = vadd.f32 %v5010_v45, %v810_v48  ;;  %v811_v52 = vmul.f32 %v5009_v39, %v6807_v49 }
 0x20b   :  { %v817_v53 = vadd.f32 %v5010_v45, %v808_v50  ;;  %v809_v54 = vmul.f32 %v5009_v39, %v6811_v14 }
 0x20c   :  { %v823_v55 = vmax.f32 %v819_v51, 0.0  ;;  %v820_v3 = vadd.f32 %v5010_v45, %v811_v52 }
 0x20d   :  { %v821_v31 = vmax.f32 %v817_v53, 0.0  ;;  %v818_v56 = vadd.f32 %v5010_v45, %v809_v54 }
 0x20e   :  { %v5318_v57 = vpack.c.bf16 %v823_v55, %v823_v55  ;;  %v824_v58 = vmax.f32 %v820_v3, 0.0 }
 0x20f   :  { %v5316_v59 = vpack.c.bf16 %v821_v31, %v821_v31  ;;  %v822_v12 = vmax.f32 %v818_v56, 0.0 }
 0x210   :  { %v855_v61 = vshrl.u32 %v5318_v57, 16  ;;  %v5319_v62 = vpack.c.bf16 %v824_v58, %v824_v58  ;;  %v858_v4 = vshll.u32 %v5318_v57, 16 }
 0x211   :  { %v838_v0 = vshrl.u32 %v5316_v59, 16  ;;  %v5317_v1 = vpack.c.bf16 %v822_v12, %v822_v12  ;;  %v841_v6 = vshll.u32 %v5316_v59, 16 }
 0x212   :  { %v857_v2 = vrot.slane %v855_v61, 7  ;;  %v863_v63 = vshrl.u32 %v5319_v62, 16  ;;  %v866_v10 = vshll.u32 %v5319_v62, 16 }
 0x213   :  { %v840_v5 = vrot.slane %v838_v0, 7  ;;  %v846_v7 = vshrl.u32 %v5317_v1, 16  ;;  %v849_v21 = vshll.u32 %v5317_v1, 16 }
 0x214   :  { %v860_v8 = vor.u32 %v858_v4, %v857_v2  ;;  %v865_v9 = vrot.slane %v863_v63, 7  ;;  %v861_v22 = vrot.slane %v857_v2, 4 }
 0x215   :  { %v843_v15 = vor.u32 %v841_v6, %v840_v5  ;;  %v848_v16 = vrot.slane %v846_v7, 7  ;;  %v844_v26 = vrot.slane %v840_v5, 4 }
 0x216   :  { %v885_v23 = vsel %vm6721_vm8, %v860_v8, %v884_v11  ;;  %v868_v18 = vor.u32 %v866_v10, %v865_v9  ;;  %v870_v25 = vrot.slane %v865_v9, 4 }
 0x217   :  { %886 = vst [vmem:[#allocation2 + $0xc] sm:$0xf] %v885_v23  ;;  %v878_v19 = vsel %vm6721_vm8, %v843_v15, %v877_v24  ;;  %v851_v29 = vor.u32 %v849_v21, %v848_v16  ;;  %v853_v30 = vrot.slane %v848_v16, 4  ;;  %v6212_v24 = vld [vmem:[#allocation4 + $0xc8] sm:$0xff]  }
 0x218   :  { %879 = vst [vmem:[#allocation2] sm:$0xf] %v878_v19  ;;  %v869_v32 = vsel %vm6715_vm7, %v861_v22, %v868_v18  ;;  %v889_v34 = vsel %vm6663_vm3, %v870_v25, %v888_v27  ;;  %v6213_v25 = vld [vmem:[#allocation4 + $0xd0] sm:$0xff]   ;;  %v6215_v19 = vld [vmem:[#allocation4 + $0xe0] sm:$0xff]   ;;  %v6216_v27 = vld [vmem:[#allocation4 + $0xe8] sm:$0xff]  }
 0x219   :  { %887 = vst [vmem:[#allocation2 + $0x10] sm:$0xf] %v869_v32  ;;  %890 = vst [vmem:[#allocation2 + $0x14] sm:$0x1] %v889_v34  ;;  %v852_v37 = vsel %vm6715_vm7, %v844_v26, %v851_v29  ;;  %v882_v38 = vsel %vm6663_vm3, %v853_v30, %v881_v36  ;;  %v6214_v26 = vld [vmem:[#allocation4 + $0xd8] sm:$0xff]   ;;  %v6217_v29 = vld [vmem:[#allocation4 + $0xf0] sm:$0xff]  }
 0x21a   :  { %880 = vst [vmem:[#allocation2 + $0x4] sm:$0xf] %v852_v37  ;;  %883 = vst [vmem:[#allocation2 + $0x8] sm:$0x1] %v882_v38  ;;  %v6220_v36 = vld [vmem:[#allocation4 + $0x140] sm:$0xff]  }
 0x21e   :  { %v6827_v39 = vld [vmem:[#allocation2 + $0xc] sm:$0xf] }
 0x21f   :  { %v896_v40 = vld [vmem:[#allocation2] sm:$0xf]  ;;  %v927_v41 = vshrl.u32 %v6827_v39, 16  ;;  %v930_v43 = vshll.u32 %v6827_v39, 16 }
 0x220   :  { %v903_v44 = vshrl.u32 %v896_v40, 16  ;;  %v906_v45 = vshll.u32 %v896_v40, 16  ;;  %v6831_v47 = vld [vmem:[#allocation2 + $0x10] sm:$0xf]  ;;  %v6839_v31 = vld [vmem:[#allocation2 + $0x14] sm:$0x1] }
 0x221   :  { %v6833_v48 = vld [vmem:[#allocation2 + $0x4] sm:$0xf]  ;;  %v6835_v50 = vld [vmem:[#allocation2 + $0x8] sm:$0x1]  ;;  %v929_v51 = vrot.slane %v927_v41, 4  ;;  %v932_v52 = vrot.slane %v930_v43, 5  ;;  %v5028_v41 = vcombine.low %v6827_v39, %v6831_v47 }
 0x222   :  { %v905_v53 = vrot.slane %v903_v44, 4  ;;  %v908_v54 = vrot.slane %v906_v45, 5  ;;  %v912_v55 = vshll.u32 %v6833_v48, 16  ;;  %v916_v3 = vshrl.u32 %v6833_v48, 16  ;;  %v950_v34 = vld [vmem:[#allocation2] sm:$0xe] }
 0x223   :  { %v933_v56 = vor.u32 %v932_v52, %v929_v51  ;;  %v936_v57 = vshll.u32 %v6831_v47, 16  ;;  %v940_v58 = vshrl.u32 %v6831_v47, 16  ;;  %v922_v62 = vshll.u32 %v6835_v50, 16  ;;  %v6221_v44 = vld [vmem:[#allocation4 + $0x148] sm:$0xff]   ;;  %v6224_v51 = vld [vmem:[#allocation4 + $0x160] sm:$0xff]   ;;  %v6226_v52 = vld [vmem:[#allocation4 + $0x170] sm:$0xff]  }
 0x224   :  { %v909_v59 = vor.u32 %v908_v54, %v905_v53  ;;  %v914_v12 = vrot.slane %v912_v55, 5  ;;  %v918_v61 = vrot.slane %v916_v3, 4  ;;  %v946_v2 = vshll.u32 %v6839_v31, 16  ;;  %v6225_v39 = vld [vmem:[#allocation4 + $0x168] sm:$0xff]   ;;  %v6227_v54 = vld [vmem:[#allocation4 + $0x178] sm:$0xff]  }
 0x225   :  { %v938_v0 = vrot.slane %v936_v57, 5  ;;  %v942_v1 = vrot.slane %v940_v58, 4  ;;  %v934_v5 = vrot.slane %v933_v56, 4  ;;  %v924_v8 = vrot.slane %v922_v62, 5  ;;  %v951_v3 = vld [vmem:[#allocation2 + $0xc] sm:$0xe] }
 0x226   :  { %v910_v4 = vrot.slane %v909_v59, 4  ;;  %v919_v63 = vor.u32 %v918_v61, %v914_v12  ;;  %v948_v10 = vrot.slane %v946_v2, 5  ;;  %v5027_v18 = vcombine.low %v896_v40, %v6833_v48  ;;  %v6229_v61 = vld [vmem:[#allocation4 + $0x1c8] sm:$0xff]   ;;  %v6230_v62 = vld [vmem:[#allocation4 + $0x1d0] sm:$0xff]  }
 0x227   :  { %v943_v6 = vor.u32 %v942_v1, %v938_v0  ;;  %v939_v21 = vsel %vm6750_vm11, %v934_v5, %v938_v0  ;;  %v960_v30 = vrot.slane %v6833_v48, 5  ;;  %v963_v37 = vrot.slane %v6835_v50, 5  ;;  %v6222_v48 = vld [vmem:[#allocation4 + $0x150] sm:$0xff]   ;;  %v6223_v50 = vld [vmem:[#allocation4 + $0x158] sm:$0xff]   ;;  %v6233_v1 = vld [vmem:[#allocation4 + $0x1e8] sm:$0xff]  }
 0x228   :  { %v920_v7 = vrot.slane %v919_v63, 4  ;;  %v915_v11 = vsel %vm6750_vm11, %v910_v4, %v914_v12  ;;  %v5015_v38 = vrot.slane %v950_v34, 9  ;;  %v967_v53 = vrot.slane %v6831_v47, 5  ;;  %v6228_v47 = vld [vmem:[#allocation4 + $0x1c0] sm:$0xff]   ;;  %v6231_v0 = vld [vmem:[#allocation4 + $0x1d8] sm:$0xff]   ;;  %v6234_v2 = vld [vmem:[#allocation4 + $0x1f0] sm:$0xff]  }
 0x229   :  { %v944_v9 = vrot.slane %v943_v6, 4  ;;  %v962_v32 = vrot.slane %v960_v30, 4  ;;  %v970_v56 = vrot.slane %v6839_v31, 5  ;;  %v5016_v57 = vrot.slane %v951_v3, 9  ;;  %5742 = vmatprep.subr.bf16.mxu0 %v6228_v47  ;;  %v6232_v31 = vld [vmem:[#allocation4 + $0x1e0] sm:$0xff]   ;;  %v6235_v4 = vld [vmem:[#allocation4 + $0x1f8] sm:$0xff]  }
 0x22a   :  { %v925_v15 = vsel %vm6750_vm11, %v920_v7, %v924_v8  ;;  %v961_v43 = vsel %vm6771_vm14, %v5015_v38, %v960_v30  ;;  %v969_v55 = vrot.slane %v967_v53, 4  ;;  %5743 = vmatpush3.bf16.msra.mxu0 %v6228_v47  ;;  %v6869_v63 = vld [vmem:[#allocation4 + $0x180] sm:$0xff]  }
 0x22b   :  { %v5017_v16 = vcombine.low %v915_v11, %v925_v15  ;;  %v949_v22 = vsel %vm6750_vm11, %v944_v9, %v948_v10  ;;  %v964_v40 = vsel %vm6771_vm14, %v962_v32, %v963_v37  ;;  %v968_v59 = vsel %vm6771_vm14, %v5016_v57, %v967_v53  ;;  %5744 = vmatprep.subr.bf16.mxu0 %v6229_v61  ;;  %v5047_v5 = vld [vmem:[%s7489_s6 + $0x1] ss:$0 sm:$0xff]  ;;  %v5048_v9 = vld [vmem:[%s7517_s21 + $0x2] ss:$0 sm:$0xff] }
 0x22c   :  { %v5018_v23 = vcombine.low %v939_v21, %v949_v22  ;;  %v5037_v45 = vcombine.low %v961_v43, %v964_v40  ;;  %v971_v58 = vsel %vm6771_vm14, %v969_v55, %v970_v56  ;;  %v5049_v22 = vld [vmem:[%s7487_s4 + $0x2] ss:$0 sm:$0xff]  ;;  %v1443_v55 = vld [vmem:[#allocation2 + $0xc] sm:$0xf] }
 0x22d   :  { %5698 = vmatprep.mubr.bf16.mxu1 %v5017_v16  ;;  %v5038_v12 = vcombine.low %v968_v59, %v971_v58 }
 0x22e   :  { %5699 = vmatmul.mubr.bf16.vlgmr.msra.gmra.mrb[0].mxu1 %v5018_v23  ;;  %5745 = vmatpush3.bf16.msra.mxu0 %v6229_v61 }
 0x22f   :  { %5703 = vmatpush3.bf16.msra.mxu1 %v6787_v33  ;;  %5718 = vmatprep.mubr.bf16.mxu1 %v5027_v18  ;;  %v6218_v33 = vld [vmem:[#allocation4 + $0xf8] sm:$0xff]  }
 0x230   :  { %5704 = vmatprep.subr.bf16.mxu1 %v6212_v24  ;;  %5746 = vmatprep.subr.bf16.mxu0 %v6230_v62 }
 0x232   :  { %5747 = vmatpush3.bf16.msra.mxu0 %v6230_v62 }
 0x233   :  { %5705 = vmatpush3.bf16.msra.mxu1 %v6212_v24  ;;  %5748 = vmatprep.subr.bf16.mxu0 %v6231_v0 }
 0x234   :  { %5706 = vmatprep.subr.bf16.mxu1 %v6213_v25 }
 0x236   :  { %5749 = vmatpush3.bf16.msra.mxu0 %v6231_v0 }
 0x237   :  { %5707 = vmatpush3.bf16.msra.mxu1 %v6213_v25  ;;  %5750 = vmatprep.subr.bf16.mxu0 %v6232_v31 }
 0x238   :  { %5708 = vmatprep.subr.bf16.mxu1 %v6214_v26 }
 0x23a   :  { %5751 = vmatpush3.bf16.msra.mxu0 %v6232_v31  ;;  %v1447_v31 = vld [vmem:[#allocation2 + $0x14] sm:$0x1] }
 0x23b   :  { %5709 = vmatpush3.bf16.msra.mxu1 %v6214_v26  ;;  %5752 = vmatprep.subr.bf16.mxu0 %v6233_v1 }
 0x23c   :  { %5710 = vmatprep.subr.bf16.mxu1 %v6215_v19 }
 0x23e   :  { %5753 = vmatpush3.bf16.msra.mxu0 %v6233_v1 }
 0x23f   :  { %5711 = vmatpush3.bf16.msra.mxu1 %v6215_v19  ;;  %5754 = vmatprep.subr.bf16.mxu0 %v6234_v2 }
 0x240   :  { %5712 = vmatprep.subr.bf16.mxu1 %v6216_v27 }
 0x242   :  { %5755 = vmatpush3.bf16.msra.mxu0 %v6234_v2 }
 0x243   :  { %5713 = vmatpush3.bf16.msra.mxu1 %v6216_v27  ;;  %5756 = vmatprep.subr.bf16.mxu0 %v6235_v4 }
 0x244   :  { %5714 = vmatprep.subr.bf16.mxu1 %v6217_v29 }
 0x246   :  { %5757 = vmatpush3.bf16.msra.mxu0 %v6235_v4 }
 0x247   :  { %5715 = vmatpush3.bf16.msra.mxu1 %v6217_v29  ;;  %5762 = vmatprep.subr.bf16.mxu0 %v6869_v63 }
 0x248   :  { %5716 = vmatprep.subr.bf16.mxu1 %v6218_v33 }
 0x24b   :  { %5717 = vmatpush3.bf16.msra.mxu1 %v6218_v33 }
 0x24c   :  { %5722 = vmatprep.subr.bf16.mxu1 %v6220_v36 }
 0x24e   :  { %5719 = vmatmul.mubr.bf16.vlgmr.msra.gmra.mrb[0].mxu1 %v5028_v41 }
 0x24f   :  { %5723 = vmatpush3.bf16.msra.mxu1 %v6220_v36  ;;  %5738 = vmatprep.mubr.bf16.mxu1 %v5037_v45 }
 0x250   :  { %5724 = vmatprep.subr.bf16.mxu1 %v6221_v44 }
 0x253   :  { %5725 = vmatpush3.bf16.msra.mxu1 %v6221_v44 }
 0x254   :  { %5726 = vmatprep.subr.bf16.mxu1 %v6222_v48 }
 0x257   :  { %5727 = vmatpush3.bf16.msra.mxu1 %v6222_v48 }
 0x258   :  { %5728 = vmatprep.subr.bf16.mxu1 %v6223_v50 }
 0x25b   :  { %5729 = vmatpush3.bf16.msra.mxu1 %v6223_v50 }
 0x25c   :  { %5730 = vmatprep.subr.bf16.mxu1 %v6224_v51 }
 0x25f   :  { %5731 = vmatpush3.bf16.msra.mxu1 %v6224_v51 }
 0x260   :  { %5732 = vmatprep.subr.bf16.mxu1 %v6225_v39 }
 0x263   :  { %5733 = vmatpush3.bf16.msra.mxu1 %v6225_v39 }
 0x264   :  { %5734 = vmatprep.subr.bf16.mxu1 %v6226_v52 }
 0x267   :  { %5735 = vmatpush3.bf16.msra.mxu1 %v6226_v52 }
 0x268   :  { %5736 = vmatprep.subr.bf16.mxu1 %v6227_v54 }
 0x26b   :  { %5737 = vmatpush3.bf16.msra.mxu1 %v6227_v54 }
 0x26e   :  { %5739 = vmatmul.mubr.bf16.vlgmr.msra.gmra.mrb[0].mxu1 %v5038_v12  ;;  %v1436_v12 = vld [vmem:[#allocation2] sm:$0xf] }
 0x341   :  { %v5740_v6 = vpop.f32.mrb[0].mxu1 }
 0x342   :  { %v1348_v7 = vadd.f32 %v5740_v6, %v5047_v5  ;;  %v1323_v8 = vpop.f32.mrb[1].mxu1  ;;  %v1440_v6 = vld [vmem:[#allocation2 + $0x8] sm:$0x1] }
 0x343   :  { %v1346_v10 = vadd.f32 %v5047_v5, %v1323_v8  ;;  %v5741_v11 = vpop.f32.mrb[2].mxu1 }
 0x344   :  { %v6879_v15 = vadd.f32 %v1348_v7, %v6797_v42  ;;  %v1349_v16 = vadd.f32 %v5741_v11, %v5047_v5  ;;  %v1326_v21 = vpop.f32.mrb[3].mxu1 }
 0x345   :  { %v6885_v23 = vadd.f32 %v1346_v10, %v6803_v46  ;;  %v1347_v24 = vadd.f32 %v5047_v5, %v1326_v21 }
 0x346   :  { %v1369_v18 = vmul.f32 %v5048_v9, %v6879_v15  ;;  %v6889_v25 = vadd.f32 %v1349_v16, %v6807_v49 }
 0x347   :  { %v1367_v26 = vmul.f32 %v5048_v9, %v6885_v23  ;;  %v6893_v42 = vadd.f32 %v1347_v24, %v6811_v14 }
 0x348   :  { %v1378_v19 = vadd.f32 %v5049_v22, %v1369_v18  ;;  %v1370_v27 = vmul.f32 %v5048_v9, %v6889_v25 }
 0x349   :  { %v1376_v29 = vadd.f32 %v5049_v22, %v1367_v26  ;;  %v1368_v30 = vmul.f32 %v5048_v9, %v6893_v42 }
 0x34a   :  { %v1382_v33 = vmax.f32 %v1378_v19, 0.0  ;;  %v1379_v46 = vadd.f32 %v5049_v22, %v1370_v27 }
 0x34b   :  { %v1380_v32 = vmax.f32 %v1376_v29, 0.0  ;;  %v1377_v34 = vadd.f32 %v5049_v22, %v1368_v30 }
 0x34c   :  { %v5322_v36 = vpack.c.bf16 %v1382_v33, %v1382_v33  ;;  %v1383_v37 = vmax.f32 %v1379_v46, 0.0 }
 0x34d   :  { %v5320_v38 = vpack.c.bf16 %v1380_v32, %v1380_v32  ;;  %v1381_v49 = vmax.f32 %v1377_v34, 0.0 }
 0x34e   :  { %v1414_v40 = vshrl.u32 %v5322_v36, 16  ;;  %v5323_v41 = vpack.c.bf16 %v1383_v37, %v1383_v37  ;;  %v1417_v45 = vshll.u32 %v5322_v36, 16 }
 0x34f   :  { %v1397_v43 = vshrl.u32 %v5320_v38, 16  ;;  %v5321_v44 = vpack.c.bf16 %v1381_v49, %v1381_v49  ;;  %v1400_v51 = vshll.u32 %v5320_v38, 16 }
 0x350   :  { %v1416_v14 = vrot.slane %v1414_v40, 7  ;;  %v1422_v48 = vshrl.u32 %v5323_v41, 16  ;;  %v1425_v54 = vshll.u32 %v5323_v41, 16 }
 0x351   :  { %v1399_v50 = vrot.slane %v1397_v43, 7  ;;  %v1405_v39 = vshrl.u32 %v5321_v44, 16  ;;  %v1408_v57 = vshll.u32 %v5321_v44, 16 }
 0x352   :  { %v1419_v52 = vor.u32 %v1417_v45, %v1416_v14  ;;  %v1424_v53 = vrot.slane %v1422_v48, 7  ;;  %v1420_v58 = vrot.slane %v1416_v14, 4 }
 0x353   :  { %v1402_v3 = vor.u32 %v1400_v51, %v1399_v50  ;;  %v1407_v56 = vrot.slane %v1405_v39, 7  ;;  %v1403_v62 = vrot.slane %v1399_v50, 4 }
 0x354   :  { %v1444_v59 = vsel %vm6721_vm8, %v1419_v52, %v1443_v55  ;;  %v1427_v47 = vor.u32 %v1425_v54, %v1424_v53  ;;  %v1429_v61 = vrot.slane %v1424_v53, 4 }
 0x355   :  { %1445 = vst [vmem:[#allocation2 + $0xc] sm:$0xf] %v1444_v59  ;;  %v1437_v0 = vsel %vm6721_vm8, %v1402_v3, %v1436_v12  ;;  %v1410_v1 = vor.u32 %v1408_v57, %v1407_v56  ;;  %v1412_v2 = vrot.slane %v1407_v56, 4  ;;  %v6238_v12 = vld [vmem:[#allocation4 + $0x188] sm:$0xff]  }
 0x356   :  { %1438 = vst [vmem:[#allocation2] sm:$0xf] %v1437_v0  ;;  %v1428_v4 = vsel %vm6715_vm7, %v1420_v58, %v1427_v47  ;;  %v1448_v5 = vsel %vm6663_vm3, %v1429_v61, %v1447_v31  ;;  %v6239_v61 = vld [vmem:[#allocation4 + $0x190] sm:$0xff]   ;;  %v6241_v0 = vld [vmem:[#allocation4 + $0x1a0] sm:$0xff]   ;;  %v6242_v31 = vld [vmem:[#allocation4 + $0x1a8] sm:$0xff]  }
 0x357   :  { %1446 = vst [vmem:[#allocation2 + $0x10] sm:$0xf] %v1428_v4  ;;  %1449 = vst [vmem:[#allocation2 + $0x14] sm:$0x1] %v1448_v5  ;;  %v1411_v7 = vsel %vm6715_vm7, %v1403_v62, %v1410_v1  ;;  %v1441_v8 = vsel %vm6663_vm3, %v1412_v2, %v1440_v6  ;;  %v6240_v62 = vld [vmem:[#allocation4 + $0x198] sm:$0xff]   ;;  %v6243_v1 = vld [vmem:[#allocation4 + $0x1b0] sm:$0xff]  }
 0x358   :  { %1439 = vst [vmem:[#allocation2 + $0x4] sm:$0xf] %v1411_v7  ;;  %1442 = vst [vmem:[#allocation2 + $0x8] sm:$0x1] %v1441_v8  ;;  %v6246_v6 = vld [vmem:[#allocation4 + $0x200] sm:$0xff]  }
 0x35c   :  { %v6909_v9 = vld [vmem:[#allocation2 + $0xc] sm:$0xf] }
 0x35d   :  { %v1455_v10 = vld [vmem:[#allocation2] sm:$0xf]  ;;  %v1486_v11 = vshrl.u32 %v6909_v9, 16  ;;  %v1489_v16 = vshll.u32 %v6909_v9, 16 }
 0x35e   :  { %v1462_v21 = vshrl.u32 %v1455_v10, 16  ;;  %v1465_v22 = vshll.u32 %v1455_v10, 16  ;;  %v6913_v24 = vld [vmem:[#allocation2 + $0x10] sm:$0xf]  ;;  %v6921_v32 = vld [vmem:[#allocation2 + $0x14] sm:$0x1] }
 0x35f   :  { %v6915_v18 = vld [vmem:[#allocation2 + $0x4] sm:$0xf]  ;;  %v6917_v26 = vld [vmem:[#allocation2 + $0x8] sm:$0x1]  ;;  %v1488_v19 = vrot.slane %v1486_v11, 4  ;;  %v1491_v27 = vrot.slane %v1489_v16, 5  ;;  %v5067_v11 = vcombine.low %v6909_v9, %v6913_v24 }
 0x360   :  { %v1464_v29 = vrot.slane %v1462_v21, 4  ;;  %v1467_v30 = vrot.slane %v1465_v22, 5  ;;  %v1471_v33 = vshll.u32 %v6915_v18, 16  ;;  %v1475_v46 = vshrl.u32 %v6915_v18, 16  ;;  %v1509_v5 = vld [vmem:[#allocation2] sm:$0xe] }
 0x361   :  { %v1492_v34 = vor.u32 %v1491_v27, %v1488_v19  ;;  %v1495_v36 = vshll.u32 %v6913_v24, 16  ;;  %v1499_v37 = vshrl.u32 %v6913_v24, 16  ;;  %v1481_v41 = vshll.u32 %v6917_v26, 16  ;;  %v6247_v21 = vld [vmem:[#allocation4 + $0x208] sm:$0xff]   ;;  %v6250_v19 = vld [vmem:[#allocation4 + $0x220] sm:$0xff]   ;;  %v6252_v27 = vld [vmem:[#allocation4 + $0x230] sm:$0xff]  }
 0x362   :  { %v1468_v38 = vor.u32 %v1467_v30, %v1464_v29  ;;  %v1473_v49 = vrot.slane %v1471_v33, 5  ;;  %v1477_v40 = vrot.slane %v1475_v46, 4  ;;  %v1505_v14 = vshll.u32 %v6921_v32, 16  ;;  %v6251_v9 = vld [vmem:[#allocation4 + $0x228] sm:$0xff]   ;;  %v6253_v30 = vld [vmem:[#allocation4 + $0x238] sm:$0xff]  }
 0x363   :  { %v1497_v43 = vrot.slane %v1495_v36, 5  ;;  %v1501_v44 = vrot.slane %v1499_v37, 4  ;;  %v1493_v50 = vrot.slane %v1492_v34, 4  ;;  %v1483_v52 = vrot.slane %v1481_v41, 5  ;;  %v1510_v46 = vld [vmem:[#allocation2 + $0xc] sm:$0xe] }
 0x364   :  { %v1469_v45 = vrot.slane %v1468_v38, 4  ;;  %v1478_v48 = vor.u32 %v1477_v40, %v1473_v49  ;;  %v1507_v54 = vrot.slane %v1505_v14, 5  ;;  %v5066_v47 = vcombine.low %v1455_v10, %v6915_v18  ;;  %v6255_v40 = vld [vmem:[#allocation4 + $0x288] sm:$0xff]   ;;  %v6256_v41 = vld [vmem:[#allocation4 + $0x290] sm:$0xff]  }
 0x365   :  { %v1502_v51 = vor.u32 %v1501_v44, %v1497_v43  ;;  %v1498_v57 = vsel %vm6750_vm11, %v1493_v50, %v1497_v43  ;;  %v1519_v2 = vrot.slane %v6915_v18, 5  ;;  %v1522_v7 = vrot.slane %v6917_v26, 5  ;;  %v6248_v18 = vld [vmem:[#allocation4 + $0x210] sm:$0xff]   ;;  %v6249_v26 = vld [vmem:[#allocation4 + $0x218] sm:$0xff]   ;;  %v6259_v44 = vld [vmem:[#allocation4 + $0x2a8] sm:$0xff]  }
 0x366   :  { %v1479_v39 = vrot.slane %v1478_v48, 4  ;;  %v1474_v55 = vsel %vm6750_vm11, %v1469_v45, %v1473_v49  ;;  %v5054_v8 = vrot.slane %v1509_v5, 9  ;;  %v1526_v29 = vrot.slane %v6913_v24, 5  ;;  %v6254_v24 = vld [vmem:[#allocation4 + $0x280] sm:$0xff]   ;;  %v6257_v43 = vld [vmem:[#allocation4 + $0x298] sm:$0xff]   ;;  %v6260_v14 = vld [vmem:[#allocation4 + $0x2b0] sm:$0xff]  }
 0x367   :  { %v1503_v53 = vrot.slane %v1502_v51, 4  ;;  %v1521_v4 = vrot.slane %v1519_v2, 4  ;;  %v1529_v34 = vrot.slane %v6921_v32, 5  ;;  %v5055_v36 = vrot.slane %v1510_v46, 9  ;;  %5802 = vmatprep.subr.bf16.mxu1 %v6254_v24  ;;  %v6258_v32 = vld [vmem:[#allocation4 + $0x2a0] sm:$0xff]   ;;  %v6261_v45 = vld [vmem:[#allocation4 + $0x2b8] sm:$0xff]  }
 0x368   :  { %v1484_v3 = vsel %vm6750_vm11, %v1479_v39, %v1483_v52  ;;  %v1520_v16 = vsel %vm6771_vm14, %v5054_v8, %v1519_v2  ;;  %v1528_v33 = vrot.slane %v1526_v29, 4  ;;  %5803 = vmatpush3.bf16.msra.mxu1 %v6254_v24  ;;  %v6951_v48 = vld [vmem:[#allocation4 + $0x240] sm:$0xff]  }
 0x369   :  { %v5056_v56 = vcombine.low %v1474_v55, %v1484_v3  ;;  %v1508_v58 = vsel %vm6750_vm11, %v1503_v53, %v1507_v54  ;;  %v1523_v10 = vsel %vm6771_vm14, %v1521_v4, %v1522_v7  ;;  %v1527_v38 = vsel %vm6771_vm14, %v5055_v36, %v1526_v29  ;;  %5804 = vmatprep.subr.bf16.mxu1 %v6255_v40  ;;  %v5086_v50 = vld [vmem:[%s7489_s6 + $0x2] ss:$0 sm:$0xff]  ;;  %v5087_v53 = vld [vmem:[%s7517_s21 + $0x3] ss:$0 sm:$0xff] }
 0x36a   :  { %v5057_v59 = vcombine.low %v1498_v57, %v1508_v58  ;;  %v5076_v22 = vcombine.low %v1520_v16, %v1523_v10  ;;  %v1530_v37 = vsel %vm6771_vm14, %v1528_v33, %v1529_v34  ;;  %v5088_v58 = vld [vmem:[%s7487_s4 + $0x3] ss:$0 sm:$0xff]  ;;  %v2002_v33 = vld [vmem:[#allocation2 + $0xc] sm:$0xf] }
 0x36b   :  { %5758 = vmatprep.mubr.bf16.mxu0 %v5056_v56  ;;  %v5077_v49 = vcombine.low %v1527_v38, %v1530_v37 }
 0x36c   :  { %5759 = vmatmul.mubr.bf16.vlgmr.msra.gmra.mrb[4].mxu0 %v5057_v59  ;;  %5805 = vmatpush3.bf16.msra.mxu1 %v6255_v40 }
 0x36d   :  { %5763 = vmatpush3.bf16.msra.mxu0 %v6869_v63  ;;  %5778 = vmatprep.mubr.bf16.mxu0 %v5066_v47  ;;  %v6244_v63 = vld [vmem:[#allocation4 + $0x1b8] sm:$0xff]  }
 0x36e   :  { %5764 = vmatprep.subr.bf16.mxu0 %v6238_v12  ;;  %5806 = vmatprep.subr.bf16.mxu1 %v6256_v41 }
 0x370   :  { %5807 = vmatpush3.bf16.msra.mxu1 %v6256_v41 }
 0x371   :  { %5765 = vmatpush3.bf16.msra.mxu0 %v6238_v12  ;;  %5808 = vmatprep.subr.bf16.mxu1 %v6257_v43 }
 0x372   :  { %5766 = vmatprep.subr.bf16.mxu0 %v6239_v61 }
 0x374   :  { %5809 = vmatpush3.bf16.msra.mxu1 %v6257_v43 }
 0x375   :  { %5767 = vmatpush3.bf16.msra.mxu0 %v6239_v61  ;;  %5810 = vmatprep.subr.bf16.mxu1 %v6258_v32 }
 0x376   :  { %5768 = vmatprep.subr.bf16.mxu0 %v6240_v62 }
 0x378   :  { %5811 = vmatpush3.bf16.msra.mxu1 %v6258_v32  ;;  %v2006_v32 = vld [vmem:[#allocation2 + $0x14] sm:$0x1] }
 0x379   :  { %5769 = vmatpush3.bf16.msra.mxu0 %v6240_v62  ;;  %5812 = vmatprep.subr.bf16.mxu1 %v6259_v44 }
 0x37a   :  { %5770 = vmatprep.subr.bf16.mxu0 %v6241_v0 }
 0x37c   :  { %5813 = vmatpush3.bf16.msra.mxu1 %v6259_v44 }
 0x37d   :  { %5771 = vmatpush3.bf16.msra.mxu0 %v6241_v0  ;;  %5814 = vmatprep.subr.bf16.mxu1 %v6260_v14 }
 0x37e   :  { %5772 = vmatprep.subr.bf16.mxu0 %v6242_v31 }
 0x380   :  { %5815 = vmatpush3.bf16.msra.mxu1 %v6260_v14 }
 0x381   :  { %5773 = vmatpush3.bf16.msra.mxu0 %v6242_v31  ;;  %5816 = vmatprep.subr.bf16.mxu1 %v6261_v45 }
 0x382   :  { %5774 = vmatprep.subr.bf16.mxu0 %v6243_v1 }
 0x384   :  { %5817 = vmatpush3.bf16.msra.mxu1 %v6261_v45 }
 0x385   :  { %5775 = vmatpush3.bf16.msra.mxu0 %v6243_v1  ;;  %5822 = vmatprep.subr.bf16.mxu1 %v6951_v48 }
 0x386   :  { %5776 = vmatprep.subr.bf16.mxu0 %v6244_v63 }
 0x389   :  { %5777 = vmatpush3.bf16.msra.mxu0 %v6244_v63 }
 0x38a   :  { %5782 = vmatprep.subr.bf16.mxu0 %v6246_v6 }
 0x38c   :  { %5779 = vmatmul.mubr.bf16.vlgmr.msra.gmra.mrb[4].mxu0 %v5067_v11 }
 0x38d   :  { %5783 = vmatpush3.bf16.msra.mxu0 %v6246_v6  ;;  %5798 = vmatprep.mubr.bf16.mxu0 %v5076_v22 }
 0x38e   :  { %5784 = vmatprep.subr.bf16.mxu0 %v6247_v21 }
 0x391   :  { %5785 = vmatpush3.bf16.msra.mxu0 %v6247_v21 }
 0x392   :  { %5786 = vmatprep.subr.bf16.mxu0 %v6248_v18 }
 0x395   :  { %5787 = vmatpush3.bf16.msra.mxu0 %v6248_v18 }
 0x396   :  { %5788 = vmatprep.subr.bf16.mxu0 %v6249_v26 }
 0x399   :  { %5789 = vmatpush3.bf16.msra.mxu0 %v6249_v26 }
 0x39a   :  { %5790 = vmatprep.subr.bf16.mxu0 %v6250_v19 }
 0x39d   :  { %5791 = vmatpush3.bf16.msra.mxu0 %v6250_v19 }
 0x39e   :  { %5792 = vmatprep.subr.bf16.mxu0 %v6251_v9 }
 0x3a1   :  { %5793 = vmatpush3.bf16.msra.mxu0 %v6251_v9 }
 0x3a2   :  { %5794 = vmatprep.subr.bf16.mxu0 %v6252_v27 }
 0x3a5   :  { %5795 = vmatpush3.bf16.msra.mxu0 %v6252_v27 }
 0x3a6   :  { %5796 = vmatprep.subr.bf16.mxu0 %v6253_v30 }
 0x3a9   :  { %5797 = vmatpush3.bf16.msra.mxu0 %v6253_v30 }
 0x3ac   :  { %5799 = vmatmul.mubr.bf16.vlgmr.msra.gmra.mrb[4].mxu0 %v5077_v49  ;;  %v1995_v49 = vld [vmem:[#allocation2] sm:$0xf] }
 0x47f   :  { %v5800_v51 = vpop.f32.mrb[4].mxu0 }
 0x480   :  { %v1907_v39 = vadd.f32 %v5800_v51, %v5086_v50  ;;  %v1882_v52 = vpop.f32.mrb[5].mxu0  ;;  %v1999_v51 = vld [vmem:[#allocation2 + $0x8] sm:$0x1] }
 0x481   :  { %v1905_v54 = vadd.f32 %v5086_v50, %v1882_v52  ;;  %v5801_v55 = vpop.f32.mrb[6].mxu0 }
 0x482   :  { %v6961_v3 = vadd.f32 %v1907_v39, %v6879_v15  ;;  %v1908_v56 = vadd.f32 %v5801_v55, %v5086_v50  ;;  %v1885_v57 = vpop.f32.mrb[7].mxu0 }
 0x483   :  { %v6967_v59 = vadd.f32 %v1905_v54, %v6885_v23  ;;  %v1906_v12 = vadd.f32 %v5086_v50, %v1885_v57 }
 0x484   :  { %v1928_v47 = vmul.f32 %v5087_v53, %v6961_v3  ;;  %v6971_v61 = vadd.f32 %v1908_v56, %v6889_v25 }
 0x485   :  { %v1926_v62 = vmul.f32 %v5087_v53, %v6967_v59  ;;  %v6975_v15 = vadd.f32 %v1906_v12, %v6893_v42 }
 0x486   :  { %v1937_v0 = vadd.f32 %v5088_v58, %v1928_v47  ;;  %v1929_v31 = vmul.f32 %v5087_v53, %v6971_v61 }
 0x487   :  { %v1935_v1 = vadd.f32 %v5088_v58, %v1926_v62  ;;  %v1927_v2 = vmul.f32 %v5087_v53, %v6975_v15 }
 0x488   :  { %v1941_v63 = vmax.f32 %v1937_v0, 0.0  ;;  %v1938_v23 = vadd.f32 %v5088_v58, %v1929_v31 }
 0x489   :  { %v1939_v4 = vmax.f32 %v1935_v1, 0.0  ;;  %v1936_v5 = vadd.f32 %v5088_v58, %v1927_v2 }
 0x48a   :  { %v5326_v6 = vpack.c.bf16 %v1941_v63, %v1941_v63  ;;  %v1942_v7 = vmax.f32 %v1938_v23, 0.0 }
 0x48b   :  { %v5324_v8 = vpack.c.bf16 %v1939_v4, %v1939_v4  ;;  %v1940_v25 = vmax.f32 %v1936_v5, 0.0 }
 0x48c   :  { %v1973_v10 = vshrl.u32 %v5326_v6, 16  ;;  %v5327_v11 = vpack.c.bf16 %v1942_v7, %v1942_v7  ;;  %v1976_v22 = vshll.u32 %v5326_v6, 16 }
 0x48d   :  { %v1956_v16 = vshrl.u32 %v5324_v8, 16  ;;  %v5325_v21 = vpack.c.bf16 %v1940_v25, %v1940_v25  ;;  %v1959_v19 = vshll.u32 %v5324_v8, 16 }
 0x48e   :  { %v1975_v42 = vrot.slane %v1973_v10, 7  ;;  %v1981_v18 = vshrl.u32 %v5327_v11, 16  ;;  %v1984_v30 = vshll.u32 %v5327_v11, 16 }
 0x48f   :  { %v1958_v26 = vrot.slane %v1956_v16, 7  ;;  %v1964_v9 = vshrl.u32 %v5325_v21, 16  ;;  %v1967_v36 = vshll.u32 %v5325_v21, 16 }
 0x490   :  { %v1978_v27 = vor.u32 %v1976_v22, %v1975_v42  ;;  %v1983_v29 = vrot.slane %v1981_v18, 7  ;;  %v1979_v37 = vrot.slane %v1975_v42, 4 }
 0x491   :  { %v1961_v46 = vor.u32 %v1959_v19, %v1958_v26  ;;  %v1966_v34 = vrot.slane %v1964_v9, 7  ;;  %v1962_v41 = vrot.slane %v1958_v26, 4 }
 0x492   :  { %v2003_v38 = vsel %vm6721_vm8, %v1978_v27, %v2002_v33  ;;  %v1986_v24 = vor.u32 %v1984_v30, %v1983_v29  ;;  %v1988_v40 = vrot.slane %v1983_v29, 4 }
 0x493   :  { %2004 = vst [vmem:[#allocation2 + $0xc] sm:$0xf] %v2003_v38  ;;  %v1996_v43 = vsel %vm6721_vm8, %v1961_v46, %v1995_v49  ;;  %v1969_v44 = vor.u32 %v1967_v36, %v1966_v34  ;;  %v1971_v14 = vrot.slane %v1966_v34, 4 }
 0x494   :  { %1997 = vst [vmem:[#allocation2] sm:$0xf] %v1996_v43  ;;  %v1987_v45 = vsel %vm6715_vm7, %v1979_v37, %v1986_v24  ;;  %v2007_v50 = vsel %vm6663_vm3, %v1988_v40, %v2006_v32  ;;  %v6263_v40 = vld [vmem:[#allocation4 + $0x248] sm:$0xff]   ;;  %v6264_v43 = vld [vmem:[#allocation4 + $0x250] sm:$0xff]   ;;  %v6265_v32 = vld [vmem:[#allocation4 + $0x258] sm:$0xff]  }
 0x495   :  { %2005 = vst [vmem:[#allocation2 + $0x10] sm:$0xf] %v1987_v45  ;;  %2008 = vst [vmem:[#allocation2 + $0x14] sm:$0x1] %v2007_v50  ;;  %v1970_v39 = vsel %vm6715_vm7, %v1962_v41, %v1969_v44  ;;  %v2000_v52 = vsel %vm6663_vm3, %v1971_v14, %v1999_v51  ;;  %v6266_v44 = vld [vmem:[#allocation4 + $0x260] sm:$0xff]   ;;  %v6267_v14 = vld [vmem:[#allocation4 + $0x268] sm:$0xff]  }
 0x496   :  { %1998 = vst [vmem:[#allocation2 + $0x4] sm:$0xf] %v1970_v39  ;;  %2001 = vst [vmem:[#allocation2 + $0x8] sm:$0x1] %v2000_v52  ;;  %v6268_v45 = vld [vmem:[#allocation4 + $0x270] sm:$0xff]   ;;  %v6270_v52 = vld [vmem:[#allocation4 + $0x2c0] sm:$0xff]  }
 0x49a   :  { %v6991_v53 = vld [vmem:[#allocation2 + $0xc] sm:$0xf] }
 0x49b   :  { %v2014_v54 = vld [vmem:[#allocation2] sm:$0xf]  ;;  %v2045_v55 = vshrl.u32 %v6991_v53, 16  ;;  %v2048_v56 = vshll.u32 %v6991_v53, 16 }
 0x49c   :  { %v2021_v57 = vshrl.u32 %v2014_v54, 16  ;;  %v2024_v58 = vshll.u32 %v2014_v54, 16  ;;  %v6995_v12 = vld [vmem:[#allocation2 + $0x10] sm:$0xf]  ;;  %v7006_v10 = vld [vmem:[#allocation2 + $0x14] sm:$0x1] }
 0x49d   :  { %v6997_v47 = vld [vmem:[#allocation2 + $0x4] sm:$0xf]  ;;  %v6999_v28 = vld [vmem:[#allocation2 + $0x8] sm:$0x1]  ;;  %v2047_v4 = vrot.slane %v2045_v55, 4  ;;  %v2050_v5 = vrot.slane %v2048_v56, 5 }
 0x49e   :  { %v2636_v62 = vld [vmem:[#allocation2 + $0x4] sm:$0x1]  ;;  %v2023_v0 = vrot.slane %v2021_v57, 4  ;;  %v2026_v31 = vrot.slane %v2024_v58, 5  ;;  %v2030_v1 = vshll.u32 %v6997_v47, 16  ;;  %v2034_v2 = vshrl.u32 %v6997_v47, 16 }
 0x49f   :  { %v2040_v63 = vshll.u32 %v6999_v28, 16  ;;  %v2637_v23 = vsel %vm6670_vm4, 0, %v2636_v62  ;;  %v2639_v6 = vld [vmem:[#allocation2 + $0x10] sm:$0x1]  ;;  %v2054_v11 = vshll.u32 %v6995_v12, 16  ;;  %v2051_v16 = vor.u32 %v2050_v5, %v2047_v4 }
 0x4a0   :  { %v2027_v7 = vor.u32 %v2026_v31, %v2023_v0  ;;  %v2032_v8 = vrot.slane %v2030_v1, 5  ;;  %v2036_v25 = vrot.slane %v2034_v2, 4  ;;  %2638 = vst [vmem:[#allocation2 + $0x4] sm:$0x1] %v2637_v23  ;;  %v2058_v21 = vshrl.u32 %v6995_v12, 16  ;;  %v6272_v0 = vld [vmem:[#allocation4 + $0x2d0] sm:$0xff]  }
 0x4a1   :  { %v2056_v18 = vrot.slane %v2054_v11, 5  ;;  %v2640_v26 = vsel %vm6670_vm4, 0, %v2639_v6  ;;  %v2064_v9 = vshll.u32 %v7006_v10, 16  ;;  %v2042_v29 = vrot.slane %v2040_v63, 5  ;;  %v2068_v39 = vld [vmem:[#allocation2] sm:$0xe] }
 0x4a2   :  { %v2028_v42 = vrot.slane %v2027_v7, 4  ;;  %v2037_v22 = vor.u32 %v2036_v25, %v2032_v8  ;;  %v2060_v19 = vrot.slane %v2058_v21, 4  ;;  %2641 = vst [vmem:[#allocation2 + $0x10] sm:$0x1] %v2640_v26  ;;  %v2052_v30 = vrot.slane %v2051_v16, 4  ;;  %v6274_v31 = vld [vmem:[#allocation4 + $0x2e0] sm:$0xff]  }
 0x4a3   :  { %v2066_v38 = vrot.slane %v2064_v9, 5  ;;  %v5105_v41 = vcombine.low %v2014_v54, %v6997_v47  ;;  %v2078_v50 = vrot.slane %v6997_v47, 5  ;;  %v2081_v54 = vrot.slane %v6999_v28, 5  ;;  %v6271_v47 = vld [vmem:[#allocation4 + $0x2c8] sm:$0xff]   ;;  %v6273_v28 = vld [vmem:[#allocation4 + $0x2d8] sm:$0xff]   ;;  %v6276_v1 = vld [vmem:[#allocation4 + $0x2f0] sm:$0xff]  }
 0x4a4   :  { %v2038_v27 = vrot.slane %v2037_v22, 4  ;;  %v2061_v33 = vor.u32 %v2060_v19, %v2056_v18  ;;  %v2033_v46 = vsel %vm6750_vm11, %v2028_v42, %v2032_v8  ;;  %v2057_v17 = vsel %vm6750_vm11, %v2052_v30, %v2056_v18  ;;  %v6277_v63 = vld [vmem:[#allocation4 + $0x2f8] sm:$0xff]   ;;  %v2069_v4 = vld [vmem:[#allocation2 + $0xc] sm:$0xe]  ;;  %v6282_v42 = vld [vmem:[%s7492_s9 + $0x20] sm:$0xff]  }
 0x4a5   :  { %v2080_v51 = vrot.slane %v2078_v50, 4  ;;  %v5093_v55 = vrot.slane %v2068_v39, 9  ;;  %v5106_v57 = vcombine.low %v6991_v53, %v6995_v12  ;;  %v6275_v53 = vld [vmem:[#allocation4 + $0x2e8] sm:$0xff]   ;;  %v2085_v2 = vrot.slane %v6995_v12, 5  ;;  %v6278_v12 = vld [vmem:[%s7492_s9] sm:$0xff]   ;;  %v6280_v16 = vld [vmem:[%s7492_s9 + $0x10] sm:$0xff]  }
 0x4a6   :  { %v2043_v34 = vsel %vm6750_vm11, %v2038_v27, %v2042_v29  ;;  %v2062_v37 = vrot.slane %v2061_v33, 4  ;;  %v2088_v5 = vrot.slane %v7006_v10, 5  ;;  %v5094_v6 = vrot.slane %v2069_v4, 9  ;;  %v6279_v10 = vld [vmem:[%s7492_s9 + $0x8] sm:$0xff]   ;;  %v6281_v21 = vld [vmem:[%s7492_s9 + $0x18] sm:$0xff]   ;;  %v6284_v18 = vld [vmem:[%s7492_s9 + $0x30] sm:$0xff]  }
 0x4a7   :  { %v5095_v36 = vcombine.low %v2033_v46, %v2043_v34  ;;  %v2082_v56 = vsel %vm6771_vm14, %v2080_v51, %v2081_v54  ;;  %v2079_v58 = vsel %vm6771_vm14, %v5093_v55, %v2078_v50  ;;  %v2087_v23 = vrot.slane %v2085_v2, 4  ;;  %v6283_v22 = vld [vmem:[%s7492_s9 + $0x28] sm:$0xff]   ;;  %v6285_v26 = vld [vmem:[%s7492_s9 + $0x38] sm:$0xff]   ;;  %v5125_v19 = vld [vmem:[%s7489_s6 + $0x3] ss:$0 sm:$0xff] }
 0x4a8   :  { %v2067_v49 = vsel %vm6750_vm11, %v2062_v37, %v2066_v38  ;;  %v5115_v62 = vcombine.low %v2079_v58, %v2082_v56  ;;  %v2086_v8 = vsel %vm6771_vm14, %v5094_v6, %v2085_v2  ;;  %v6499_v11 = vmov 0.0   ;;  %v5126_v30 = vld [vmem:[%s7490_s7] ss:$0 sm:$0xff]  ;;  %v6292_v2 = vld [vmem:[#allocation7 + $0x50] sm:$0xff]   ;;  %v6295_v4 = vld [vmem:[#allocation7 + $0x28] sm:$0xff]  }
 0x4a9   :  { %5818 = vmatprep.mubr.bf16.mxu1 %v5095_v36  ;;  %v5096_v24 = vcombine.low %v2057_v17, %v2067_v49  ;;  %v2089_v7 = vsel %vm6771_vm14, %v2087_v23, %v2088_v5  ;;  %5862 = vmatprep.subr.bf16.mxu0 %v6499_v11  ;;  %v5127_v38 = vld [vmem:[%s7491_s8] ss:$0 sm:$0xff]  ;;  %v6294_v23 = vld [vmem:[#allocation7 + $0x58] sm:$0xff]   ;;  %v6297_v6 = vld [vmem:[#allocation7 + $0x30] sm:$0xff]   ;;  %vm4501_vm4 = vcmask 1041409  }
 0x4aa   :  { %v5116_v25 = vcombine.low %v2086_v8, %v2089_v7  ;;  %5863 = vmatpush3.bf16.msra.mxu0 %v6278_v12  ;;  %5878 = vmatprep.mubr.msk.bf16.mxu0 %vm6500_vm15, %v6499_v11  ;;  %v6296_v5 = vld [vmem:[#allocation7 + $0x60] sm:$0xff]   ;;  %v6298_v7 = vld [vmem:[#allocation7 + $0x68] sm:$0xff]   ;;  %v6299_v8 = vld [vmem:[#allocation7 + $0x38] sm:$0xff]  }
 0x4ab   :  { %5819 = vmatmul.mubr.bf16.vlgmr.msra.gmra.mrb[4].mxu1 %v5096_v24  ;;  %5864 = vmatprep.subr.bf16.mxu0 %v6499_v11  ;;  %v6302_v12 = vld [vmem:[#allocation7 + $0x78] sm:$0xff]  }
 0x4ac   :  { %5823 = vmatpush3.bf16.msra.mxu1 %v6951_v48  ;;  %5838 = vmatprep.mubr.bf16.mxu1 %v5105_v41  ;;  %v6269_v48 = vld [vmem:[#allocation4 + $0x278] sm:$0xff]  }
 0x4ad   :  { %5824 = vmatprep.subr.bf16.mxu1 %v6263_v40 }
 0x4ae   :  { %5865 = vmatpush3.bf16.msra.mxu0 %v6279_v10  ;;  %v5128_v10 = vld [vmem:[%s7493_s10] ss:$0 sm:$0xff] }
 0x4af   :  { %5866 = vmatprep.subr.bf16.mxu0 %v6499_v11 }
 0x4b0   :  { %5825 = vmatpush3.bf16.msra.mxu1 %v6263_v40 }
 0x4b1   :  { %5826 = vmatprep.subr.bf16.mxu1 %v6264_v43 }
 0x4b2   :  { %5867 = vmatpush3.bf16.msra.mxu0 %v6280_v16 }
 0x4b3   :  { %5868 = vmatprep.subr.bf16.mxu0 %v6499_v11 }
 0x4b4   :  { %5827 = vmatpush3.bf16.msra.mxu1 %v6264_v43 }
 0x4b5   :  { %5828 = vmatprep.subr.bf16.mxu1 %v6265_v32 }
 0x4b6   :  { %5869 = vmatpush3.bf16.msra.mxu0 %v6281_v21  ;;  %v5137_v21 = vld [vmem:[%s7494_s11] ss:$0 sm:$0xff] }
 0x4b7   :  { %5870 = vmatprep.subr.bf16.mxu0 %v6499_v11 }
 0x4b8   :  { %5829 = vmatpush3.bf16.msra.mxu1 %v6265_v32 }
 0x4b9   :  { %5830 = vmatprep.subr.bf16.mxu1 %v6266_v44 }
 0x4ba   :  { %5871 = vmatpush3.bf16.msra.mxu0 %v6282_v42 }
 0x4bb   :  { %5872 = vmatprep.subr.bf16.mxu0 %v6499_v11 }
 0x4bc   :  { %5831 = vmatpush3.bf16.msra.mxu1 %v6266_v44 }
 0x4bd   :  { %5832 = vmatprep.subr.bf16.mxu1 %v6267_v14 }
 0x4be   :  { %5873 = vmatpush3.bf16.msra.mxu0 %v6283_v22 }
 0x4bf   :  { %5874 = vmatprep.subr.bf16.mxu0 %v6499_v11 }
 0x4c0   :  { %5833 = vmatpush3.bf16.msra.mxu1 %v6267_v14 }
 0x4c1   :  { %5834 = vmatprep.subr.bf16.mxu1 %v6268_v45 }
 0x4c2   :  { %5875 = vmatpush3.bf16.msra.mxu0 %v6284_v18  ;;  %v5138_v18 = vld [vmem:[%s7495_s12] ss:$0 sm:$0xff] }
 0x4c3   :  { %5876 = vmatprep.subr.bf16.mxu0 %v6499_v11 }
 0x4c4   :  { %5835 = vmatpush3.bf16.msra.mxu1 %v6268_v45 }
 0x4c5   :  { %5836 = vmatprep.subr.bf16.mxu1 %v6269_v48 }
 0x4c6   :  { %5877 = vmatpush3.bf16.msra.mxu0 %v6285_v26 }
 0x4c7   :  { %5902 = vmatprep.subr.bf16.mxu0 %v6499_v11 }
 0x4c8   :  { %5837 = vmatpush3.bf16.msra.mxu1 %v6269_v48 }
 0x4c9   :  { %5842 = vmatprep.subr.bf16.mxu1 %v6270_v52 }
 0x4cb   :  { %5839 = vmatmul.mubr.bf16.vlgmr.msra.gmra.mrb[4].mxu1 %v5106_v57 }
 0x4cc   :  { %5843 = vmatpush3.bf16.msra.mxu1 %v6270_v52  ;;  %5858 = vmatprep.mubr.bf16.mxu1 %v5115_v62  ;;  %v6286_v62 = vld [vmem:[#allocation7] sm:$0xff]  }
 0x4cd   :  { %5844 = vmatprep.subr.bf16.mxu1 %v6271_v47 }
 0x4d0   :  { %5845 = vmatpush3.bf16.msra.mxu1 %v6271_v47 }
 0x4d1   :  { %5846 = vmatprep.subr.bf16.mxu1 %v6272_v0 }
 0x4d4   :  { %5847 = vmatpush3.bf16.msra.mxu1 %v6272_v0  ;;  %v6287_v0 = vld [vmem:[#allocation7 + $0x8] sm:$0xff]  }
 0x4d5   :  { %5848 = vmatprep.subr.bf16.mxu1 %v6273_v28 }
 0x4d8   :  { %5849 = vmatpush3.bf16.msra.mxu1 %v6273_v28  ;;  %v6288_v28 = vld [vmem:[#allocation7 + $0x40] sm:$0xff]  }
 0x4d9   :  { %5850 = vmatprep.subr.bf16.mxu1 %v6274_v31 }
 0x4dc   :  { %5851 = vmatpush3.bf16.msra.mxu1 %v6274_v31  ;;  %v6289_v31 = vld [vmem:[#allocation7 + $0x10] sm:$0xff]  }
 0x4dd   :  { %5852 = vmatprep.subr.bf16.mxu1 %v6275_v53 }
 0x4e0   :  { %5853 = vmatpush3.bf16.msra.mxu1 %v6275_v53  ;;  %v6290_v53 = vld [vmem:[#allocation7 + $0x48] sm:$0xff]  }
 0x4e1   :  { %5854 = vmatprep.subr.bf16.mxu1 %v6276_v1 }
 0x4e4   :  { %5855 = vmatpush3.bf16.msra.mxu1 %v6276_v1  ;;  %v6291_v1 = vld [vmem:[#allocation7 + $0x18] sm:$0xff]  }
 0x4e5   :  { %5856 = vmatprep.subr.bf16.mxu1 %v6277_v63 }
 0x4e8   :  { %5857 = vmatpush3.bf16.msra.mxu1 %v6277_v63  ;;  %v6293_v63 = vld [vmem:[#allocation7 + $0x20] sm:$0xff]  }
 0x4e9   :  { %5882 = vmatprep.subr.bf16.mxu1 %v6499_v11 }
 0x4eb   :  { %5859 = vmatmul.mubr.bf16.vlgmr.msra.gmra.mrb[4].mxu1 %v5116_v25  ;;  %v6301_v25 = vld [vmem:[#allocation7 + $0x70] sm:$0xff]  }
 0x4ec   :  { %5898 = vmatprep.mubr.msk.bf16.mxu1 %vm6500_vm15, %v6499_v11  ;;  %5883 = vmatpush3.bf16.msra.mxu1 %v6288_v28 }
 0x4ed   :  { %5884 = vmatprep.subr.bf16.mxu1 %v6499_v11 }
 0x4f0   :  { %5885 = vmatpush3.bf16.msra.mxu1 %v6290_v53 }
 0x4f1   :  { %5886 = vmatprep.subr.bf16.mxu1 %v6499_v11 }
 0x4f4   :  { %5887 = vmatpush3.bf16.msra.mxu1 %v6292_v2 }
 0x4f5   :  { %5888 = vmatprep.subr.bf16.mxu1 %v6499_v11 }
 0x4f8   :  { %5889 = vmatpush3.bf16.msra.mxu1 %v6294_v23 }
 0x4f9   :  { %5890 = vmatprep.subr.bf16.mxu1 %v6499_v11 }
 0x4fc   :  { %5891 = vmatpush3.bf16.msra.mxu1 %v6296_v5 }
 0x4fd   :  { %5892 = vmatprep.subr.bf16.mxu1 %v6499_v11 }
 0x500   :  { %5893 = vmatpush3.bf16.msra.mxu1 %v6298_v7 }
 0x501   :  { %5894 = vmatprep.subr.bf16.mxu1 %v6499_v11 }
 0x504   :  { %5895 = vmatpush3.bf16.msra.mxu1 %v6301_v25 }
 0x505   :  { %5896 = vmatprep.subr.bf16.mxu1 %v6499_v11 }
 0x508   :  { %5897 = vmatpush3.bf16.msra.mxu1 %v6302_v12  ;;  %v6303_v12 = vld [vmem:[#allocation7 + $0x80] sm:$0xff]  }
 0x509   :  { %5922 = vmatprep.subr.bf16.mxu1 %v6499_v11 }
 0x5be   :  { %v5860_v9 = vpop.f32.mrb[4].mxu1 }
 0x5bf   :  { %v2466_v27 = vadd.f32 %v5860_v9, %v5125_v19  ;;  %v2441_v29 = vpop.f32.mrb[5].mxu1 }
 0x5c0   :  { %v2464_v33 = vadd.f32 %v5125_v19, %v2441_v29  ;;  %v5861_v46 = vpop.f32.mrb[6].mxu1 }
 0x5c1   :  { %v2470_v34 = vadd.f32 %v2466_v27, %v6961_v3  ;;  %v2467_v36 = vadd.f32 %v5861_v46, %v5125_v19  ;;  %v2444_v37 = vpop.f32.mrb[7].mxu1 }
 0x5c2   :  { %v2468_v17 = vadd.f32 %v2464_v33, %v6967_v59  ;;  %v2465_v49 = vadd.f32 %v5125_v19, %v2444_v37 }
 0x5c3   :  { %v2489_v24 = vmul.f32 %v5126_v30, %v2470_v34  ;;  %v2471_v40 = vadd.f32 %v2467_v36, %v6971_v61 }
 0x5c4   :  { %v2487_v41 = vmul.f32 %v5126_v30, %v2468_v17  ;;  %v2469_v43 = vadd.f32 %v2465_v49, %v6975_v15 }
 0x5c5   :  { %v2500_v32 = vadd.f32 %v5127_v38, %v2489_v24  ;;  %v2490_v44 = vmul.f32 %v5126_v30, %v2471_v40 }
 0x5c6   :  { %v2498_v14 = vadd.f32 %v5127_v38, %v2487_v41  ;;  %v2488_v45 = vmul.f32 %v5126_v30, %v2469_v43 }
 0x5c7   :  { %v2504_v3 = vmax.f32 %v2500_v32, 0.0  ;;  %v2501_v50 = vadd.f32 %v5127_v38, %v2490_v44  ;;  %v2688_v44 = vld [vmem:[#allocation2] sm:$0xf] }
 0x5c8   :  { %v2502_v48 = vmax.f32 %v2498_v14, 0.0  ;;  %v2499_v51 = vadd.f32 %v5127_v38, %v2488_v45  ;;  %v2691_v14 = vld [vmem:[#allocation2 + $0x4] sm:$0x1] }
 0x5c9   :  { %2508 = vst [vmem:[#allocation3 + $0x10] sm:$0xff] %v2504_v3  ;;  %v2505_v39 = vmax.f32 %v2501_v50, 0.0 }
 0x5ca   :  { %2506 = vst [vmem:[#allocation3] sm:$0xff] %v2502_v48  ;;  %v2503_v52 = vmax.f32 %v2499_v51, 0.0  ;;  %v2694_v51 = vld [vmem:[#allocation2 + $0xc] sm:$0xf] }
 0x5cb   :  { %2509 = vst [vmem:[#allocation3 + $0x18] sm:$0xff] %v2505_v39  ;;  %v2697_v39 = vld [vmem:[#allocation2 + $0x10] sm:$0x1] }
 0x5cc   :  { %2507 = vst [vmem:[#allocation3 + $0x8] sm:$0xff] %v2503_v52 }
 0x5d2   :  { %v2512_v59 = vld [vmem:[#allocation3 + $0x10] ss:$2 sm:$0xff]  ;;  %v2516_v54 = vld [vmem:[#allocation3 + $0x11] ss:$2 sm:$0xff] }
 0x5d3   :  { %v2510_v61 = vld [vmem:[#allocation3] ss:$2 sm:$0xff]  ;;  %v2514_v55 = vld [vmem:[#allocation3 + $0x1] ss:$2 sm:$0xff]  ;;  %v2518_v56 = vadd.f32 %v2516_v54, %v2512_v59 }
 0x5d4   :  { %v2517_v15 = vadd.f32 %v2514_v55, %v2510_v61 }
 0x5d5   :  { %v2520_v57 = vmul.f32 0.5, %v2518_v56 }
 0x5d6   :  { %v2519_v58 = vmul.f32 0.5, %v2517_v15 }
 0x5d8   :  { %v2521_v47 = vpack.c.bf16 %v2520_v57, %v2519_v58 }
 0x5da   :  { %5879 = vmatmul.mubr.bf16.vlgmr.msra.gmra.mrb[8].mxu0 %v2521_v47 }
 0x5db   :  { %5918 = vmatprep.mubr.msk.bf16.mxu0 %vm6500_vm15, %v6499_v11  ;;  %5903 = vmatpush3.bf16.msra.mxu0 %v6286_v62 }
 0x5dc   :  { %5904 = vmatprep.subr.bf16.mxu0 %v6499_v11 }
 0x5df   :  { %5905 = vmatpush3.bf16.msra.mxu0 %v6287_v0 }
 0x5e0   :  { %5906 = vmatprep.subr.bf16.mxu0 %v6499_v11 }
 0x5e3   :  { %5907 = vmatpush3.bf16.msra.mxu0 %v6289_v31 }
 0x5e4   :  { %5908 = vmatprep.subr.bf16.mxu0 %v6499_v11 }
 0x5e7   :  { %5909 = vmatpush3.bf16.msra.mxu0 %v6291_v1 }
 0x5e8   :  { %5910 = vmatprep.subr.bf16.mxu0 %v6499_v11 }
 0x5eb   :  { %5911 = vmatpush3.bf16.msra.mxu0 %v6293_v63 }
 0x5ec   :  { %5912 = vmatprep.subr.bf16.mxu0 %v6499_v11 }
 0x5ef   :  { %5913 = vmatpush3.bf16.msra.mxu0 %v6295_v4 }
 0x5f0   :  { %5914 = vmatprep.subr.bf16.mxu0 %v6499_v11 }
 0x5f3   :  { %5915 = vmatpush3.bf16.msra.mxu0 %v6297_v6 }
 0x5f4   :  { %5916 = vmatprep.subr.bf16.mxu0 %v6499_v11 }
 0x5f7   :  { %5917 = vmatpush3.bf16.msra.mxu0 %v6299_v8 }
 0x5f8   :  { %5942 = vmatprep.subr.bf16.mxu0 %v6499_v11 }
 0x6ad   :  { %v2627_v16 = vpop.f32.mrb[8].mxu0 }
 0x6ae   :  { %v7112_v42 = vadd.f32 %v5128_v10, %v2627_v16  ;;  %v5880_v22 = vpop.f32.mrb[9].mxu0  ;;  %v6304_v16 = vld [vmem:[#allocation7 + $0x88] sm:$0xff]  }
 0x6af   :  { %v2630_v26 = vpop.f32.mrb[10].mxu0  ;;  %v6306_v22 = vld [vmem:[#allocation7 + $0x98] sm:$0xff]  }
 0x6b0   :  { %v2649_v19 = vmul.f32 %v5137_v21, %v7112_v42  ;;  %v7118_v9 = vadd.f32 %v5128_v10, %v2630_v26  ;;  %v5881_v27 = vpop.f32.mrb[11].mxu0  ;;  %v6308_v26 = vld [vmem:[#allocation7 + $0xa8] sm:$0xff]  }
 0x6b1   :  { %v6309_v27 = vld [vmem:[#allocation7 + $0xb0] sm:$0xff]  }
 0x6b2   :  { %v2656_v29 = vadd.f32 %v5138_v18, %v2649_v19  ;;  %v2650_v30 = vmul.f32 %v5137_v21, %v7118_v9  ;;  %v6305_v21 = vld [vmem:[#allocation7 + $0x90] sm:$0xff]  }
 0x6b4   :  { %v2658_v33 = vmax.f32 %v2656_v29, 0.0  ;;  %v2657_v46 = vadd.f32 %v5138_v18, %v2650_v30  ;;  %v6307_v18 = vld [vmem:[#allocation7 + $0xa0] sm:$0xff]  }
 0x6b6   :  { %v5328_v34 = vpack.c.bf16 %v2658_v33, %v2658_v33  ;;  %v2659_v36 = vmax.f32 %v2657_v46, 0.0  ;;  %v6310_v46 = vld [vmem:[#allocation7 + $0xb8] sm:$0xff]  }
 0x6b8   :  { %v2669_v37 = vshrl.u32 %v5328_v34, 16  ;;  %v5329_v38 = vpack.c.bf16 %v2659_v36, %v2659_v36  ;;  %v2672_v49 = vshll.u32 %v5328_v34, 16 }
 0x6ba   :  { %v2671_v17 = vrot.slane %v2669_v37, 7  ;;  %v2677_v24 = vshrl.u32 %v5329_v38, 16  ;;  %v2680_v32 = vshll.u32 %v5329_v38, 16 }
 0x6bc   :  { %v2674_v40 = vor.u32 %v2672_v49, %v2671_v17  ;;  %v2675_v41 = vrot.slane %v2671_v17, 4  ;;  %v2679_v43 = vrot.slane %v2677_v24, 7  ;;  %v6311_v49 = vld [vmem:[#allocation7 + $0xc0] sm:$0xff]   ;;  %v6312_v24 = vld [vmem:[#allocation7 + $0xc8] sm:$0xff]  }
 0x6be   :  { %v2689_v45 = vsel %vm6721_vm8, %v2674_v40, %v2688_v44  ;;  %v2692_v3 = vsel %vm6663_vm3, %v2675_v41, %v2691_v14  ;;  %v2682_v50 = vor.u32 %v2680_v32, %v2679_v43  ;;  %v2683_v48 = vrot.slane %v2679_v43, 4  ;;  %v6313_v40 = vld [vmem:[#allocation7 + $0x100] sm:$0xff]   ;;  %v6314_v41 = vld [vmem:[#allocation7 + $0xd0] sm:$0xff]   ;;  %v6315_v43 = vld [vmem:[#allocation7 + $0x108] sm:$0xff]  }
 0x6bf   :  { %2690 = vst [vmem:[#allocation2] sm:$0xf] %v2689_v45  ;;  %2693 = vst [vmem:[#allocation2 + $0x4] sm:$0x1] %v2692_v3  ;;  %v6316_v32 = vld [vmem:[#allocation7 + $0xd8] sm:$0xff]   ;;  %v6317_v44 = vld [vmem:[#allocation7 + $0x110] sm:$0xff]  }
 0x6c0   :  { %v2695_v52 = vsel %vm6721_vm8, %v2682_v50, %v2694_v51  ;;  %v2698_v59 = vsel %vm6663_vm3, %v2683_v48, %v2697_v39  ;;  %v6318_v14 = vld [vmem:[#allocation7 + $0xe0] sm:$0xff]   ;;  %v6319_v45 = vld [vmem:[#allocation7 + $0x118] sm:$0xff]   ;;  %v6320_v3 = vld [vmem:[#allocation7 + $0xe8] sm:$0xff]  }
 0x6c1   :  { %2696 = vst [vmem:[#allocation2 + $0xc] sm:$0xf] %v2695_v52  ;;  %2699 = vst [vmem:[#allocation2 + $0x10] sm:$0x1] %v2698_v59  ;;  %v6321_v50 = vld [vmem:[#allocation7 + $0x120] sm:$0xff]   ;;  %v6322_v48 = vld [vmem:[#allocation7 + $0xf0] sm:$0xff]  }
 0x6c2   :  { %v6323_v51 = vld [vmem:[#allocation7 + $0x128] sm:$0xff]   ;;  %v6324_v39 = vld [vmem:[#allocation7 + $0xf8] sm:$0xff]   ;;  %v6326_v52 = vld [vmem:[#allocation7 + $0x130] sm:$0xff]  }
 0x6c3   :  { %v6327_v59 = vld [vmem:[#allocation7 + $0x138] sm:$0xff]  }
 0x6c6   :  { %v2703_v54 = vld [vmem:[#allocation2] sm:$0xf]  ;;  %v2705_v57 = vld [vmem:[#allocation2 + $0x4] sm:$0x1] }
 0x6c7   :  { %v2708_v61 = vshrl.u32 %v2703_v54, 16  ;;  %v2711_v55 = vshll.u32 %v2703_v54, 16  ;;  %v2717_v53 = vshll.u32 %v2705_v57, 16  ;;  %v2735_v29 = vld [vmem:[#allocation2] sm:$0xe]  ;;  %v2743_v36 = vrot.slane %v2705_v57, 5 }
 0x6c8   :  { %v2704_v56 = vld [vmem:[#allocation2 + $0xc] sm:$0xf]  ;;  %v2706_v58 = vld [vmem:[#allocation2 + $0x10] sm:$0x1]  ;;  %v5141_v34 = vrot.slane %v2735_v29, 9 }
 0x6c9   :  { %v5152_v15 = vcombine.low %v2703_v54, %v2704_v56  ;;  %v2710_v47 = vrot.slane %v2708_v61, 4  ;;  %v2713_v62 = vrot.slane %v2711_v55, 5  ;;  %v2722_v0 = vshrl.u32 %v2704_v56, 16  ;;  %v2736_v19 = vld [vmem:[#allocation2 + $0xc] sm:$0xe] }
 0x6ca   :  { %v2725_v28 = vshll.u32 %v2704_v56, 16  ;;  %v2731_v63 = vshll.u32 %v2706_v58, 16  ;;  %v2719_v5 = vrot.slane %v2717_v53, 5  ;;  %v5142_v30 = vrot.slane %v2736_v19, 9 }
 0x6cb   :  { %5919 = vmatmul.mubr.bf16.vlgmr.msra.gmra.mrb[12].mxu0 %v5152_v15  ;;  %v2714_v31 = vor.u32 %v2713_v62, %v2710_v47  ;;  %v2724_v1 = vrot.slane %v2722_v0, 4  ;;  %v2747_v33 = vrot.slane %v2706_v58, 5  ;;  %v2744_v38 = vsel %vm6771_vm14, %v5141_v34, %v2743_v36 }
 0x6cc   :  { %v2727_v2 = vrot.slane %v2725_v28, 5  ;;  %5958 = vmatprep.mubr.msk.bf16.mxu0 %vm6500_vm15, %v6499_v11  ;;  %v2733_v7 = vrot.slane %v2731_v63, 5  ;;  %5943 = vmatpush3.bf16.msra.mxu0 %v6313_v40  ;;  %v5170_v28 = vld [vmem:[%s7497_s14] ss:$0 sm:$0xff]  ;;  %v3142_v40 = vld [vmem:[#allocation2 + $0xc] sm:$0xf] }
 0x6cd   :  { %v2715_v23 = vrot.slane %v2714_v31, 4  ;;  %v2748_v37 = vsel %vm6771_vm14, %v5142_v30, %v2747_v33  ;;  %5944 = vmatprep.subr.bf16.mxu0 %v6499_v11 }
 0x6ce   :  { %v2728_v4 = vor.u32 %v2727_v2, %v2724_v1  ;;  %v5161_v17 = vcombine.low %v2744_v38, %v2748_v37  ;;  %v3136_v37 = vld [vmem:[#allocation2] sm:$0xf]  ;;  %v3139_v38 = vld [vmem:[#allocation2 + $0x4] sm:$0x1] }
 0x6cf   :  { %v2720_v8 = vsel %vm6750_vm11, %v2715_v23, %v2719_v5  ;;  %v5171_v5 = vld [vmem:[%s7494_s11 + $0x1] ss:$0 sm:$0xff] }
 0x6d0   :  { %v2729_v6 = vrot.slane %v2728_v4, 4  ;;  %5945 = vmatpush3.bf16.msra.mxu0 %v6315_v43 }
 0x6d1   :  { %5946 = vmatprep.subr.bf16.mxu0 %v6499_v11 }
 0x6d2   :  { %v2734_v25 = vsel %vm6750_vm11, %v2729_v6, %v2733_v7 }
 0x6d3   :  { %v5143_v10 = vcombine.low %v2720_v8, %v2734_v25  ;;  %v5172_v8 = vld [vmem:[%s7495_s12 + $0x1] ss:$0 sm:$0xff] }
 0x6d4   :  { %5947 = vmatpush3.bf16.msra.mxu0 %v6317_v44 }
 0x6d5   :  { %5899 = vmatmul.mubr.bf16.vlgmr.msra.gmra.mrb[8].mxu1 %v5143_v10  ;;  %5948 = vmatprep.subr.bf16.mxu0 %v6499_v11 }
 0x6d6   :  { %5923 = vmatpush3.bf16.msra.mxu1 %v6303_v12  ;;  %5938 = vmatprep.mubr.msk.bf16.mxu1 %vm6500_vm15, %v6499_v11 }
 0x6d7   :  { %5924 = vmatprep.subr.bf16.mxu1 %v6499_v11 }
 0x6d8   :  { %5949 = vmatpush3.bf16.msra.mxu0 %v6319_v45 }
 0x6d9   :  { %5950 = vmatprep.subr.bf16.mxu0 %v6499_v11 }
 0x6da   :  { %5925 = vmatpush3.bf16.msra.mxu1 %v6304_v16 }
 0x6db   :  { %5926 = vmatprep.subr.bf16.mxu1 %v6499_v11 }
 0x6dc   :  { %5951 = vmatpush3.bf16.msra.mxu0 %v6321_v50 }
 0x6dd   :  { %5952 = vmatprep.subr.bf16.mxu0 %v6499_v11 }
 0x6de   :  { %5927 = vmatpush3.bf16.msra.mxu1 %v6305_v21 }
 0x6df   :  { %5928 = vmatprep.subr.bf16.mxu1 %v6499_v11 }
 0x6e0   :  { %5953 = vmatpush3.bf16.msra.mxu0 %v6323_v51 }
 0x6e1   :  { %5954 = vmatprep.subr.bf16.mxu0 %v6499_v11 }
 0x6e2   :  { %5929 = vmatpush3.bf16.msra.mxu1 %v6306_v22 }
 0x6e3   :  { %5930 = vmatprep.subr.bf16.mxu1 %v6499_v11 }
 0x6e4   :  { %5955 = vmatpush3.bf16.msra.mxu0 %v6326_v52 }
 0x6e5   :  { %5956 = vmatprep.subr.bf16.mxu0 %v6499_v11 }
 0x6e6   :  { %5931 = vmatpush3.bf16.msra.mxu1 %v6307_v18 }
 0x6e7   :  { %5932 = vmatprep.subr.bf16.mxu1 %v6499_v11 }
 0x6e8   :  { %5957 = vmatpush3.bf16.msra.mxu0 %v6327_v59 }
 0x6e9   :  { %5982 = vmatprep.subr.bf16.mxu0 %v6499_v11 }
 0x6ea   :  { %5933 = vmatpush3.bf16.msra.mxu1 %v6308_v26 }
 0x6eb   :  { %5934 = vmatprep.subr.bf16.mxu1 %v6499_v11 }
 0x6ee   :  { %5935 = vmatpush3.bf16.msra.mxu1 %v6309_v27 }
 0x6ef   :  { %5936 = vmatprep.subr.bf16.mxu1 %v6499_v11 }
 0x6f2   :  { %5937 = vmatpush3.bf16.msra.mxu1 %v6310_v46 }
 0x6f3   :  { %5962 = vmatprep.subr.bf16.mxu1 %v6499_v11 }
 0x6f5   :  { %5939 = vmatmul.mubr.bf16.vlgmr.msra.gmra.mrb[12].mxu1 %v5161_v17 }
 0x6f6   :  { %5978 = vmatprep.mubr.msk.bf16.mxu1 %vm6500_vm15, %v6499_v11  ;;  %5963 = vmatpush3.bf16.msra.mxu1 %v6311_v49 }
 0x6f7   :  { %5964 = vmatprep.subr.bf16.mxu1 %v6499_v11 }
 0x6fa   :  { %5965 = vmatpush3.bf16.msra.mxu1 %v6312_v24 }
 0x6fb   :  { %5966 = vmatprep.subr.bf16.mxu1 %v6499_v11 }
 0x6fe   :  { %5967 = vmatpush3.bf16.msra.mxu1 %v6314_v41  ;;  %v3145_v41 = vld [vmem:[#allocation2 + $0x10] sm:$0x1] }
 0x6ff   :  { %5968 = vmatprep.subr.bf16.mxu1 %v6499_v11 }
 0x702   :  { %5969 = vmatpush3.bf16.msra.mxu1 %v6316_v32 }
 0x703   :  { %5970 = vmatprep.subr.bf16.mxu1 %v6499_v11 }
 0x706   :  { %5971 = vmatpush3.bf16.msra.mxu1 %v6318_v14 }
 0x707   :  { %5972 = vmatprep.subr.bf16.mxu1 %v6499_v11 }
 0x70a   :  { %5973 = vmatpush3.bf16.msra.mxu1 %v6320_v3 }
 0x70b   :  { %5974 = vmatprep.subr.bf16.mxu1 %v6499_v11 }
 0x70e   :  { %5975 = vmatpush3.bf16.msra.mxu1 %v6322_v48 }
 0x70f   :  { %5976 = vmatprep.subr.bf16.mxu1 %v6499_v11 }
 0x712   :  { %5977 = vmatpush3.bf16.msra.mxu1 %v6324_v39 }
 0x713   :  { %6002 = vmatprep.subr.bf16.mxu1 %v6499_v11 }
 0x79e   :  { %v2962_v54 = vpop.f32.mrb[12].mxu0 }
 0x79f   :  { %v5920_v61 = vpop.f32.mrb[13].mxu0 }
 0x7a0   :  { %v2965_v55 = vpop.f32.mrb[14].mxu0 }
 0x7a1   :  { %v5921_v56 = vpop.f32.mrb[15].mxu0 }
 0x7a8   :  { %v2867_v15 = vpop.f32.mrb[8].mxu1 }
 0x7a9   :  { %v2963_v57 = vadd.f32 %v2962_v54, %v2867_v15  ;;  %v5900_v58 = vpop.f32.mrb[9].mxu1 }
 0x7aa   :  { %v2870_v47 = vpop.f32.mrb[10].mxu1 }
 0x7ab   :  { %v2966_v62 = vadd.f32 %v2965_v55, %v2870_v47  ;;  %v5901_v0 = vpop.f32.mrb[11].mxu1 }
 0x7c8   :  { %v3071_v31 = vpop.f32.mrb[12].mxu1 }
 0x7c9   :  { %v3078_v53 = vadd.f32 %v3071_v31, %v2963_v57  ;;  %v5940_v1 = vpop.f32.mrb[13].mxu1 }
 0x7ca   :  { %v3074_v2 = vpop.f32.mrb[14].mxu1  ;;  %v6328_v1 = vld [vmem:[#allocation7 + $0x140] sm:$0xff]  }
 0x7cb   :  { %v3084_v63 = vadd.f32 %v5170_v28, %v3078_v53  ;;  %v3079_v23 = vadd.f32 %v3074_v2, %v2966_v62  ;;  %v5941_v4 = vpop.f32.mrb[15].mxu1 }
 0x7cc   :  { %v6331_v4 = vld [vmem:[#allocation7 + $0x158] sm:$0xff]  }
 0x7cd   :  { %v7174_v6 = vadd.f32 %v3084_v63, %v7112_v42  ;;  %v3085_v7 = vadd.f32 %v5170_v28, %v3079_v23  ;;  %v6329_v63 = vld [vmem:[#allocation7 + $0x148] sm:$0xff]   ;;  %v6330_v23 = vld [vmem:[#allocation7 + $0x150] sm:$0xff]  }
 0x7cf   :  { %v3097_v25 = vmul.f32 %v5171_v5, %v7174_v6  ;;  %v7181_v12 = vadd.f32 %v3085_v7, %v7118_v9  ;;  %v6333_v7 = vld [vmem:[#allocation7 + $0x168] sm:$0xff]  }
 0x7d1   :  { %v3104_v10 = vadd.f32 %v5172_v8, %v3097_v25  ;;  %v3098_v16 = vmul.f32 %v5171_v5, %v7181_v12  ;;  %v6332_v5 = vld [vmem:[#allocation7 + $0x160] sm:$0xff]   ;;  %v6334_v25 = vld [vmem:[#allocation7 + $0x170] sm:$0xff]  }
 0x7d3   :  { %v3106_v21 = vmax.f32 %v3104_v10, 0.0  ;;  %v3105_v22 = vadd.f32 %v5172_v8, %v3098_v16 }
 0x7d5   :  { %v5330_v18 = vpack.c.bf16 %v3106_v21, %v3106_v21  ;;  %v3107_v26 = vmax.f32 %v3105_v22, 0.0  ;;  %v6335_v22 = vld [vmem:[#allocation7 + $0x178] sm:$0xff]  }
 0x7d7   :  { %v3117_v19 = vshrl.u32 %v5330_v18, 16  ;;  %v5331_v42 = vpack.c.bf16 %v3107_v26, %v3107_v26  ;;  %v3120_v29 = vshll.u32 %v5330_v18, 16 }
 0x7d9   :  { %v3119_v27 = vrot.slane %v3117_v19, 7  ;;  %v3125_v30 = vshrl.u32 %v5331_v42, 16  ;;  %v3128_v36 = vshll.u32 %v5331_v42, 16 }
 0x7db   :  { %v3122_v33 = vor.u32 %v3120_v29, %v3119_v27  ;;  %v3123_v46 = vrot.slane %v3119_v27, 4  ;;  %v3127_v34 = vrot.slane %v3125_v30, 7  ;;  %v6336_v29 = vld [vmem:[#allocation7 + $0x180] sm:$0xff]   ;;  %v6337_v30 = vld [vmem:[#allocation7 + $0x188] sm:$0xff]  }
 0x7dd   :  { %v3137_v9 = vsel %vm6721_vm8, %v3122_v33, %v3136_v37  ;;  %v3140_v17 = vsel %vm6663_vm3, %v3123_v46, %v3139_v38  ;;  %v3130_v49 = vor.u32 %v3128_v36, %v3127_v34  ;;  %v3131_v24 = vrot.slane %v3127_v34, 4  ;;  %v6338_v33 = vld [vmem:[#allocation7 + $0x1c0] sm:$0xff]   ;;  %v6339_v46 = vld [vmem:[#allocation7 + $0x190] sm:$0xff]   ;;  %v6340_v34 = vld [vmem:[#allocation7 + $0x1c8] sm:$0xff]  }
 0x7de   :  { %3138 = vst [vmem:[#allocation2] sm:$0xf] %v3137_v9  ;;  %3141 = vst [vmem:[#allocation2 + $0x4] sm:$0x1] %v3140_v17  ;;  %v6341_v36 = vld [vmem:[#allocation7 + $0x198] sm:$0xff]   ;;  %v6342_v37 = vld [vmem:[#allocation7 + $0x1d0] sm:$0xff]  }
 0x7df   :  { %v3143_v43 = vsel %vm6721_vm8, %v3130_v49, %v3142_v40  ;;  %v3146_v32 = vsel %vm6663_vm3, %v3131_v24, %v3145_v41  ;;  %v6343_v38 = vld [vmem:[#allocation7 + $0x1a0] sm:$0xff]   ;;  %v6344_v9 = vld [vmem:[#allocation7 + $0x1d8] sm:$0xff]   ;;  %v6345_v17 = vld [vmem:[#allocation7 + $0x1a8] sm:$0xff]  }
 0x7e0   :  { %3144 = vst [vmem:[#allocation2 + $0xc] sm:$0xf] %v3143_v43  ;;  %3147 = vst [vmem:[#allocation2 + $0x10] sm:$0x1] %v3146_v32  ;;  %v6346_v49 = vld [vmem:[#allocation7 + $0x1e0] sm:$0xff]   ;;  %v6347_v24 = vld [vmem:[#allocation7 + $0x1b0] sm:$0xff]  }
 0x7e1   :  { %v6348_v40 = vld [vmem:[#allocation7 + $0x1e8] sm:$0xff]   ;;  %v6349_v41 = vld [vmem:[#allocation7 + $0x1b8] sm:$0xff]   ;;  %v6351_v43 = vld [vmem:[#allocation7 + $0x1f0] sm:$0xff]  }
 0x7e2   :  { %v6352_v32 = vld [vmem:[#allocation7 + $0x1f8] sm:$0xff]  }
 0x7e5   :  { %v3151_v44 = vld [vmem:[#allocation2] sm:$0xf]  ;;  %v3153_v48 = vld [vmem:[#allocation2 + $0x4] sm:$0x1] }
 0x7e6   :  { %v3156_v14 = vshrl.u32 %v3151_v44, 16  ;;  %v3159_v45 = vshll.u32 %v3151_v44, 16  ;;  %v3165_v55 = vshll.u32 %v3153_v48, 16  ;;  %v3183_v10 = vld [vmem:[#allocation2] sm:$0xe]  ;;  %v3191_v26 = vrot.slane %v3153_v48, 5 }
 0x7e7   :  { %v3152_v3 = vld [vmem:[#allocation2 + $0xc] sm:$0xf]  ;;  %v3154_v51 = vld [vmem:[#allocation2 + $0x10] sm:$0x1]  ;;  %v5175_v18 = vrot.slane %v3183_v10, 9 }
 0x7e8   :  { %v5186_v50 = vcombine.low %v3151_v44, %v3152_v3  ;;  %v3158_v39 = vrot.slane %v3156_v14, 4  ;;  %v3161_v52 = vrot.slane %v3159_v45, 5  ;;  %v3170_v59 = vshrl.u32 %v3152_v3, 16  ;;  %v3184_v8 = vld [vmem:[#allocation2 + $0xc] sm:$0xe] }
 0x7e9   :  { %v3173_v54 = vshll.u32 %v3152_v3, 16  ;;  %v3179_v57 = vshll.u32 %v3154_v51, 16  ;;  %v3167_v62 = vrot.slane %v3165_v55, 5  ;;  %v5176_v16 = vrot.slane %v3184_v8, 9 }
 0x7ea   :  { %5979 = vmatmul.mubr.bf16.vlgmr.msra.gmra.mrb[16].mxu1 %v5186_v50  ;;  %v3162_v61 = vor.u32 %v3161_v52, %v3158_v39  ;;  %v3172_v56 = vrot.slane %v3170_v59, 4  ;;  %v3195_v21 = vrot.slane %v3154_v51, 5  ;;  %v3192_v42 = vsel %vm6771_vm14, %v5175_v18, %v3191_v26 }
 0x7eb   :  { %v3175_v15 = vrot.slane %v3173_v54, 5  ;;  %6018 = vmatprep.mubr.msk.bf16.mxu1 %vm6500_vm15, %v6499_v11  ;;  %v3181_v28 = vrot.slane %v3179_v57, 5  ;;  %6003 = vmatpush3.bf16.msra.mxu1 %v6338_v33  ;;  %v5204_v54 = vld [vmem:[%s7497_s14 + $0x1] ss:$0 sm:$0xff]  ;;  %v3591_v33 = vld [vmem:[#allocation2 + $0xc] sm:$0xf] }
 0x7ec   :  { %v3163_v58 = vrot.slane %v3162_v61, 4  ;;  %v3196_v19 = vsel %vm6771_vm14, %v5176_v16, %v3195_v21  ;;  %6004 = vmatprep.subr.bf16.mxu1 %v6499_v11 }
 0x7ed   :  { %v3176_v47 = vor.u32 %v3175_v15, %v3172_v56  ;;  %v5195_v27 = vcombine.low %v3192_v42, %v3196_v19  ;;  %v3585_v19 = vld [vmem:[#allocation2] sm:$0xf]  ;;  %v3588_v42 = vld [vmem:[#allocation2 + $0x4] sm:$0x1] }
 0x7ee   :  { %v3168_v31 = vsel %vm6750_vm11, %v3163_v58, %v3167_v62  ;;  %v5205_v62 = vld [vmem:[%s7494_s11 + $0x2] ss:$0 sm:$0xff] }
 0x7ef   :  { %v3177_v0 = vrot.slane %v3176_v47, 4  ;;  %6005 = vmatpush3.bf16.msra.mxu1 %v6340_v34 }
 0x7f0   :  { %6006 = vmatprep.subr.bf16.mxu1 %v6499_v11 }
 0x7f1   :  { %v3182_v53 = vsel %vm6750_vm11, %v3177_v0, %v3181_v28 }
 0x7f2   :  { %v5177_v2 = vcombine.low %v3168_v31, %v3182_v53  ;;  %v5206_v31 = vld [vmem:[%s7495_s12 + $0x2] ss:$0 sm:$0xff] }
 0x7f3   :  { %6007 = vmatpush3.bf16.msra.mxu1 %v6342_v37 }
 0x7f4   :  { %5959 = vmatmul.mubr.bf16.vlgmr.msra.gmra.mrb[16].mxu0 %v5177_v2  ;;  %6008 = vmatprep.subr.bf16.mxu1 %v6499_v11 }
 0x7f5   :  { %5983 = vmatpush3.bf16.msra.mxu0 %v6328_v1  ;;  %5998 = vmatprep.mubr.msk.bf16.mxu0 %vm6500_vm15, %v6499_v11 }
 0x7f6   :  { %5984 = vmatprep.subr.bf16.mxu0 %v6499_v11 }
 0x7f7   :  { %6009 = vmatpush3.bf16.msra.mxu1 %v6344_v9 }
 0x7f8   :  { %6010 = vmatprep.subr.bf16.mxu1 %v6499_v11 }
 0x7f9   :  { %5985 = vmatpush3.bf16.msra.mxu0 %v6329_v63 }
 0x7fa   :  { %5986 = vmatprep.subr.bf16.mxu0 %v6499_v11 }
 0x7fb   :  { %6011 = vmatpush3.bf16.msra.mxu1 %v6346_v49 }
 0x7fc   :  { %6012 = vmatprep.subr.bf16.mxu1 %v6499_v11 }
 0x7fd   :  { %5987 = vmatpush3.bf16.msra.mxu0 %v6330_v23 }
 0x7fe   :  { %5988 = vmatprep.subr.bf16.mxu0 %v6499_v11 }
 0x7ff   :  { %6013 = vmatpush3.bf16.msra.mxu1 %v6348_v40 }
 0x800   :  { %6014 = vmatprep.subr.bf16.mxu1 %v6499_v11 }
 0x801   :  { %5989 = vmatpush3.bf16.msra.mxu0 %v6331_v4 }
 0x802   :  { %5990 = vmatprep.subr.bf16.mxu0 %v6499_v11 }
 0x803   :  { %6015 = vmatpush3.bf16.msra.mxu1 %v6351_v43 }
 0x804   :  { %6016 = vmatprep.subr.bf16.mxu1 %v6499_v11 }
 0x805   :  { %5991 = vmatpush3.bf16.msra.mxu0 %v6332_v5 }
 0x806   :  { %5992 = vmatprep.subr.bf16.mxu0 %v6499_v11 }
 0x807   :  { %6017 = vmatpush3.bf16.msra.mxu1 %v6352_v32 }
 0x808   :  { %6042 = vmatprep.subr.bf16.mxu1 %v6499_v11 }
 0x809   :  { %5993 = vmatpush3.bf16.msra.mxu0 %v6333_v7 }
 0x80a   :  { %5994 = vmatprep.subr.bf16.mxu0 %v6499_v11 }
 0x80d   :  { %5995 = vmatpush3.bf16.msra.mxu0 %v6334_v25 }
 0x80e   :  { %5996 = vmatprep.subr.bf16.mxu0 %v6499_v11 }
 0x811   :  { %5997 = vmatpush3.bf16.msra.mxu0 %v6335_v22 }
 0x812   :  { %6022 = vmatprep.subr.bf16.mxu0 %v6499_v11 }
 0x814   :  { %5999 = vmatmul.mubr.bf16.vlgmr.msra.gmra.mrb[20].mxu0 %v5195_v27 }
 0x815   :  { %6038 = vmatprep.mubr.msk.bf16.mxu0 %vm6500_vm15, %v6499_v11  ;;  %6023 = vmatpush3.bf16.msra.mxu0 %v6336_v29 }
 0x816   :  { %6024 = vmatprep.subr.bf16.mxu0 %v6499_v11 }
 0x819   :  { %6025 = vmatpush3.bf16.msra.mxu0 %v6337_v30 }
 0x81a   :  { %6026 = vmatprep.subr.bf16.mxu0 %v6499_v11 }
 0x81d   :  { %6027 = vmatpush3.bf16.msra.mxu0 %v6339_v46  ;;  %v3594_v46 = vld [vmem:[#allocation2 + $0x10] sm:$0x1] }
 0x81e   :  { %6028 = vmatprep.subr.bf16.mxu0 %v6499_v11 }
 0x821   :  { %6029 = vmatpush3.bf16.msra.mxu0 %v6341_v36 }
 0x822   :  { %6030 = vmatprep.subr.bf16.mxu0 %v6499_v11 }
 0x825   :  { %6031 = vmatpush3.bf16.msra.mxu0 %v6343_v38 }
 0x826   :  { %6032 = vmatprep.subr.bf16.mxu0 %v6499_v11 }
 0x829   :  { %6033 = vmatpush3.bf16.msra.mxu0 %v6345_v17 }
 0x82a   :  { %6034 = vmatprep.subr.bf16.mxu0 %v6499_v11 }
 0x82d   :  { %6035 = vmatpush3.bf16.msra.mxu0 %v6347_v24 }
 0x82e   :  { %6036 = vmatprep.subr.bf16.mxu0 %v6499_v11 }
 0x831   :  { %6037 = vmatpush3.bf16.msra.mxu0 %v6349_v41 }
 0x832   :  { %6062 = vmatprep.subr.bf16.mxu0 %v6499_v11 }
 0x8bd   :  { %v3411_v44 = vpop.f32.mrb[16].mxu1 }
 0x8be   :  { %v5980_v14 = vpop.f32.mrb[17].mxu1 }
 0x8bf   :  { %v3414_v45 = vpop.f32.mrb[18].mxu1 }
 0x8c0   :  { %v5981_v3 = vpop.f32.mrb[19].mxu1 }
 0x8c7   :  { %v3316_v50 = vpop.f32.mrb[16].mxu0 }
 0x8c8   :  { %v3412_v48 = vadd.f32 %v3411_v44, %v3316_v50  ;;  %v5960_v51 = vpop.f32.mrb[17].mxu0 }
 0x8c9   :  { %v3319_v39 = vpop.f32.mrb[18].mxu0 }
 0x8ca   :  { %v3415_v52 = vadd.f32 %v3414_v45, %v3319_v39  ;;  %v5961_v59 = vpop.f32.mrb[19].mxu0 }
 0x8e7   :  { %v3520_v61 = vpop.f32.mrb[20].mxu0 }
 0x8e8   :  { %v3527_v55 = vadd.f32 %v3520_v61, %v3412_v48  ;;  %v6000_v56 = vpop.f32.mrb[21].mxu0 }
 0x8e9   :  { %v3523_v15 = vpop.f32.mrb[22].mxu0  ;;  %v6353_v56 = vld [vmem:[#allocation7 + $0x200] sm:$0xff]  }
 0x8ea   :  { %v3533_v57 = vadd.f32 %v5204_v54, %v3527_v55  ;;  %v3528_v58 = vadd.f32 %v3523_v15, %v3415_v52  ;;  %v6001_v47 = vpop.f32.mrb[23].mxu0 }
 0x8eb   :  { %v6356_v47 = vld [vmem:[#allocation7 + $0x218] sm:$0xff]  }
 0x8ec   :  { %v7237_v0 = vadd.f32 %v3533_v57, %v7174_v6  ;;  %v3534_v28 = vadd.f32 %v5204_v54, %v3528_v58  ;;  %v6354_v57 = vld [vmem:[#allocation7 + $0x208] sm:$0xff]   ;;  %v6355_v58 = vld [vmem:[#allocation7 + $0x210] sm:$0xff]  }
 0x8ee   :  { %v3546_v53 = vmul.f32 %v5205_v62, %v7237_v0  ;;  %v7244_v1 = vadd.f32 %v3534_v28, %v7181_v12  ;;  %v6358_v28 = vld [vmem:[#allocation7 + $0x228] sm:$0xff]  }
 0x8f0   :  { %v3553_v2 = vadd.f32 %v5206_v31, %v3546_v53  ;;  %v3547_v63 = vmul.f32 %v5205_v62, %v7244_v1  ;;  %v6357_v62 = vld [vmem:[#allocation7 + $0x220] sm:$0xff]   ;;  %v6359_v53 = vld [vmem:[#allocation7 + $0x230] sm:$0xff]  }
 0x8f2   :  { %v3555_v23 = vmax.f32 %v3553_v2, 0.0  ;;  %v3554_v4 = vadd.f32 %v5206_v31, %v3547_v63 }
 0x8f4   :  { %v5332_v5 = vpack.c.bf16 %v3555_v23, %v3555_v23  ;;  %v3556_v7 = vmax.f32 %v3554_v4, 0.0  ;;  %v6360_v4 = vld [vmem:[#allocation7 + $0x238] sm:$0xff]  }
 0x8f6   :  { %v3566_v8 = vshrl.u32 %v5332_v5, 16  ;;  %v5333_v6 = vpack.c.bf16 %v3556_v7, %v3556_v7  ;;  %v3569_v10 = vshll.u32 %v5332_v5, 16 }
 0x8f8   :  { %v3568_v25 = vrot.slane %v3566_v8, 7  ;;  %v3574_v16 = vshrl.u32 %v5333_v6, 16  ;;  %v3577_v26 = vshll.u32 %v5333_v6, 16 }
 0x8fa   :  { %v3571_v21 = vor.u32 %v3569_v10, %v3568_v25  ;;  %v3572_v22 = vrot.slane %v3568_v25, 4  ;;  %v3576_v18 = vrot.slane %v3574_v16, 7  ;;  %v6361_v10 = vld [vmem:[#allocation7 + $0x240] sm:$0xff]   ;;  %v6362_v16 = vld [vmem:[#allocation7 + $0x248] sm:$0xff]  }
 0x8fc   :  { %v3586_v12 = vsel %vm6721_vm8, %v3571_v21, %v3585_v19  ;;  %v3589_v27 = vsel %vm6663_vm3, %v3572_v22, %v3588_v42  ;;  %v3579_v29 = vor.u32 %v3577_v26, %v3576_v18  ;;  %v3580_v30 = vrot.slane %v3576_v18, 4  ;;  %v6363_v21 = vld [vmem:[#allocation7 + $0x280] sm:$0xff]   ;;  %v6364_v22 = vld [vmem:[#allocation7 + $0x250] sm:$0xff]   ;;  %v6365_v18 = vld [vmem:[#allocation7 + $0x288] sm:$0xff]  }
 0x8fd   :  { %3587 = vst [vmem:[#allocation2] sm:$0xf] %v3586_v12  ;;  %3590 = vst [vmem:[#allocation2 + $0x4] sm:$0x1] %v3589_v27  ;;  %v6366_v26 = vld [vmem:[#allocation7 + $0x258] sm:$0xff]   ;;  %v6367_v19 = vld [vmem:[#allocation7 + $0x290] sm:$0xff]  }
 0x8fe   :  { %v3592_v34 = vsel %vm6721_vm8, %v3579_v29, %v3591_v33  ;;  %v3595_v36 = vsel %vm6663_vm3, %v3580_v30, %v3594_v46  ;;  %v6368_v42 = vld [vmem:[#allocation7 + $0x260] sm:$0xff]   ;;  %v6369_v12 = vld [vmem:[#allocation7 + $0x298] sm:$0xff]   ;;  %v6370_v27 = vld [vmem:[#allocation7 + $0x268] sm:$0xff]  }
 0x8ff   :  { %3593 = vst [vmem:[#allocation2 + $0xc] sm:$0xf] %v3592_v34  ;;  %3596 = vst [vmem:[#allocation2 + $0x10] sm:$0x1] %v3595_v36  ;;  %v6371_v29 = vld [vmem:[#allocation7 + $0x2a0] sm:$0xff]   ;;  %v6372_v30 = vld [vmem:[#allocation7 + $0x270] sm:$0xff]  }
 0x900   :  { %v6373_v33 = vld [vmem:[#allocation7 + $0x2a8] sm:$0xff]   ;;  %v6374_v46 = vld [vmem:[#allocation7 + $0x278] sm:$0xff]   ;;  %v6376_v34 = vld [vmem:[#allocation7 + $0x2b0] sm:$0xff]  }
 0x901   :  { %v6377_v36 = vld [vmem:[#allocation7 + $0x2b8] sm:$0xff]  }
 0x904   :  { %v3600_v37 = vld [vmem:[#allocation2] sm:$0xf]  ;;  %v3602_v49 = vld [vmem:[#allocation2 + $0x4] sm:$0x1] }
 0x905   :  { %v3605_v38 = vshrl.u32 %v3600_v37, 16  ;;  %v3608_v9 = vshll.u32 %v3600_v37, 16  ;;  %v3614_v14 = vshll.u32 %v3602_v49, 16  ;;  %v3632_v2 = vld [vmem:[#allocation2] sm:$0xe]  ;;  %v3640_v7 = vrot.slane %v3602_v49, 5 }
 0x906   :  { %v3601_v17 = vld [vmem:[#allocation2 + $0xc] sm:$0xf]  ;;  %v3603_v24 = vld [vmem:[#allocation2 + $0x10] sm:$0x1]  ;;  %v5209_v5 = vrot.slane %v3632_v2, 9 }
 0x907   :  { %v3619_v40 = vshrl.u32 %v3601_v17, 16  ;;  %v3622_v41 = vshll.u32 %v3601_v17, 16  ;;  %v5220_v43 = vcombine.low %v3600_v37, %v3601_v17  ;;  %v3607_v32 = vrot.slane %v3605_v38, 4  ;;  %v3633_v31 = vld [vmem:[#allocation2 + $0xc] sm:$0xe] }
 0x908   :  { %v3610_v44 = vrot.slane %v3608_v9, 5  ;;  %v3628_v50 = vshll.u32 %v3603_v24, 16  ;;  %v3616_v52 = vrot.slane %v3614_v14, 5  ;;  %v5210_v63 = vrot.slane %v3633_v31, 9 }
 0x909   :  { %6039 = vmatmul.mubr.bf16.vlgmr.msra.gmra.mrb[24].mxu0 %v5220_v43  ;;  %v3621_v45 = vrot.slane %v3619_v40, 4  ;;  %v3624_v3 = vrot.slane %v3622_v41, 5  ;;  %v3644_v23 = vrot.slane %v3603_v24, 5  ;;  %v3641_v6 = vsel %vm6771_vm14, %v5209_v5, %v3640_v7 }
 0x90a   :  { %v3611_v48 = vor.u32 %v3610_v44, %v3607_v32  ;;  %6078 = vmatprep.mubr.msk.bf16.mxu0 %vm6500_vm15, %v6499_v11  ;;  %v3630_v54 = vrot.slane %v3628_v50, 5  ;;  %6063 = vmatpush3.bf16.msra.mxu0 %v6363_v21  ;;  %v5238_v44 = vld [vmem:[%s7497_s14 + $0x2] ss:$0 sm:$0xff]  ;;  %v4040_v21 = vld [vmem:[#allocation2 + $0xc] sm:$0xf] }
 0x90b   :  { %v3625_v51 = vor.u32 %v3624_v3, %v3621_v45  ;;  %v3645_v8 = vsel %vm6771_vm14, %v5210_v63, %v3644_v23  ;;  %6064 = vmatprep.subr.bf16.mxu0 %v6499_v11 }
 0x90c   :  { %v3612_v39 = vrot.slane %v3611_v48, 4  ;;  %v5229_v25 = vcombine.low %v3641_v6, %v3645_v8  ;;  %v4034_v8 = vld [vmem:[#allocation2] sm:$0xf]  ;;  %v4037_v6 = vld [vmem:[#allocation2 + $0x4] sm:$0x1] }
 0x90d   :  { %v3626_v59 = vrot.slane %v3625_v51, 4 }
 0x90e   :  { %v3617_v61 = vsel %vm6750_vm11, %v3612_v39, %v3616_v52  ;;  %6065 = vmatpush3.bf16.msra.mxu0 %v6365_v18  ;;  %v5239_v52 = vld [vmem:[%s7494_s11 + $0x3] ss:$0 sm:$0xff] }
 0x90f   :  { %v3631_v55 = vsel %vm6750_vm11, %v3626_v59, %v3630_v54  ;;  %6066 = vmatprep.subr.bf16.mxu0 %v6499_v11 }
 0x910   :  { %v5211_v15 = vcombine.low %v3617_v61, %v3631_v55  ;;  %v5240_v61 = vld [vmem:[%s7495_s12 + $0x3] ss:$0 sm:$0xff] }
 0x912   :  { %6019 = vmatmul.mubr.bf16.vlgmr.msra.gmra.mrb[20].mxu1 %v5211_v15  ;;  %6067 = vmatpush3.bf16.msra.mxu0 %v6367_v19 }
 0x913   :  { %6043 = vmatpush3.bf16.msra.mxu1 %v6353_v56  ;;  %6058 = vmatprep.mubr.msk.bf16.mxu1 %vm6500_vm15, %v6499_v11 }
 0x914   :  { %6044 = vmatprep.subr.bf16.mxu1 %v6499_v11  ;;  %6068 = vmatprep.subr.bf16.mxu0 %v6499_v11 }
 0x916   :  { %6069 = vmatpush3.bf16.msra.mxu0 %v6369_v12 }
 0x917   :  { %6045 = vmatpush3.bf16.msra.mxu1 %v6354_v57  ;;  %6070 = vmatprep.subr.bf16.mxu0 %v6499_v11 }
 0x918   :  { %6046 = vmatprep.subr.bf16.mxu1 %v6499_v11 }
 0x91a   :  { %6071 = vmatpush3.bf16.msra.mxu0 %v6371_v29 }
 0x91b   :  { %6047 = vmatpush3.bf16.msra.mxu1 %v6355_v58  ;;  %6072 = vmatprep.subr.bf16.mxu0 %v6499_v11 }
 0x91c   :  { %6048 = vmatprep.subr.bf16.mxu1 %v6499_v11 }
 0x91e   :  { %6073 = vmatpush3.bf16.msra.mxu0 %v6373_v33 }
 0x91f   :  { %6049 = vmatpush3.bf16.msra.mxu1 %v6356_v47  ;;  %6074 = vmatprep.subr.bf16.mxu0 %v6499_v11 }
 0x920   :  { %6050 = vmatprep.subr.bf16.mxu1 %v6499_v11 }
 0x922   :  { %6075 = vmatpush3.bf16.msra.mxu0 %v6376_v34 }
 0x923   :  { %6051 = vmatpush3.bf16.msra.mxu1 %v6357_v62  ;;  %6076 = vmatprep.subr.bf16.mxu0 %v6499_v11 }
 0x924   :  { %6052 = vmatprep.subr.bf16.mxu1 %v6499_v11 }
 0x926   :  { %6077 = vmatpush3.bf16.msra.mxu0 %v6377_v36 }
 0x927   :  { %6053 = vmatpush3.bf16.msra.mxu1 %v6358_v28  ;;  %6102 = vmatprep.subr.bf16.mxu0 %v6499_v11 }
 0x928   :  { %6054 = vmatprep.subr.bf16.mxu1 %v6499_v11 }
 0x92b   :  { %6055 = vmatpush3.bf16.msra.mxu1 %v6359_v53 }
 0x92c   :  { %6056 = vmatprep.subr.bf16.mxu1 %v6499_v11 }
 0x92f   :  { %6057 = vmatpush3.bf16.msra.mxu1 %v6360_v4 }
 0x930   :  { %6082 = vmatprep.subr.bf16.mxu1 %v6499_v11 }
 0x932   :  { %6059 = vmatmul.mubr.bf16.vlgmr.msra.gmra.mrb[24].mxu1 %v5229_v25 }
 0x933   :  { %6098 = vmatprep.mubr.msk.bf16.mxu1 %vm6500_vm15, %v6499_v11  ;;  %6083 = vmatpush3.bf16.msra.mxu1 %v6361_v10 }
 0x934   :  { %6084 = vmatprep.subr.bf16.mxu1 %v6499_v11 }
 0x937   :  { %6085 = vmatpush3.bf16.msra.mxu1 %v6362_v16 }
 0x938   :  { %6086 = vmatprep.subr.bf16.mxu1 %v6499_v11 }
 0x93b   :  { %6087 = vmatpush3.bf16.msra.mxu1 %v6364_v22  ;;  %v4043_v22 = vld [vmem:[#allocation2 + $0x10] sm:$0x1] }
 0x93c   :  { %6088 = vmatprep.subr.bf16.mxu1 %v6499_v11 }
 0x93f   :  { %6089 = vmatpush3.bf16.msra.mxu1 %v6366_v26 }
 0x940   :  { %6090 = vmatprep.subr.bf16.mxu1 %v6499_v11 }
 0x943   :  { %6091 = vmatpush3.bf16.msra.mxu1 %v6368_v42 }
 0x944   :  { %6092 = vmatprep.subr.bf16.mxu1 %v6499_v11 }
 0x947   :  { %6093 = vmatpush3.bf16.msra.mxu1 %v6370_v27 }
 0x948   :  { %6094 = vmatprep.subr.bf16.mxu1 %v6499_v11 }
 0x94b   :  { %6095 = vmatpush3.bf16.msra.mxu1 %v6372_v30 }
 0x94c   :  { %6096 = vmatprep.subr.bf16.mxu1 %v6499_v11 }
 0x94f   :  { %6097 = vmatpush3.bf16.msra.mxu1 %v6374_v46 }
 0x9dc   :  { %v3860_v37 = vpop.f32.mrb[24].mxu0 }
 0x9dd   :  { %v6040_v38 = vpop.f32.mrb[25].mxu0 }
 0x9de   :  { %v3863_v9 = vpop.f32.mrb[26].mxu0 }
 0x9df   :  { %v6041_v17 = vpop.f32.mrb[27].mxu0 }
 0x9e5   :  { %v3765_v49 = vpop.f32.mrb[20].mxu1 }
 0x9e6   :  { %v3861_v24 = vadd.f32 %v3860_v37, %v3765_v49  ;;  %v6020_v40 = vpop.f32.mrb[21].mxu1 }
 0x9e7   :  { %v3768_v41 = vpop.f32.mrb[22].mxu1 }
 0x9e8   :  { %v3864_v43 = vadd.f32 %v3863_v9, %v3768_v41  ;;  %v6021_v32 = vpop.f32.mrb[23].mxu1 }
 0xa05   :  { %v3969_v14 = vpop.f32.mrb[24].mxu1 }
 0xa06   :  { %v3976_v45 = vadd.f32 %v3969_v14, %v3861_v24  ;;  %v6060_v3 = vpop.f32.mrb[25].mxu1  ;;  %v6378_v14 = vld [vmem:[#allocation7 + $0x2c0] sm:$0xff]  }
 0xa07   :  { %v3972_v50 = vpop.f32.mrb[26].mxu1  ;;  %v6379_v3 = vld [vmem:[#allocation7 + $0x2c8] sm:$0xff]  }
 0xa08   :  { %v3982_v48 = vadd.f32 %v5238_v44, %v3976_v45  ;;  %v3977_v51 = vadd.f32 %v3972_v50, %v3864_v43  ;;  %v6061_v39 = vpop.f32.mrb[27].mxu1  ;;  %v6380_v50 = vld [vmem:[#allocation7 + $0x2d0] sm:$0xff]  }
 0xa0a   :  { %v7299_v59 = vadd.f32 %v3982_v48, %v7237_v0  ;;  %v3983_v54 = vadd.f32 %v5238_v44, %v3977_v51  ;;  %v6381_v48 = vld [vmem:[#allocation7 + $0x2d8] sm:$0xff]   ;;  %v6383_v51 = vld [vmem:[#allocation7 + $0x2e8] sm:$0xff]  }
 0xa0c   :  { %v3995_v55 = vmul.f32 %v5239_v52, %v7299_v59  ;;  %v7306_v56 = vadd.f32 %v3983_v54, %v7244_v1 }
 0xa0e   :  { %v4002_v15 = vadd.f32 %v5240_v61, %v3995_v55  ;;  %v3996_v57 = vmul.f32 %v5239_v52, %v7306_v56  ;;  %v6384_v52 = vld [vmem:[#allocation7 + $0x2f0] sm:$0xff]  }
 0xa10   :  { %v4004_v58 = vmax.f32 %v4002_v15, 0.0  ;;  %v4003_v47 = vadd.f32 %v5240_v61, %v3996_v57  ;;  %v6385_v15 = vld [vmem:[#allocation7 + $0x2f8] sm:$0xff]  }
 0xa12   :  { %v5334_v62 = vpack.c.bf16 %v4004_v58, %v4004_v58  ;;  %v4005_v28 = vmax.f32 %v4003_v47, 0.0 }
 0xa14   :  { %v4015_v31 = vshrl.u32 %v5334_v62, 16  ;;  %v5335_v0 = vpack.c.bf16 %v4005_v28, %v4005_v28  ;;  %v4018_v2 = vshll.u32 %v5334_v62, 16 }
 0xa16   :  { %v4017_v53 = vrot.slane %v4015_v31, 7  ;;  %v4023_v63 = vshrl.u32 %v5335_v0, 16  ;;  %v4026_v7 = vshll.u32 %v5335_v0, 16  ;;  %v6386_v31 = vld [vmem:[%s7498_s15 + $0x40] sm:$0xff]  }
 0xa17   :  { %v6387_v0 = vld [vmem:[%s7498_s15 + $0xc0] sm:$0xff]   ;;  %5573 = vmatprep.subr.bf16.mxu1 %v6386_v31 }
 0xa18   :  { %v4020_v23 = vor.u32 %v4018_v2, %v4017_v53  ;;  %v4021_v4 = vrot.slane %v4017_v53, 4  ;;  %v4025_v5 = vrot.slane %v4023_v63, 7  ;;  %v6388_v53 = vld [vmem:[%s7498_s15] sm:$0xff]   ;;  %v6391_v63 = vld [vmem:[%s7498_s15 + $0xc8] sm:$0xff]  }
 0xa19   :  { %v6389_v2 = vld [vmem:[%s7498_s15 + $0x80] sm:$0xff]  }
 0xa1a   :  { %v4035_v1 = vsel %vm6721_vm8, %v4020_v23, %v4034_v8  ;;  %v4038_v25 = vsel %vm6663_vm3, %v4021_v4, %v4037_v6  ;;  %v4028_v10 = vor.u32 %v4026_v7, %v4025_v5  ;;  %v4029_v16 = vrot.slane %v4025_v5, 4  ;;  %v6392_v23 = vld [vmem:[%s7498_s15 + $0x8] sm:$0xff]   ;;  %v6394_v5 = vld [vmem:[%s7498_s15 + $0x50] sm:$0xff]  }
 0xa1b   :  { %4036 = vst [vmem:[#allocation2] sm:$0xf] %v4035_v1  ;;  %4039 = vst [vmem:[#allocation2 + $0x4] sm:$0x1] %v4038_v25  ;;  %v6393_v4 = vld [vmem:[%s7498_s15 + $0x88] sm:$0xff]   ;;  %v6395_v7 = vld [vmem:[%s7498_s15 + $0xd0] sm:$0xff]  }
 0xa1c   :  { %v4041_v18 = vsel %vm6721_vm8, %v4028_v10, %v4040_v21  ;;  %v4044_v26 = vsel %vm6663_vm3, %v4029_v16, %v4043_v22  ;;  %v6396_v8 = vld [vmem:[%s7498_s15 + $0x10] sm:$0xff]   ;;  %v6398_v1 = vld [vmem:[%s7498_s15 + $0x58] sm:$0xff]   ;;  %v6402_v21 = vld [vmem:[%s7498_s15 + $0x60] sm:$0xff]   ;;  %vm4469_vm3 = vcmask 1045508  }
 0xa1d   :  { %4042 = vst [vmem:[#allocation2 + $0xc] sm:$0xf] %v4041_v18  ;;  %4045 = vst [vmem:[#allocation2 + $0x10] sm:$0x1] %v4044_v26  ;;  %v6397_v6 = vld [vmem:[%s7498_s15 + $0x90] sm:$0xff]   ;;  %v6399_v25 = vld [vmem:[%s7498_s15 + $0xd8] sm:$0xff]  }
 0xa1e   :  { %v6400_v10 = vld [vmem:[%s7498_s15 + $0x18] sm:$0xff]   ;;  %v6403_v22 = vld [vmem:[%s7498_s15 + $0xe0] sm:$0xff]  }
 0xa1f   :  { %v6401_v16 = vld [vmem:[%s7498_s15 + $0x98] sm:$0xff]   ;;  %v6404_v18 = vld [vmem:[%s7498_s15 + $0x20] sm:$0xff]  }
 0xa20   :  { %v6405_v26 = vld [vmem:[%s7498_s15 + $0xa0] sm:$0xff]  }
 0xa22   :  { %v4049_v19 = vld [vmem:[#allocation2] sm:$0xf]  ;;  %v4051_v27 = vld [vmem:[#allocation2 + $0x4] sm:$0x1] }
 0xa23   :  { %v4054_v42 = vshrl.u32 %v4049_v19, 16  ;;  %v4057_v12 = vshll.u32 %v4049_v19, 16  ;;  %v4063_v38 = vshll.u32 %v4051_v27, 16  ;;  %v4081_v54 = vld [vmem:[#allocation2] sm:$0xe]  ;;  %v4089_v58 = vrot.slane %v4051_v27, 5 }
 0xa24   :  { %v4050_v29 = vld [vmem:[#allocation2 + $0xc] sm:$0xf]  ;;  %v4052_v30 = vld [vmem:[#allocation2 + $0x10] sm:$0x1]  ;;  %v5243_v57 = vrot.slane %v4081_v54, 9  ;;  %v6409_v27 = vld [vmem:[%s7498_s15 + $0xa8] sm:$0xff]  }
 0xa25   :  { %v4056_v33 = vrot.slane %v4054_v42, 4  ;;  %v4059_v46 = vrot.slane %v4057_v12, 5  ;;  %v4068_v34 = vshrl.u32 %v4050_v29, 16  ;;  %v4071_v36 = vshll.u32 %v4050_v29, 16  ;;  %v4082_v39 = vld [vmem:[#allocation2 + $0xc] sm:$0xe] }
 0xa26   :  { %v5254_v37 = vcombine.low %v4049_v19, %v4050_v29  ;;  %v4077_v49 = vshll.u32 %v4052_v30, 16  ;;  %v4065_v40 = vrot.slane %v4063_v38, 5  ;;  %v5244_v61 = vrot.slane %v4082_v39, 9  ;;  %v6406_v19 = vld [vmem:[%s7498_s15 + $0x68] sm:$0xff]   ;;  %v6410_v29 = vld [vmem:[%s7498_s15 + $0x70] sm:$0xff]   ;;  %v6417_v38 = vld [vmem:[%s7498_s15 + $0xb8] sm:$0xff]  }
 0xa27   :  { %v4070_v9 = vrot.slane %v4068_v34, 4  ;;  %v4073_v35 = vrot.slane %v4071_v36, 5  ;;  %v4060_v17 = vor.u32 %v4059_v46, %v4056_v33  ;;  %v4093_v55 = vrot.slane %v4052_v30, 5  ;;  %v6407_v42 = vld [vmem:[%s7498_s15 + $0xe8] sm:$0xff]   ;;  %v6411_v30 = vld [vmem:[%s7498_s15 + $0xf0] sm:$0xff]   ;;  %v6414_v34 = vld [vmem:[%s7498_s15 + $0x78] sm:$0xff]  }
 0xa28   :  { %6099 = vmatmul.mubr.bf16.vlgmr.msra.gmra.mrb[28].mxu1 %v5254_v37  ;;  %v4079_v43 = vrot.slane %v4077_v49, 5  ;;  %v4090_v62 = vsel %vm6771_vm14, %v5243_v57, %v4089_v58  ;;  %v6408_v12 = vld [vmem:[%s7498_s15 + $0x28] sm:$0xff]   ;;  %v6412_v33 = vld [vmem:[%s7498_s15 + $0x30] sm:$0xff]   ;;  %v6415_v36 = vld [vmem:[%s7498_s15 + $0xf8] sm:$0xff]  }
 0xa29   :  { %v4061_v13 = vrot.slane %v4060_v17, 4  ;;  %v4074_v24 = vor.u32 %v4073_v35, %v4070_v9  ;;  %v4094_v47 = vsel %vm6771_vm14, %v5244_v61, %v4093_v55  ;;  %5574 = vmatpush3.bf16.msra.mxu1 %v6388_v53  ;;  %v6413_v46 = vld [vmem:[%s7498_s15 + $0xb0] sm:$0xff]   ;;  %v6416_v37 = vld [vmem:[%s7498_s15 + $0x38] sm:$0xff]  }
 0xa2a   :  { %v5263_v28 = vcombine.low %v4090_v62, %v4094_v47  ;;  %5575 = vmatprep.subr.bf16.mxu1 %v6390_v60 }
 0xa2b   :  { %v4075_v41 = vrot.slane %v4074_v24, 4  ;;  %v4066_v32 = vsel %vm6750_vm11, %v4061_v13, %v4065_v40 }
 0xa2d   :  { %v4080_v44 = vsel %vm6750_vm11, %v4075_v41, %v4079_v43  ;;  %5576 = vmatpush3.bf16.msra.mxu1 %v6392_v23 }
 0xa2e   :  { %v5245_v45 = vcombine.low %v4066_v32, %v4080_v44  ;;  %5577 = vmatprep.subr.bf16.mxu1 %v6394_v5  ;;  %v5272_v44 = vld [vmem:[%s7497_s14 + $0x3] ss:$0 sm:$0xff] }
 0xa30   :  { %6079 = vmatmul.mubr.bf16.vlgmr.msra.gmra.mrb[28].mxu0 %v5245_v45 }
 0xa31   :  { %6103 = vmatpush3.bf16.msra.mxu0 %v6378_v14  ;;  %6118 = vmatprep.mubr.msk.bf16.mxu0 %vm6500_vm15, %v6499_v11 }
 0xa32   :  { %6104 = vmatprep.subr.bf16.mxu0 %v6499_v11  ;;  %5578 = vmatpush3.bf16.msra.mxu1 %v6396_v8 }
 0xa33   :  { %5579 = vmatprep.subr.bf16.mxu1 %v6398_v1 }
 0xa35   :  { %6105 = vmatpush3.bf16.msra.mxu0 %v6379_v3 }
 0xa36   :  { %6106 = vmatprep.subr.bf16.mxu0 %v6499_v11  ;;  %5580 = vmatpush3.bf16.msra.mxu1 %v6400_v10 }
 0xa37   :  { %5581 = vmatprep.subr.bf16.mxu1 %v6402_v21 }
 0xa39   :  { %6107 = vmatpush3.bf16.msra.mxu0 %v6380_v50 }
 0xa3a   :  { %6108 = vmatprep.subr.bf16.mxu0 %v6499_v11  ;;  %5582 = vmatpush3.bf16.msra.mxu1 %v6404_v18 }
 0xa3b   :  { %5583 = vmatprep.subr.bf16.mxu1 %v6406_v19 }
 0xa3d   :  { %6109 = vmatpush3.bf16.msra.mxu0 %v6381_v48 }
 0xa3e   :  { %6110 = vmatprep.subr.bf16.mxu0 %v6499_v11  ;;  %5584 = vmatpush3.bf16.msra.mxu1 %v6408_v12 }
 0xa3f   :  { %5585 = vmatprep.subr.bf16.mxu1 %v6410_v29 }
 0xa41   :  { %6111 = vmatpush3.bf16.msra.mxu0 %v6382_v20 }
 0xa42   :  { %6112 = vmatprep.subr.bf16.mxu0 %v6499_v11  ;;  %5586 = vmatpush3.bf16.msra.mxu1 %v6412_v33 }
 0xa43   :  { %5587 = vmatprep.subr.bf16.mxu1 %v6414_v34 }
 0xa45   :  { %6113 = vmatpush3.bf16.msra.mxu0 %v6383_v51 }
 0xa46   :  { %6114 = vmatprep.subr.bf16.mxu0 %v6499_v11  ;;  %5588 = vmatpush3.bf16.msra.mxu1 %v6416_v37 }
 0xa47   :  { %6122 = vmatprep.subr.bf16.mxu1 %v6499_v11 }
 0xa49   :  { %6115 = vmatpush3.bf16.msra.mxu0 %v6384_v52 }
 0xa4a   :  { %6116 = vmatprep.subr.bf16.mxu0 %v6499_v11 }
 0xa4d   :  { %6117 = vmatpush3.bf16.msra.mxu0 %v6385_v15 }
 0xa4e   :  { %5595 = vmatprep.subr.bf16.mxu0 %v6387_v0 }
 0xa50   :  { %6119 = vmatmul.mubr.bf16.vlgmr.msra.gmra.mrb[32].mxu0 %v5263_v28 }
 0xa51   :  { %5596 = vmatpush3.bf16.msra.mxu0 %v6389_v2 }
 0xa52   :  { %5597 = vmatprep.subr.bf16.mxu0 %v6391_v63 }
 0xa55   :  { %5598 = vmatpush3.bf16.msra.mxu0 %v6393_v4 }
 0xa56   :  { %5599 = vmatprep.subr.bf16.mxu0 %v6395_v7 }
 0xa59   :  { %5600 = vmatpush3.bf16.msra.mxu0 %v6397_v6 }
 0xa5a   :  { %5601 = vmatprep.subr.bf16.mxu0 %v6399_v25 }
 0xa5d   :  { %5602 = vmatpush3.bf16.msra.mxu0 %v6401_v16 }
 0xa5e   :  { %5603 = vmatprep.subr.bf16.mxu0 %v6403_v22 }
 0xa61   :  { %5604 = vmatpush3.bf16.msra.mxu0 %v6405_v26 }
 0xa62   :  { %5605 = vmatprep.subr.bf16.mxu0 %v6407_v42 }
 0xa65   :  { %5606 = vmatpush3.bf16.msra.mxu0 %v6409_v27 }
 0xa66   :  { %5607 = vmatprep.subr.bf16.mxu0 %v6411_v30 }
 0xa69   :  { %5608 = vmatpush3.bf16.msra.mxu0 %v6413_v46 }
 0xa6a   :  { %5609 = vmatprep.subr.bf16.mxu0 %v6415_v36 }
 0xa6d   :  { %5610 = vmatpush3.bf16.msra.mxu0 %v6417_v38 }
 0xafb   :  { %v4309_v9 = vpop.f32.mrb[28].mxu1 }
 0xafc   :  { %v6100_v35 = vpop.f32.mrb[29].mxu1 }
 0xafd   :  { %v4312_v17 = vpop.f32.mrb[30].mxu1 }
 0xafe   :  { %v6101_v49 = vpop.f32.mrb[31].mxu1 }
 0xb03   :  { %v4214_v13 = vpop.f32.mrb[28].mxu0 }
 0xb04   :  { %v4310_v24 = vadd.f32 %v4309_v9, %v4214_v13  ;;  %v6080_v40 = vpop.f32.mrb[29].mxu0 }
 0xb05   :  { %v4217_v41 = vpop.f32.mrb[30].mxu0 }
 0xb06   :  { %v4313_v43 = vadd.f32 %v4312_v17, %v4217_v41  ;;  %v6081_v32 = vpop.f32.mrb[31].mxu0 }
 0xb23   :  { %v4418_v14 = vpop.f32.mrb[32].mxu0 }
 0xb24   :  { %v4425_v45 = vadd.f32 %v4418_v14, %v4310_v24  ;;  %v6120_v3 = vpop.f32.mrb[33].mxu0 }
 0xb25   :  { %v4421_v50 = vpop.f32.mrb[34].mxu0 }
 0xb26   :  { %v4431_v48 = vadd.f32 %v5272_v44, %v4425_v45  ;;  %v4426_v20 = vadd.f32 %v4421_v50, %v4313_v43  ;;  %v6121_v51 = vpop.f32.mrb[35].mxu0 }
 0xb28   :  { %v4433_v39 = vadd.f32 %v4431_v48, %v7299_v59  ;;  %v4432_v52 = vadd.f32 %v5272_v44, %v4426_v20 }
 0xb2a   :  { %4435 = vst [vmem:[#allocation3] sm:$0xff] %v4433_v39  ;;  %v4434_v54 = vadd.f32 %v4432_v52, %v7306_v56  ;;  %v4455_v61 = vsel %vm4454_vm0, %v4433_v39, -inf  ;;  %v4485_v55 = vsel %vm4484_vm1, %v4433_v39, -inf  ;;  %v4440_v15 = vsel %vm4439_vm2, %v4433_v39, -inf  ;;  %v6418_v52 = vld [vmem:[%s7500_s17] sm:$0xff]  }
 0xb2b   :  { %v4456_v57 = vrot.slane %v4455_v61, 4  ;;  %v4486_v58 = vrot.slane %v4485_v55, 4  ;;  %v4441_v47 = vrot.slane %v4440_v15, 4  ;;  %v4470_v62 = vsel %vm4469_vm3, %v4433_v39, -inf }
 0xb2c   :  { %4436 = vst [vmem:[#allocation3 + $0x8] sm:$0xff] %v4434_v54  ;;  %v4462_v28 = vsel %vm4454_vm0, %v4434_v54, -inf  ;;  %v4492_v59 = vsel %vm4484_vm1, %v4434_v54, -inf  ;;  %v4447_v31 = vsel %vm4439_vm2, %v4434_v54, -inf  ;;  %v4471_v0 = vrot.slane %v4470_v62, 4 }
 0xb2d   :  { %v4457_v56 = vmax.f32 %v4455_v61, %v4456_v57  ;;  %v4463_v53 = vrot.slane %v4462_v28, 4  ;;  %v4487_v2 = vmax.f32 %v4485_v55, %v4486_v58  ;;  %v4493_v60 = vrot.slane %v4492_v59, 4  ;;  %v6420_v57 = vld [vmem:[%s7500_s17 + $0x10] sm:$0xff]   ;;  %v6421_v58 = vld [vmem:[%s7500_s17 + $0x18] sm:$0xff]  }
 0xb2e   :  { %v4442_v63 = vmax.f32 %v4440_v15, %v4441_v47  ;;  %v4448_v23 = vrot.slane %v4447_v31, 4  ;;  %v4472_v4 = vmax.f32 %v4470_v62, %v4471_v0  ;;  %v4477_v5 = vsel %vm4469_vm3, %v4434_v54, -inf  ;;  %v6419_v15 = vld [vmem:[%s7500_s17 + $0x8] sm:$0xff]   ;;  %v5273_v62 = vld [vmem:[%s7499_s16] ss:$0 sm:$0xff]  ;;  %s6501_s16 = smov [#allocation9]  }
 0xb2f   :  { %v4458_v7 = vrot.slane %v4457_v56, 2  ;;  %v4464_v8 = vmax.f32 %v4462_v28, %v4463_v53  ;;  %v4488_v6 = vrot.slane %v4487_v2, 2  ;;  %v4494_v1 = vmax.f32 %v4492_v59, %v4493_v60  ;;  %s4956_s11 = sshll.u32 %s6501_s16, 4  ;;  %s4957_s11 = int_to_ptr.vmem [resolvable:$true] %s4956_s11 }
 0xb30   :  { %v4443_v25 = vrot.slane %v4442_v63, 2  ;;  %v4449_v10 = vmax.f32 %v4447_v31, %v4448_v23  ;;  %v4473_v16 = vrot.slane %v4472_v4, 2  ;;  %v4478_v21 = vrot.slane %v4477_v5, 4  ;;  %s6466_s12 = scalar_lea.vmem %s4957_s11, 32  ;;  %p6471_p3 = scmp.lt.s32.totalorder %s4957_s11, %s4957_s11 }
 0xb31   :  { %v4459_v22 = vmax.f32 %v4457_v56, %v4458_v7  ;;  %v4465_v18 = vrot.slane %v4464_v8, 2  ;;  %v4489_v26 = vmax.f32 %v4487_v2, %v4488_v6  ;;  %v4495_v19 = vrot.slane %v4494_v1, 2  ;;  %v5306_v7 = vld [vmem:[%s7501_s18] ss:$0 sm:$0xff]  ;;  %p6467_p2 = scmp.ne.s32.totalorder %s4957_s11, %s6466_s12  ;;  %p6472_p4 = scmp.lt.s32.totalorder %s6466_s12, %s6466_s12 }
 0xb32   :  { %v4444_v42 = vmax.f32 %v4442_v63, %v4443_v25  ;;  %v4450_v12 = vrot.slane %v4449_v10, 2  ;;  %v4474_v27 = vmax.f32 %v4472_v4, %v4473_v16  ;;  %v4479_v29 = vmax.f32 %v4477_v5, %v4478_v21 }
 0xb33   :  { %v4460_v30 = vrot.slane %v4459_v22, 1  ;;  %v4466_v33 = vmax.f32 %v4464_v8, %v4465_v18  ;;  %v4490_v46 = vrot.slane %v4489_v26, 1  ;;  %v4496_v34 = vmax.f32 %v4494_v1, %v4495_v19  ;;  %p6473_p5 = por %p6472_p4, %p6471_p3 }
 0xb34   :  { %v4445_v36 = vrot.slane %v4444_v42, 1  ;;  %v4451_v37 = vmax.f32 %v4449_v10, %v4450_v12  ;;  %v4480_v38 = vrot.slane %v4479_v29, 2  ;;  %v4475_v17 = vrot.slane %v4474_v27, 1 }
 0xb35   :  { %v4467_v9 = vrot.slane %v4466_v33, 1  ;;  %v4497_v35 = vrot.slane %v4496_v34, 1  ;;  %v4461_v24 = vmax.f32 %v4459_v22, %v4460_v30  ;;  %v4491_v41 = vmax.f32 %v4489_v26, %v4490_v46  ;;  %p6474_p6 = pnand %p6473_p5, %p6467_p2 }
 0xb36   :  { %v4452_v49 = vrot.slane %v4451_v37, 1  ;;  %v4481_v13 = vmax.f32 %v4479_v29, %v4480_v38  ;;  %v4446_v32 = vmax.f32 %v4444_v42, %v4445_v36  ;;  %v4476_v50 = vmax.f32 %v4474_v27, %v4475_v17 }
 0xb37   :  { %v4468_v40 = vmax.f32 %v4466_v33, %v4467_v9  ;;  %v4498_v43 = vmax.f32 %v4496_v34, %v4497_v35 }
 0xb38   :  { %v4453_v44 = vmax.f32 %v4451_v37, %v4452_v49  ;;  %v4482_v14 = vrot.slane %v4481_v13, 1 }
 0xb39   :  { %v4506_v45 = vsel %vm4501_vm4, %v4468_v40, %v4461_v24  ;;  %v4514_v3 = vsel %vm4501_vm4, %v4498_v43, %v4491_v41 }
 0xb3a   :  { %v4517_v48 = vpack.c.bf16 %v4506_v45, %v4506_v45  ;;  %v4519_v20 = vpack.c.bf16 %v4514_v3, %v4514_v3  ;;  %v4502_v51 = vsel %vm4501_vm4, %v4453_v44, %v4446_v32  ;;  %v4483_v39 = vmax.f32 %v4481_v13, %v4482_v14 }
 0xb3b   :  { %v4516_v54 = vpack.c.bf16 %v4502_v51, %v4502_v51 }
 0xb3c   :  { %4815 = vmatprep.mubr.bf16.mxu1 %v4517_v48  ;;  %4855 = vmatprep.mubr.bf16.mxu0 %v4519_v20  ;;  %v4510_v61 = vsel %vm4501_vm4, %v4483_v39, %v4476_v50 }
 0xb3d   :  { %4816 = vmatmul.mubr.bf16.vlgmr.msra.gmra.mrb[32].mxu1 %v4516_v54  ;;  %v4518_v55 = vpack.c.bf16 %v4510_v61, %v4510_v61 }
 0xb3e   :  { %6123 = vmatpush3.bf16.msra.mxu1 %v6418_v52  ;;  %6130 = vmatprep.mubr.msk.bf16.mxu1 %vm6500_vm15, %v6499_v11 }
 0xb3f   :  { %4856 = vmatmul.mubr.bf16.vlgmr.msra.gmra.mrb[36].mxu0 %v4518_v55  ;;  %6124 = vmatprep.subr.bf16.mxu1 %v6499_v11 }
 0xb42   :  { %6125 = vmatpush3.bf16.msra.mxu1 %v6419_v15 }
 0xb43   :  { %6126 = vmatprep.subr.bf16.mxu1 %v6499_v11 }
 0xb46   :  { %6127 = vmatpush3.bf16.msra.mxu1 %v6420_v57 }
 0xb47   :  { %6128 = vmatprep.subr.bf16.mxu1 %v6499_v11 }
 0xb4a   :  { %6129 = vmatpush3.bf16.msra.mxu1 %v6421_v58 }
 0xc10   :  { %v5589_v47 = vpop.f32.mrb[32].mxu1 }
 0xc11   :  { %v5590_v28 = vpop.f32.mrb[33].mxu1 }
 0xc12   :  { %v5611_v59 = vpop.f32.mrb[36].mxu0  ;;  %v5591_v31 = vadd.f32 %v5590_v28, %v5589_v47  ;;  %v5592_v0 = vpop.f32.mrb[34].mxu1 }
 0xc13   :  { %v5612_v56 = vpop.f32.mrb[37].mxu0  ;;  %v5593_v53 = vpop.f32.mrb[35].mxu1 }
 0xc14   :  { %v4818_v2 = vadd.f32 %v5591_v31, %v5273_v62  ;;  %v5613_v60 = vadd.f32 %v5612_v56, %v5611_v59  ;;  %v5614_v63 = vpop.f32.mrb[38].mxu0 }
 0xc15   :  { %v5615_v11 = vpop.f32.mrb[39].mxu0 }
 0xc16   :  { %v4858_v23 = vadd.f32 %v5613_v60, %v4818_v2 }
 0xc18   :  { %v4863_v4 = vmax.f32 %v4858_v23, 0.0 }
 0xc1a   :  { %v4864_v5 = vpack.c.bf16 %v4863_v4, %v4863_v4 }
 0xc1c   :  { %6131 = vmatmul.mubr.msk.bf16.vlgmr.msra.gmra.mrb[36].mxu1 %vm4904_vm5, %v4864_v5 }
 0xcef   :  { %v4942_v8 = vpop.f32.mrb[36].mxu1 }
 0xcf0   :  { %v4943_v6 = vadd.f32 %v5306_v7, %v4942_v8  ;;  %v6132_v1 = vpop.f32.mrb[37].mxu1 }
 0xcf1   :  { %v4945_v25 = vpop.f32.mrb[38].mxu1 }
 0xcf2   :  { %v6133_v10 = vpop.f32.mrb[39].mxu1  ;;  %4949 = vst.msk [vmem:[#allocation9] sm:$0x3] %vm4948_vm6, %v4943_v6 }
 0xcf3   :  { %6477 = shalt.err (!%p6474_p6)
}
 0xcf4   :  { %s6478_s18 = scalar_lea.hbm %s7502_s19, 32 }
 0xcf5   :  { %p6479_p7 = scmp.ne.s32.totalorder %s7502_s19, %s6478_s18  ;;  %p6482_p8 = scmp.lt.u32.totalorder %s6478_s18, %s7502_s19 }
 0xcf7   :  { %p6484_p9 = pnand %p6482_p8, %p6479_p7 }
 0xcf9   :  { %6487 = shalt.err (!%p6484_p9)
}
 0xcfa   :  { %4959 = dma.vmem_to_hbm [thread:$0]  %s4957_s11, 32, %s7502_s19, [#allocation6]  }
 0xcfb   :  { %6492 = dma.done.wait [#allocation6], 32  }
 0xcfc   :  { %6493 = vsyncadd [#allocation6], 4294967264 }
 0xcfd   :  { %4963 = vsyncpa [#allocation5], 1 }
 0xcfe   :  { %4964 = vsyncpa [#allocation8], 1 }
 0xcff   :  { %4965 = vsyncpa [#allocation6], 1 }

</bundles_post_ra>
